<compile_context>
chip_gen: v5e
topology: v5e:2x2
jax: 0.10.0
libtpu: 0.0.40
codegen_flags: <defaults>
</compile_context>

<pallas_src>
import functools

import jax
import jax.numpy as jnp
from jax.experimental import pallas as pl
from jax.experimental.pallas import tpu as pltpu

LANE = 128  # pad channel/class dims to multiples of this for lane-dense stores


# ----------------------------------------------------------------------------
# Pallas kernels
# ----------------------------------------------------------------------------
def _conv3x3_relu_kernel(x_ref, w_ref, b_ref, o_ref, *, H, W, Wp):
    """Fused 3x3 SAME conv + bias + ReLU for one image.

    x_ref: (1, Hp*Wp, Cin)  bf16   zero-padded image, rows flattened i*Wp + j
    w_ref: (9, Cin, Cout)   bf16   taps ordered k = dy*3 + dx
    b_ref: (1, Cout)        f32
    o_ref: (1, H, W, Cout)  bf16
    """
    x2 = x_ref[0]                                   # (Hp*Wp, Cin)
    Cout = w_ref.shape[2]
    L = (H - 1) * Wp + W                            # max valid row + 1
    acc = jnp.zeros((L, Cout), jnp.float32)
    for k in range(9):                              # unrolled: 9 MXU dots
        dy, dx = divmod(k, 3)
        off = dy * Wp + dx
        acc = acc + jnp.dot(x2[off:off + L, :], w_ref[k],
                            preferred_element_type=jnp.float32)
    acc = jnp.maximum(acc + b_ref[...], 0.0)        # f32 epilogue (v5e-safe)
    # Valid output rows are r = h*Wp + w with w < W; store row-block per h.
    for h in range(H):
        o_ref[0, h] = acc[h * Wp:h * Wp + W, :].astype(o_ref.dtype)


def _conv3x3_pool_pred_kernel(x_ref, w_ref, b_ref, wp_ref, bp_ref, o_ref,
                              *, H, W, Wp):
    """Fused conv3 + ReLU + AdaptiveAvgPool over H + Linear pred head.

    x_ref : (1, Hp*Wp, Cin) bf16
    w_ref : (9, Cin, C)     bf16    b_ref : (1, C)  f32
    wp_ref: (C, NCp)        bf16    bp_ref: (1, NCp) f32
    o_ref : (1, W, NCp)     f32     logits (sequence dim = W)
    """
    x2 = x_ref[0]
    C = w_ref.shape[2]
    L = (H - 1) * Wp + W
    acc = jnp.zeros((L, C), jnp.float32)
    for k in range(9):
        dy, dx = divmod(k, 3)
        off = dy * Wp + dx
        acc = acc + jnp.dot(x2[off:off + L, :], w_ref[k],
                            preferred_element_type=jnp.float32)
    feats = jnp.maximum(acc + b_ref[...], 0.0)      # (L, C) f32, never stored
    # mean over H: sum the H valid row-blocks (rows h*Wp .. h*Wp+W-1)
    pooled = feats[0:W, :]
    for h in range(1, H):
        pooled = pooled + feats[h * Wp:h * Wp + W, :]
    pooled = pooled * (1.0 / H)                     # (W, C)
    logits = jnp.dot(pooled.astype(wp_ref.dtype), wp_ref[...],
                     preferred_element_type=jnp.float32) + bp_ref[...]
    o_ref[0] = logits.astype(o_ref.dtype)


# ----------------------------------------------------------------------------
# pallas_call wrappers
# ----------------------------------------------------------------------------
def conv3x3_relu(x_nhwc, w9, b):
    """x:(N,H,W,Cin) bf16, w9:(9,Cin,Cout) bf16, b:(Cout,) f32 -> (N,H,W,Cout) bf16."""
    N, H, W, Cin = x_nhwc.shape
    Cout = w9.shape[2]
    Hp, Wp = H + 2, W + 2
    xp = jnp.pad(x_nhwc, ((0, 0), (1, 1), (1, 1), (0, 0))).reshape(N, Hp * Wp, Cin)
    kern = functools.partial(_conv3x3_relu_kernel, H=H, W=W, Wp=Wp)
    # NOTE: each grid step processes a whole image (small OCR crops); for large
    # images this would tile over output-row blocks (with a 2-row halo).
    return pl.pallas_call(
        kern,
        out_shape=jax.ShapeDtypeStruct((N, H, W, Cout), jnp.bfloat16),
        grid=(N,),
        in_specs=[
            pl.BlockSpec((1, Hp * Wp, Cin), lambda n: (n, 0, 0)),
            pl.BlockSpec((9, Cin, Cout), lambda n: (0, 0, 0)),
            pl.BlockSpec((1, Cout), lambda n: (0, 0)),
        ],
        out_specs=pl.BlockSpec((1, H, W, Cout), lambda n: (n, 0, 0, 0)),
        compiler_params=pltpu.CompilerParams(
            dimension_semantics=("parallel",)),
    )(xp, w9, b.reshape(1, Cout))


def conv3x3_pool_pred(x_nhwc, w9, b, wp, bp):
    """Fused conv3+ReLU+avgpool(H)+Linear.  Returns logits (N, W, NCp) f32."""
    N, H, W, Cin = x_nhwc.shape
    C = w9.shape[2]
    NCp = wp.shape[1]
    Hp, Wp = H + 2, W + 2
    xp = jnp.pad(x_nhwc, ((0, 0), (1, 1), (1, 1), (0, 0))).reshape(N, Hp * Wp, Cin)
    kern = functools.partial(_conv3x3_pool_pred_kernel, H=H, W=W, Wp=Wp)
    return pl.pallas_call(
        kern,
        out_shape=jax.ShapeDtypeStruct((N, W, NCp), jnp.float32),
        grid=(N,),
        in_specs=[
            pl.BlockSpec((1, Hp * Wp, Cin), lambda n: (n, 0, 0)),
            pl.BlockSpec((9, Cin, C), lambda n: (0, 0, 0)),
            pl.BlockSpec((1, C), lambda n: (0, 0)),
            pl.BlockSpec((C, NCp), lambda n: (0, 0)),
            pl.BlockSpec((1, NCp), lambda n: (0, 0)),
        ],
        out_specs=pl.BlockSpec((1, W, NCp), lambda n: (n, 0, 0)),
        compiler_params=pltpu.CompilerParams(
            dimension_semantics=("parallel",)),
    )(xp, w9, b.reshape(1, C), wp, bp.reshape(1, NCp))


# ----------------------------------------------------------------------------
# JAX glue (maxpool, label encoding, params)
# ----------------------------------------------------------------------------
def maxpool2x2(x_nhwc):
    N, H, W, C = x_nhwc.shape
    return x_nhwc.reshape(N, H // 2, 2, W // 2, 2, C).max(axis=(2, 4))


def encode_labels(texts, alphabet, max_seq_len):
    """Deterministic CTC-style encode: char index + 1 (0 = blank), padded."""
    table = {ch: i + 1 for i, ch in enumerate(alphabet)}
    labels, lengths = [], []
    for t in texts:
        idx = [table[ch] for ch in t]
        lengths.append(len(idx))
        labels.append(idx + [0] * (max_seq_len - len(idx)))
    return jnp.asarray(labels, jnp.int32), jnp.asarray(lengths, jnp.int32)


def init_params(key):
    ks = jax.random.split(key, 8)
    s = 0.1
    return {
        "w1": jax.random.normal(ks[0], (3, 3, 3, 32), jnp.float32) * s,
        "b1": jax.random.normal(ks[1], (32,), jnp.float32) * s,
        "w2": jax.random.normal(ks[2], (3, 3, 32, 64), jnp.float32) * s,
        "b2": jax.random.normal(ks[3], (64,), jnp.float32) * s,
        "w3": jax.random.normal(ks[4], (3, 3, 64, 256), jnp.float32) * s,
        "b3": jax.random.normal(ks[5], (256,), jnp.float32) * s,
        # nn.Linear(256, num_classes), stored as (256, ncls)
        "wp": jax.random.normal(ks[6], (256, NUM_CLASSES), jnp.float32) * s,
        "bp": jax.random.normal(ks[7], (NUM_CLASSES,), jnp.float32) * s,
    }


def _pad_axis(a, axis, new_size):
    pad = [(0, 0)] * a.ndim
    pad[axis] = (0, new_size - a.shape[axis])
    return jnp.pad(a, pad)


def _round_up(n, m):
    return ((n + m - 1) // m) * m


def prepare_params(params):
    """Pad channel/class dims to multiples of 128 and cast MXU operands to bf16.

    Zero-padded output channels stay exactly 0 through bias+ReLU, and padded
    input channels have zero weights, so the math is unchanged.
    """
    c1 = _round_up(32, LANE)
    c2 = _round_up(64, LANE)
    c3 = 256                       # already a multiple of 128
    ncp = _round_up(NUM_CLASSES, LANE)

    w1 = _pad_axis(params["w1"], 3, c1)                       # (3,3,3,128)
    w2 = _pad_axis(_pad_axis(params["w2"], 2, c1), 3, c2)     # (3,3,128,128)
    w3 = _pad_axis(params["w3"], 2, c2)                       # (3,3,128,256)
    wp = _pad_axis(params["wp"], 1, ncp)                      # (256,128)

    def w9(w):
        return w.reshape(9, w.shape[2], w.shape[3]).astype(jnp.bfloat16)

    return {
        "w1": w9(w1), "b1": _pad_axis(params["b1"], 0, c1).astype(jnp.float32),
        "w2": w9(w2), "b2": _pad_axis(params["b2"], 0, c2).astype(jnp.float32),
        "w3": w9(w3), "b3": params["b3"].astype(jnp.float32),
        "wp": wp.astype(jnp.bfloat16),
        "bp": _pad_axis(params["bp"], 0, ncp).astype(jnp.float32),
    }


@jax.jit
def _ocr_forward_arrays(p, images_nchw):
    x = jnp.transpose(images_nchw, (0, 2, 3, 1)).astype(jnp.bfloat16)  # NHWC
    # --- feature extractor (stand-in for ResNet_FeatureExtractor_Small) ---
    x = conv3x3_relu(x, p["w1"], p["b1"])
    x = maxpool2x2(x)                                   # (N, H/2, W/2, 128)
    x = conv3x3_relu(x, p["w2"], p["b2"])
    x = maxpool2x2(x)                                   # (N, H/4, W/4, 128)
    # --- conv3 + AdaptiveAvgPool2d((None,1)) over H + Linear pred, fused ---
    logits_p = conv3x3_pool_pred(x, p["w3"], p["b3"], p["wp"], p["bp"])
    return logits_p[..., :NUM_CLASSES]                  # drop class padding


def ocr_forward(prepped, images_nchw, texts, alphabet, max_seq_len=32):
    """Mirrors OCR.forward: returns (logits (N, W', num_classes), labels, lengths)."""
    N, _, H, W = images_nchw.shape
    assert H % 4 == 0 and W % 4 == 0, "stand-in backbone needs H, W % 4 == 0"
    labels, lengths = encode_labels(texts, alphabet, max_seq_len)
    logits = _ocr_forward_arrays(prepped, images_nchw)
    return logits, labels, lengths


# ----------------------------------------------------------------------------
# XLA reference of the same (bf16-operand / f32-accumulate) computation
# ----------------------------------------------------------------------------
def _reference_forward(p, images_nchw):
    def conv(x, w9, b):
        w = w9.reshape(3, 3, w9.shape[1], w9.shape[2])
        y = jax.lax.conv_general_dilated(
            x, w, (1, 1), "SAME",
            dimension_numbers=("NHWC", "HWIO", "NHWC"),
            preferred_element_type=jnp.float32)
        return jnp.maximum(y + b, 0.0)

    x = jnp.transpose(images_nchw, (0, 2, 3, 1)).astype(jnp.bfloat16)
    x = maxpool2x2(conv(x, p["w1"], p["b1"]).astype(jnp.bfloat16))
    x = maxpool2x2(conv(x, p["w2"], p["b2"]).astype(jnp.bfloat16))
    f = conv(x, p["w3"], p["b3"])                       # (N, H/4, W/4, 256) f32
    pooled = jnp.mean(f, axis=1)                        # mean over H -> (N, W', 256)
    logits = jnp.dot(pooled.astype(jnp.bfloat16), p["wp"],
                     preferred_element_type=jnp.float32) + p["bp"]
    return logits[..., :NUM_CLASSES]


# ----------------------------------------------------------------------------
# main
# ----------------------------------------------------------------------------
ALPHABET = "0123456789"
NUM_CLASSES = len(ALPHABET) + 1   # len(converter.character) = alphabet + blank

if __name__ == "__main__":
    key = jax.random.PRNGKey(0)
    k_img, k_par = jax.random.split(key)

    # images: (N, 3, H, W) as the PyTorch module expects (NCHW)
    images = jax.random.normal(k_img, (2, 3, 16, 16), jnp.float32)
    texts = ["123", "4567"]

    params = init_params(k_par)
    prepped = prepare_params(params)

    logits, labels, lengths = ocr_forward(prepped, images, texts, ALPHABET,
                                          max_seq_len=32)
    jax.block_until_ready(logits)
    jax.block_until_ready(labels)
    jax.block_until_ready(lengths)

    assert logits.shape == (2, 4, NUM_CLASSES), logits.shape
    assert labels.shape == (2, 32), labels.shape
    assert lengths.shape == (2,), lengths.shape

    # numerical check against an XLA implementation of the same computation
    ref = _reference_forward(prepped, images)
    max_err = float(jnp.max(jnp.abs(logits - ref)))
    assert max_err < 2e-1, f"Pallas/XLA mismatch, max abs err {max_err}"

    print("KERNEL_OK")
</pallas_src>

<mosaic_0001>
module attributes {stable_mosaic.version = 11 : i64} {
  func.func @_conv3x3_relu_kernel(%arg0: i32, %arg1: memref<1x324x3xbf16, #tpu.memory_space<vmem>>, %arg2: memref<9x3x128xbf16, #tpu.memory_space<vmem>>, %arg3: memref<1x128xf32, #tpu.memory_space<vmem>>, %arg4: memref<1x16x16x128xbf16, #tpu.memory_space<vmem>>) attributes {dimension_semantics = [#tpu.dimension_semantics<parallel>], iteration_bounds = array<i64: 2>, scalar_prefetch = 0 : i64, scratch_operands = 0 : i64, tpu.core_type = #tpu.core_type<tc>, window_params = [{transform_indices = @transform_0, window_bounds = array<i64: 1, 324, 3>}, {pipeline_mode = #tpu.pipeline_mode<synchronous>, transform_indices = @transform_1, window_bounds = array<i64: 9, 3, 128>}, {pipeline_mode = #tpu.pipeline_mode<synchronous>, transform_indices = @transform_2, window_bounds = array<i64: 1, 128>}, {transform_indices = @transform_3, window_bounds = array<i64: 1, 16, 16, 128>}]} {
    %c0 = arith.constant 0 : index
    %c0_0 = arith.constant 0 : index
    %c0_1 = arith.constant 0 : index
    %0 = vector.load %arg1[%c0, %c0_0, %c0_1] : memref<1x324x3xbf16, #tpu.memory_space<vmem>>, vector<1x324x3xbf16>
    %1 = vector.shape_cast %0 : vector<1x324x3xbf16> to vector<324x3xbf16>
    %cst = arith.constant 0.000000e+00 : f32
    %2 = vector.broadcast %cst : f32 to vector<286x128xf32>
    %3 = vector.extract_strided_slice %1 {offsets = [0, 0], sizes = [286, 3], strides = [1, 1]} : vector<324x3xbf16> to vector<286x3xbf16>
    %c0_2 = arith.constant 0 : index
    %c0_3 = arith.constant 0 : index
    %c0_4 = arith.constant 0 : index
    %4 = vector.load %arg2[%c0_2, %c0_3, %c0_4] : memref<9x3x128xbf16, #tpu.memory_space<vmem>>, vector<1x3x128xbf16>
    %5 = vector.shape_cast %4 : vector<1x3x128xbf16> to vector<3x128xbf16>
    %cst_5 = arith.constant dense<0.000000e+00> : vector<286x128xf32>
    %6 = tpu.matmul %3, %5, %cst_5 {dimension_numbers = #tpu.dot_dimension_numbers<[1], [0], [0], [1], [0, 0, 1, 1], [], []>} : vector<286x3xbf16>, vector<3x128xbf16>, vector<286x128xf32> -> vector<286x128xf32>
    %7 = arith.addf %2, %6 : vector<286x128xf32>
    %8 = vector.extract_strided_slice %1 {offsets = [1, 0], sizes = [286, 3], strides = [1, 1]} : vector<324x3xbf16> to vector<286x3xbf16>
    %c1 = arith.constant 1 : index
    %c0_6 = arith.constant 0 : index
    %c0_7 = arith.constant 0 : index
    %9 = vector.load %arg2[%c1, %c0_6, %c0_7] : memref<9x3x128xbf16, #tpu.memory_space<vmem>>, vector<1x3x128xbf16>
    %10 = vector.shape_cast %9 : vector<1x3x128xbf16> to vector<3x128xbf16>
    %cst_8 = arith.constant dense<0.000000e+00> : vector<286x128xf32>
    %11 = tpu.matmul %8, %10, %cst_8 {dimension_numbers = #tpu.dot_dimension_numbers<[1], [0], [0], [1], [0, 0, 1, 1], [], []>} : vector<286x3xbf16>, vector<3x128xbf16>, vector<286x128xf32> -> vector<286x128xf32>
    %12 = arith.addf %7, %11 : vector<286x128xf32>
    %13 = vector.extract_strided_slice %1 {offsets = [2, 0], sizes = [286, 3], strides = [1, 1]} : vector<324x3xbf16> to vector<286x3xbf16>
    %c2 = arith.constant 2 : index
    %c0_9 = arith.constant 0 : index
    %c0_10 = arith.constant 0 : index
    %14 = vector.load %arg2[%c2, %c0_9, %c0_10] : memref<9x3x128xbf16, #tpu.memory_space<vmem>>, vector<1x3x128xbf16>
    %15 = vector.shape_cast %14 : vector<1x3x128xbf16> to vector<3x128xbf16>
    %cst_11 = arith.constant dense<0.000000e+00> : vector<286x128xf32>
    %16 = tpu.matmul %13, %15, %cst_11 {dimension_numbers = #tpu.dot_dimension_numbers<[1], [0], [0], [1], [0, 0, 1, 1], [], []>} : vector<286x3xbf16>, vector<3x128xbf16>, vector<286x128xf32> -> vector<286x128xf32>
    %17 = arith.addf %12, %16 : vector<286x128xf32>
    %18 = vector.extract_strided_slice %1 {offsets = [18, 0], sizes = [286, 3], strides = [1, 1]} : vector<324x3xbf16> to vector<286x3xbf16>
    %c3 = arith.constant 3 : index
    %c0_12 = arith.constant 0 : index
    %c0_13 = arith.constant 0 : index
    %19 = vector.load %arg2[%c3, %c0_12, %c0_13] : memref<9x3x128xbf16, #tpu.memory_space<vmem>>, vector<1x3x128xbf16>
    %20 = vector.shape_cast %19 : vector<1x3x128xbf16> to vector<3x128xbf16>
    %cst_14 = arith.constant dense<0.000000e+00> : vector<286x128xf32>
    %21 = tpu.matmul %18, %20, %cst_14 {dimension_numbers = #tpu.dot_dimension_numbers<[1], [0], [0], [1], [0, 0, 1, 1], [], []>} : vector<286x3xbf16>, vector<3x128xbf16>, vector<286x128xf32> -> vector<286x128xf32>
    %22 = arith.addf %17, %21 : vector<286x128xf32>
    %23 = vector.extract_strided_slice %1 {offsets = [19, 0], sizes = [286, 3], strides = [1, 1]} : vector<324x3xbf16> to vector<286x3xbf16>
    %c4 = arith.constant 4 : index
    %c0_15 = arith.constant 0 : index
    %c0_16 = arith.constant 0 : index
    %24 = vector.load %arg2[%c4, %c0_15, %c0_16] : memref<9x3x128xbf16, #tpu.memory_space<vmem>>, vector<1x3x128xbf16>
    %25 = vector.shape_cast %24 : vector<1x3x128xbf16> to vector<3x128xbf16>
    %cst_17 = arith.constant dense<0.000000e+00> : vector<286x128xf32>
    %26 = tpu.matmul %23, %25, %cst_17 {dimension_numbers = #tpu.dot_dimension_numbers<[1], [0], [0], [1], [0, 0, 1, 1], [], []>} : vector<286x3xbf16>, vector<3x128xbf16>, vector<286x128xf32> -> vector<286x128xf32>
    %27 = arith.addf %22, %26 : vector<286x128xf32>
    %28 = vector.extract_strided_slice %1 {offsets = [20, 0], sizes = [286, 3], strides = [1, 1]} : vector<324x3xbf16> to vector<286x3xbf16>
    %c5 = arith.constant 5 : index
    %c0_18 = arith.constant 0 : index
    %c0_19 = arith.constant 0 : index
    %29 = vector.load %arg2[%c5, %c0_18, %c0_19] : memref<9x3x128xbf16, #tpu.memory_space<vmem>>, vector<1x3x128xbf16>
    %30 = vector.shape_cast %29 : vector<1x3x128xbf16> to vector<3x128xbf16>
    %cst_20 = arith.constant dense<0.000000e+00> : vector<286x128xf32>
    %31 = tpu.matmul %28, %30, %cst_20 {dimension_numbers = #tpu.dot_dimension_numbers<[1], [0], [0], [1], [0, 0, 1, 1], [], []>} : vector<286x3xbf16>, vector<3x128xbf16>, vector<286x128xf32> -> vector<286x128xf32>
    %32 = arith.addf %27, %31 : vector<286x128xf32>
    %33 = vector.extract_strided_slice %1 {offsets = [36, 0], sizes = [286, 3], strides = [1, 1]} : vector<324x3xbf16> to vector<286x3xbf16>
    %c6 = arith.constant 6 : index
    %c0_21 = arith.constant 0 : index
    %c0_22 = arith.constant 0 : index
    %34 = vector.load %arg2[%c6, %c0_21, %c0_22] : memref<9x3x128xbf16, #tpu.memory_space<vmem>>, vector<1x3x128xbf16>
    %35 = vector.shape_cast %34 : vector<1x3x128xbf16> to vector<3x128xbf16>
    %cst_23 = arith.constant dense<0.000000e+00> : vector<286x128xf32>
    %36 = tpu.matmul %33, %35, %cst_23 {dimension_numbers = #tpu.dot_dimension_numbers<[1], [0], [0], [1], [0, 0, 1, 1], [], []>} : vector<286x3xbf16>, vector<3x128xbf16>, vector<286x128xf32> -> vector<286x128xf32>
    %37 = arith.addf %32, %36 : vector<286x128xf32>
    %38 = vector.extract_strided_slice %1 {offsets = [37, 0], sizes = [286, 3], strides = [1, 1]} : vector<324x3xbf16> to vector<286x3xbf16>
    %c7 = arith.constant 7 : index
    %c0_24 = arith.constant 0 : index
    %c0_25 = arith.constant 0 : index
    %39 = vector.load %arg2[%c7, %c0_24, %c0_25] : memref<9x3x128xbf16, #tpu.memory_space<vmem>>, vector<1x3x128xbf16>
    %40 = vector.shape_cast %39 : vector<1x3x128xbf16> to vector<3x128xbf16>
    %cst_26 = arith.constant dense<0.000000e+00> : vector<286x128xf32>
    %41 = tpu.matmul %38, %40, %cst_26 {dimension_numbers = #tpu.dot_dimension_numbers<[1], [0], [0], [1], [0, 0, 1, 1], [], []>} : vector<286x3xbf16>, vector<3x128xbf16>, vector<286x128xf32> -> vector<286x128xf32>
    %42 = arith.addf %37, %41 : vector<286x128xf32>
    %43 = vector.extract_strided_slice %1 {offsets = [38, 0], sizes = [286, 3], strides = [1, 1]} : vector<324x3xbf16> to vector<286x3xbf16>
    %c8 = arith.constant 8 : index
    %c0_27 = arith.constant 0 : index
    %c0_28 = arith.constant 0 : index
    %44 = vector.load %arg2[%c8, %c0_27, %c0_28] : memref<9x3x128xbf16, #tpu.memory_space<vmem>>, vector<1x3x128xbf16>
    %45 = vector.shape_cast %44 : vector<1x3x128xbf16> to vector<3x128xbf16>
    %cst_29 = arith.constant dense<0.000000e+00> : vector<286x128xf32>
    %46 = tpu.matmul %43, %45, %cst_29 {dimension_numbers = #tpu.dot_dimension_numbers<[1], [0], [0], [1], [0, 0, 1, 1], [], []>} : vector<286x3xbf16>, vector<3x128xbf16>, vector<286x128xf32> -> vector<286x128xf32>
    %47 = arith.addf %42, %46 : vector<286x128xf32>
    %c0_30 = arith.constant 0 : index
    %c0_31 = arith.constant 0 : index
    %48 = vector.load %arg3[%c0_30, %c0_31] : memref<1x128xf32, #tpu.memory_space<vmem>>, vector<1x128xf32>
    %49 = vector.broadcast %48 : vector<1x128xf32> to vector<286x128xf32>
    %50 = arith.addf %47, %49 : vector<286x128xf32>
    %cst_32 = arith.constant 0.000000e+00 : f32
    %51 = vector.broadcast %cst_32 : f32 to vector<286x128xf32>
    %52 = arith.maximumf %50, %51 : vector<286x128xf32>
    %53 = vector.extract_strided_slice %52 {offsets = [0, 0], sizes = [16, 128], strides = [1, 1]} : vector<286x128xf32> to vector<16x128xf32>
    %54 = arith.truncf %53 : vector<16x128xf32> to vector<16x128xbf16>
    %c0_33 = arith.constant 0 : index
    %c0_34 = arith.constant 0 : index
    %c0_35 = arith.constant 0 : index
    %c0_36 = arith.constant 0 : index
    %55 = vector.load %arg4[%c0_33, %c0_34, %c0_35, %c0_36] : memref<1x16x16x128xbf16, #tpu.memory_space<vmem>>, vector<1x1x16x128xbf16>
    %56 = vector.shape_cast %55 : vector<1x1x16x128xbf16> to vector<16x128xbf16>
    %57 = vector.shape_cast %54 : vector<16x128xbf16> to vector<1x1x16x128xbf16>
    tpu.vector_store %arg4[%c0_33, %c0_34, %c0_35, %c0_36], %57 {strides = array<i32>} : memref<1x16x16x128xbf16, #tpu.memory_space<vmem>>, vector<1x1x16x128xbf16>,
    %58 = vector.extract_strided_slice %52 {offsets = [18, 0], sizes = [16, 128], strides = [1, 1]} : vector<286x128xf32> to vector<16x128xf32>
    %59 = arith.truncf %58 : vector<16x128xf32> to vector<16x128xbf16>
    %c0_37 = arith.constant 0 : index
    %c1_38 = arith.constant 1 : index
    %c0_39 = arith.constant 0 : index
    %c0_40 = arith.constant 0 : index
    %60 = vector.load %arg4[%c0_37, %c1_38, %c0_39, %c0_40] : memref<1x16x16x128xbf16, #tpu.memory_space<vmem>>, vector<1x1x16x128xbf16>
    %61 = vector.shape_cast %60 : vector<1x1x16x128xbf16> to vector<16x128xbf16>
    %62 = vector.shape_cast %59 : vector<16x128xbf16> to vector<1x1x16x128xbf16>
    tpu.vector_store %arg4[%c0_37, %c1_38, %c0_39, %c0_40], %62 {strides = array<i32>} : memref<1x16x16x128xbf16, #tpu.memory_space<vmem>>, vector<1x1x16x128xbf16>,
    %63 = vector.extract_strided_slice %52 {offsets = [36, 0], sizes = [16, 128], strides = [1, 1]} : vector<286x128xf32> to vector<16x128xf32>
    %64 = arith.truncf %63 : vector<16x128xf32> to vector<16x128xbf16>
    %c0_41 = arith.constant 0 : index
    %c2_42 = arith.constant 2 : index
    %c0_43 = arith.constant 0 : index
    %c0_44 = arith.constant 0 : index
    %65 = vector.load %arg4[%c0_41, %c2_42, %c0_43, %c0_44] : memref<1x16x16x128xbf16, #tpu.memory_space<vmem>>, vector<1x1x16x128xbf16>
    %66 = vector.shape_cast %65 : vector<1x1x16x128xbf16> to vector<16x128xbf16>
    %67 = vector.shape_cast %64 : vector<16x128xbf16> to vector<1x1x16x128xbf16>
    tpu.vector_store %arg4[%c0_41, %c2_42, %c0_43, %c0_44], %67 {strides = array<i32>} : memref<1x16x16x128xbf16, #tpu.memory_space<vmem>>, vector<1x1x16x128xbf16>,
    %68 = vector.extract_strided_slice %52 {offsets = [54, 0], sizes = [16, 128], strides = [1, 1]} : vector<286x128xf32> to vector<16x128xf32>
    %69 = arith.truncf %68 : vector<16x128xf32> to vector<16x128xbf16>
    %c0_45 = arith.constant 0 : index
    %c3_46 = arith.constant 3 : index
    %c0_47 = arith.constant 0 : index
    %c0_48 = arith.constant 0 : index
    %70 = vector.load %arg4[%c0_45, %c3_46, %c0_47, %c0_48] : memref<1x16x16x128xbf16, #tpu.memory_space<vmem>>, vector<1x1x16x128xbf16>
    %71 = vector.shape_cast %70 : vector<1x1x16x128xbf16> to vector<16x128xbf16>
    %72 = vector.shape_cast %69 : vector<16x128xbf16> to vector<1x1x16x128xbf16>
    tpu.vector_store %arg4[%c0_45, %c3_46, %c0_47, %c0_48], %72 {strides = array<i32>} : memref<1x16x16x128xbf16, #tpu.memory_space<vmem>>, vector<1x1x16x128xbf16>,
    %73 = vector.extract_strided_slice %52 {offsets = [72, 0], sizes = [16, 128], strides = [1, 1]} : vector<286x128xf32> to vector<16x128xf32>
    %74 = arith.truncf %73 : vector<16x128xf32> to vector<16x128xbf16>
    %c0_49 = arith.constant 0 : index
    %c4_50 = arith.constant 4 : index
    %c0_51 = arith.constant 0 : index
    %c0_52 = arith.constant 0 : index
    %75 = vector.load %arg4[%c0_49, %c4_50, %c0_51, %c0_52] : memref<1x16x16x128xbf16, #tpu.memory_space<vmem>>, vector<1x1x16x128xbf16>
    %76 = vector.shape_cast %75 : vector<1x1x16x128xbf16> to vector<16x128xbf16>
    %77 = vector.shape_cast %74 : vector<16x128xbf16> to vector<1x1x16x128xbf16>
    tpu.vector_store %arg4[%c0_49, %c4_50, %c0_51, %c0_52], %77 {strides = array<i32>} : memref<1x16x16x128xbf16, #tpu.memory_space<vmem>>, vector<1x1x16x128xbf16>,
    %78 = vector.extract_strided_slice %52 {offsets = [90, 0], sizes = [16, 128], strides = [1, 1]} : vector<286x128xf32> to vector<16x128xf32>
    %79 = arith.truncf %78 : vector<16x128xf32> to vector<16x128xbf16>
    %c0_53 = arith.constant 0 : index
    %c5_54 = arith.constant 5 : index
    %c0_55 = arith.constant 0 : index
    %c0_56 = arith.constant 0 : index
    %80 = vector.load %arg4[%c0_53, %c5_54, %c0_55, %c0_56] : memref<1x16x16x128xbf16, #tpu.memory_space<vmem>>, vector<1x1x16x128xbf16>
    %81 = vector.shape_cast %80 : vector<1x1x16x128xbf16> to vector<16x128xbf16>
    %82 = vector.shape_cast %79 : vector<16x128xbf16> to vector<1x1x16x128xbf16>
    tpu.vector_store %arg4[%c0_53, %c5_54, %c0_55, %c0_56], %82 {strides = array<i32>} : memref<1x16x16x128xbf16, #tpu.memory_space<vmem>>, vector<1x1x16x128xbf16>,
    %83 = vector.extract_strided_slice %52 {offsets = [108, 0], sizes = [16, 128], strides = [1, 1]} : vector<286x128xf32> to vector<16x128xf32>
    %84 = arith.truncf %83 : vector<16x128xf32> to vector<16x128xbf16>
    %c0_57 = arith.constant 0 : index
    %c6_58 = arith.constant 6 : index
    %c0_59 = arith.constant 0 : index
    %c0_60 = arith.constant 0 : index
    %85 = vector.load %arg4[%c0_57, %c6_58, %c0_59, %c0_60] : memref<1x16x16x128xbf16, #tpu.memory_space<vmem>>, vector<1x1x16x128xbf16>
    %86 = vector.shape_cast %85 : vector<1x1x16x128xbf16> to vector<16x128xbf16>
    %87 = vector.shape_cast %84 : vector<16x128xbf16> to vector<1x1x16x128xbf16>
    tpu.vector_store %arg4[%c0_57, %c6_58, %c0_59, %c0_60], %87 {strides = array<i32>} : memref<1x16x16x128xbf16, #tpu.memory_space<vmem>>, vector<1x1x16x128xbf16>,
    %88 = vector.extract_strided_slice %52 {offsets = [126, 0], sizes = [16, 128], strides = [1, 1]} : vector<286x128xf32> to vector<16x128xf32>
    %89 = arith.truncf %88 : vector<16x128xf32> to vector<16x128xbf16>
    %c0_61 = arith.constant 0 : index
    %c7_62 = arith.constant 7 : index
    %c0_63 = arith.constant 0 : index
    %c0_64 = arith.constant 0 : index
    %90 = vector.load %arg4[%c0_61, %c7_62, %c0_63, %c0_64] : memref<1x16x16x128xbf16, #tpu.memory_space<vmem>>, vector<1x1x16x128xbf16>
    %91 = vector.shape_cast %90 : vector<1x1x16x128xbf16> to vector<16x128xbf16>
    %92 = vector.shape_cast %89 : vector<16x128xbf16> to vector<1x1x16x128xbf16>
    tpu.vector_store %arg4[%c0_61, %c7_62, %c0_63, %c0_64], %92 {strides = array<i32>} : memref<1x16x16x128xbf16, #tpu.memory_space<vmem>>, vector<1x1x16x128xbf16>,
    %93 = vector.extract_strided_slice %52 {offsets = [144, 0], sizes = [16, 128], strides = [1, 1]} : vector<286x128xf32> to vector<16x128xf32>
    %94 = arith.truncf %93 : vector<16x128xf32> to vector<16x128xbf16>
    %c0_65 = arith.constant 0 : index
    %c8_66 = arith.constant 8 : index
    %c0_67 = arith.constant 0 : index
    %c0_68 = arith.constant 0 : index
    %95 = vector.load %arg4[%c0_65, %c8_66, %c0_67, %c0_68] : memref<1x16x16x128xbf16, #tpu.memory_space<vmem>>, vector<1x1x16x128xbf16>
    %96 = vector.shape_cast %95 : vector<1x1x16x128xbf16> to vector<16x128xbf16>
    %97 = vector.shape_cast %94 : vector<16x128xbf16> to vector<1x1x16x128xbf16>
    tpu.vector_store %arg4[%c0_65, %c8_66, %c0_67, %c0_68], %97 {strides = array<i32>} : memref<1x16x16x128xbf16, #tpu.memory_space<vmem>>, vector<1x1x16x128xbf16>,
    %98 = vector.extract_strided_slice %52 {offsets = [162, 0], sizes = [16, 128], strides = [1, 1]} : vector<286x128xf32> to vector<16x128xf32>
    %99 = arith.truncf %98 : vector<16x128xf32> to vector<16x128xbf16>
    %c0_69 = arith.constant 0 : index
    %c9 = arith.constant 9 : index
    %c0_70 = arith.constant 0 : index
    %c0_71 = arith.constant 0 : index
    %100 = vector.load %arg4[%c0_69, %c9, %c0_70, %c0_71] : memref<1x16x16x128xbf16, #tpu.memory_space<vmem>>, vector<1x1x16x128xbf16>
    %101 = vector.shape_cast %100 : vector<1x1x16x128xbf16> to vector<16x128xbf16>
    %102 = vector.shape_cast %99 : vector<16x128xbf16> to vector<1x1x16x128xbf16>
    tpu.vector_store %arg4[%c0_69, %c9, %c0_70, %c0_71], %102 {strides = array<i32>} : memref<1x16x16x128xbf16, #tpu.memory_space<vmem>>, vector<1x1x16x128xbf16>,
    %103 = vector.extract_strided_slice %52 {offsets = [180, 0], sizes = [16, 128], strides = [1, 1]} : vector<286x128xf32> to vector<16x128xf32>
    %104 = arith.truncf %103 : vector<16x128xf32> to vector<16x128xbf16>
    %c0_72 = arith.constant 0 : index
    %c10 = arith.constant 10 : index
    %c0_73 = arith.constant 0 : index
    %c0_74 = arith.constant 0 : index
    %105 = vector.load %arg4[%c0_72, %c10, %c0_73, %c0_74] : memref<1x16x16x128xbf16, #tpu.memory_space<vmem>>, vector<1x1x16x128xbf16>
    %106 = vector.shape_cast %105 : vector<1x1x16x128xbf16> to vector<16x128xbf16>
    %107 = vector.shape_cast %104 : vector<16x128xbf16> to vector<1x1x16x128xbf16>
    tpu.vector_store %arg4[%c0_72, %c10, %c0_73, %c0_74], %107 {strides = array<i32>} : memref<1x16x16x128xbf16, #tpu.memory_space<vmem>>, vector<1x1x16x128xbf16>,
    %108 = vector.extract_strided_slice %52 {offsets = [198, 0], sizes = [16, 128], strides = [1, 1]} : vector<286x128xf32> to vector<16x128xf32>
    %109 = arith.truncf %108 : vector<16x128xf32> to vector<16x128xbf16>
    %c0_75 = arith.constant 0 : index
    %c11 = arith.constant 11 : index
    %c0_76 = arith.constant 0 : index
    %c0_77 = arith.constant 0 : index
    %110 = vector.load %arg4[%c0_75, %c11, %c0_76, %c0_77] : memref<1x16x16x128xbf16, #tpu.memory_space<vmem>>, vector<1x1x16x128xbf16>
    %111 = vector.shape_cast %110 : vector<1x1x16x128xbf16> to vector<16x128xbf16>
    %112 = vector.shape_cast %109 : vector<16x128xbf16> to vector<1x1x16x128xbf16>
    tpu.vector_store %arg4[%c0_75, %c11, %c0_76, %c0_77], %112 {strides = array<i32>} : memref<1x16x16x128xbf16, #tpu.memory_space<vmem>>, vector<1x1x16x128xbf16>,
    %113 = vector.extract_strided_slice %52 {offsets = [216, 0], sizes = [16, 128], strides = [1, 1]} : vector<286x128xf32> to vector<16x128xf32>
    %114 = arith.truncf %113 : vector<16x128xf32> to vector<16x128xbf16>
    %c0_78 = arith.constant 0 : index
    %c12 = arith.constant 12 : index
    %c0_79 = arith.constant 0 : index
    %c0_80 = arith.constant 0 : index
    %115 = vector.load %arg4[%c0_78, %c12, %c0_79, %c0_80] : memref<1x16x16x128xbf16, #tpu.memory_space<vmem>>, vector<1x1x16x128xbf16>
    %116 = vector.shape_cast %115 : vector<1x1x16x128xbf16> to vector<16x128xbf16>
    %117 = vector.shape_cast %114 : vector<16x128xbf16> to vector<1x1x16x128xbf16>
    tpu.vector_store %arg4[%c0_78, %c12, %c0_79, %c0_80], %117 {strides = array<i32>} : memref<1x16x16x128xbf16, #tpu.memory_space<vmem>>, vector<1x1x16x128xbf16>,
    %118 = vector.extract_strided_slice %52 {offsets = [234, 0], sizes = [16, 128], strides = [1, 1]} : vector<286x128xf32> to vector<16x128xf32>
    %119 = arith.truncf %118 : vector<16x128xf32> to vector<16x128xbf16>
    %c0_81 = arith.constant 0 : index
    %c13 = arith.constant 13 : index
    %c0_82 = arith.constant 0 : index
    %c0_83 = arith.constant 0 : index
    %120 = vector.load %arg4[%c0_81, %c13, %c0_82, %c0_83] : memref<1x16x16x128xbf16, #tpu.memory_space<vmem>>, vector<1x1x16x128xbf16>
    %121 = vector.shape_cast %120 : vector<1x1x16x128xbf16> to vector<16x128xbf16>
    %122 = vector.shape_cast %119 : vector<16x128xbf16> to vector<1x1x16x128xbf16>
    tpu.vector_store %arg4[%c0_81, %c13, %c0_82, %c0_83], %122 {strides = array<i32>} : memref<1x16x16x128xbf16, #tpu.memory_space<vmem>>, vector<1x1x16x128xbf16>,
    %123 = vector.extract_strided_slice %52 {offsets = [252, 0], sizes = [16, 128], strides = [1, 1]} : vector<286x128xf32> to vector<16x128xf32>
    %124 = arith.truncf %123 : vector<16x128xf32> to vector<16x128xbf16>
    %c0_84 = arith.constant 0 : index
    %c14 = arith.constant 14 : index
    %c0_85 = arith.constant 0 : index
    %c0_86 = arith.constant 0 : index
    %125 = vector.load %arg4[%c0_84, %c14, %c0_85, %c0_86] : memref<1x16x16x128xbf16, #tpu.memory_space<vmem>>, vector<1x1x16x128xbf16>
    %126 = vector.shape_cast %125 : vector<1x1x16x128xbf16> to vector<16x128xbf16>
    %127 = vector.shape_cast %124 : vector<16x128xbf16> to vector<1x1x16x128xbf16>
    tpu.vector_store %arg4[%c0_84, %c14, %c0_85, %c0_86], %127 {strides = array<i32>} : memref<1x16x16x128xbf16, #tpu.memory_space<vmem>>, vector<1x1x16x128xbf16>,
    %128 = vector.extract_strided_slice %52 {offsets = [270, 0], sizes = [16, 128], strides = [1, 1]} : vector<286x128xf32> to vector<16x128xf32>
    %129 = arith.truncf %128 : vector<16x128xf32> to vector<16x128xbf16>
    %c0_87 = arith.constant 0 : index
    %c15 = arith.constant 15 : index
    %c0_88 = arith.constant 0 : index
    %c0_89 = arith.constant 0 : index
    %130 = vector.load %arg4[%c0_87, %c15, %c0_88, %c0_89] : memref<1x16x16x128xbf16, #tpu.memory_space<vmem>>, vector<1x1x16x128xbf16>
    %131 = vector.shape_cast %130 : vector<1x1x16x128xbf16> to vector<16x128xbf16>
    %132 = vector.shape_cast %129 : vector<16x128xbf16> to vector<1x1x16x128xbf16>
    tpu.vector_store %arg4[%c0_87, %c15, %c0_88, %c0_89], %132 {strides = array<i32>} : memref<1x16x16x128xbf16, #tpu.memory_space<vmem>>, vector<1x1x16x128xbf16>,
    return
  }
  func.func @transform_0(%arg0: i32) -> (i32, i32, i32) {
    %c0_i32 = arith.constant 0 : i32
    %c0_i32_0 = arith.constant 0 : i32
    %c0_i32_1 = arith.constant 0 : i32
    return %arg0, %c0_i32, %c0_i32_0 : i32, i32, i32
  }
  func.func @transform_1(%arg0: i32) -> (i32, i32, i32) {
    %c0_i32 = arith.constant 0 : i32
    %c0_i32_0 = arith.constant 0 : i32
    %c0_i32_1 = arith.constant 0 : i32
    %c0_i32_2 = arith.constant 0 : i32
    return %c0_i32, %c0_i32_0, %c0_i32_1 : i32, i32, i32
  }
  func.func @transform_2(%arg0: i32) -> (i32, i32) {
    %c0_i32 = arith.constant 0 : i32
    %c0_i32_0 = arith.constant 0 : i32
    %c0_i32_1 = arith.constant 0 : i32
    return %c0_i32, %c0_i32_0 : i32, i32
  }
  func.func @transform_3(%arg0: i32) -> (i32, i32, i32, i32) {
    %c0_i32 = arith.constant 0 : i32
    %c0_i32_0 = arith.constant 0 : i32
    %c0_i32_1 = arith.constant 0 : i32
    %c0_i32_2 = arith.constant 0 : i32
    return %arg0, %c0_i32, %c0_i32_0, %c0_i32_1 : i32, i32, i32, i32
  }
}

module attributes {stable_mosaic.version = 11 : i64} {
  func.func @_conv3x3_relu_kernel(%arg0: i32, %arg1: memref<1x100x128xbf16, #tpu.memory_space<vmem>>, %arg2: memref<9x128x128xbf16, #tpu.memory_space<vmem>>, %arg3: memref<1x128xf32, #tpu.memory_space<vmem>>, %arg4: memref<1x8x8x128xbf16, #tpu.memory_space<vmem>>) attributes {dimension_semantics = [#tpu.dimension_semantics<parallel>], iteration_bounds = array<i64: 2>, scalar_prefetch = 0 : i64, scratch_operands = 0 : i64, tpu.core_type = #tpu.core_type<tc>, window_params = [{transform_indices = @transform_0, window_bounds = array<i64: 1, 100, 128>}, {pipeline_mode = #tpu.pipeline_mode<synchronous>, transform_indices = @transform_1, window_bounds = array<i64: 9, 128, 128>}, {pipeline_mode = #tpu.pipeline_mode<synchronous>, transform_indices = @transform_2, window_bounds = array<i64: 1, 128>}, {transform_indices = @transform_3, window_bounds = array<i64: 1, 8, 8, 128>}]} {
    %c0 = arith.constant 0 : index
    %c0_0 = arith.constant 0 : index
    %c0_1 = arith.constant 0 : index
    %0 = vector.load %arg1[%c0, %c0_0, %c0_1] : memref<1x100x128xbf16, #tpu.memory_space<vmem>>, vector<1x100x128xbf16>
    %1 = vector.shape_cast %0 : vector<1x100x128xbf16> to vector<100x128xbf16>
    %cst = arith.constant 0.000000e+00 : f32
    %2 = vector.broadcast %cst : f32 to vector<78x128xf32>
    %3 = vector.extract_strided_slice %1 {offsets = [0, 0], sizes = [78, 128], strides = [1, 1]} : vector<100x128xbf16> to vector<78x128xbf16>
    %c0_2 = arith.constant 0 : index
    %c0_3 = arith.constant 0 : index
    %c0_4 = arith.constant 0 : index
    %4 = vector.load %arg2[%c0_2, %c0_3, %c0_4] : memref<9x128x128xbf16, #tpu.memory_space<vmem>>, vector<1x128x128xbf16>
    %5 = vector.shape_cast %4 : vector<1x128x128xbf16> to vector<128x128xbf16>
    %cst_5 = arith.constant dense<0.000000e+00> : vector<78x128xf32>
    %6 = tpu.matmul %3, %5, %cst_5 {dimension_numbers = #tpu.dot_dimension_numbers<[1], [0], [0], [1], [0, 0, 1, 1], [], []>} : vector<78x128xbf16>, vector<128x128xbf16>, vector<78x128xf32> -> vector<78x128xf32>
    %7 = arith.addf %2, %6 : vector<78x128xf32>
    %8 = vector.extract_strided_slice %1 {offsets = [1, 0], sizes = [78, 128], strides = [1, 1]} : vector<100x128xbf16> to vector<78x128xbf16>
    %c1 = arith.constant 1 : index
    %c0_6 = arith.constant 0 : index
    %c0_7 = arith.constant 0 : index
    %9 = vector.load %arg2[%c1, %c0_6, %c0_7] : memref<9x128x128xbf16, #tpu.memory_space<vmem>>, vector<1x128x128xbf16>
    %10 = vector.shape_cast %9 : vector<1x128x128xbf16> to vector<128x128xbf16>
    %cst_8 = arith.constant dense<0.000000e+00> : vector<78x128xf32>
    %11 = tpu.matmul %8, %10, %cst_8 {dimension_numbers = #tpu.dot_dimension_numbers<[1], [0], [0], [1], [0, 0, 1, 1], [], []>} : vector<78x128xbf16>, vector<128x128xbf16>, vector<78x128xf32> -> vector<78x128xf32>
    %12 = arith.addf %7, %11 : vector<78x128xf32>
    %13 = vector.extract_strided_slice %1 {offsets = [2, 0], sizes = [78, 128], strides = [1, 1]} : vector<100x128xbf16> to vector<78x128xbf16>
    %c2 = arith.constant 2 : index
    %c0_9 = arith.constant 0 : index
    %c0_10 = arith.constant 0 : index
    %14 = vector.load %arg2[%c2, %c0_9, %c0_10] : memref<9x128x128xbf16, #tpu.memory_space<vmem>>, vector<1x128x128xbf16>
    %15 = vector.shape_cast %14 : vector<1x128x128xbf16> to vector<128x128xbf16>
    %cst_11 = arith.constant dense<0.000000e+00> : vector<78x128xf32>
    %16 = tpu.matmul %13, %15, %cst_11 {dimension_numbers = #tpu.dot_dimension_numbers<[1], [0], [0], [1], [0, 0, 1, 1], [], []>} : vector<78x128xbf16>, vector<128x128xbf16>, vector<78x128xf32> -> vector<78x128xf32>
    %17 = arith.addf %12, %16 : vector<78x128xf32>
    %18 = vector.extract_strided_slice %1 {offsets = [10, 0], sizes = [78, 128], strides = [1, 1]} : vector<100x128xbf16> to vector<78x128xbf16>
    %c3 = arith.constant 3 : index
    %c0_12 = arith.constant 0 : index
    %c0_13 = arith.constant 0 : index
    %19 = vector.load %arg2[%c3, %c0_12, %c0_13] : memref<9x128x128xbf16, #tpu.memory_space<vmem>>, vector<1x128x128xbf16>
    %20 = vector.shape_cast %19 : vector<1x128x128xbf16> to vector<128x128xbf16>
    %cst_14 = arith.constant dense<0.000000e+00> : vector<78x128xf32>
    %21 = tpu.matmul %18, %20, %cst_14 {dimension_numbers = #tpu.dot_dimension_numbers<[1], [0], [0], [1], [0, 0, 1, 1], [], []>} : vector<78x128xbf16>, vector<128x128xbf16>, vector<78x128xf32> -> vector<78x128xf32>
    %22 = arith.addf %17, %21 : vector<78x128xf32>
    %23 = vector.extract_strided_slice %1 {offsets = [11, 0], sizes = [78, 128], strides = [1, 1]} : vector<100x128xbf16> to vector<78x128xbf16>
    %c4 = arith.constant 4 : index
    %c0_15 = arith.constant 0 : index
    %c0_16 = arith.constant 0 : index
    %24 = vector.load %arg2[%c4, %c0_15, %c0_16] : memref<9x128x128xbf16, #tpu.memory_space<vmem>>, vector<1x128x128xbf16>
    %25 = vector.shape_cast %24 : vector<1x128x128xbf16> to vector<128x128xbf16>
    %cst_17 = arith.constant dense<0.000000e+00> : vector<78x128xf32>
    %26 = tpu.matmul %23, %25, %cst_17 {dimension_numbers = #tpu.dot_dimension_numbers<[1], [0], [0], [1], [0, 0, 1, 1], [], []>} : vector<78x128xbf16>, vector<128x128xbf16>, vector<78x128xf32> -> vector<78x128xf32>
    %27 = arith.addf %22, %26 : vector<78x128xf32>
    %28 = vector.extract_strided_slice %1 {offsets = [12, 0], sizes = [78, 128], strides = [1, 1]} : vector<100x128xbf16> to vector<78x128xbf16>
    %c5 = arith.constant 5 : index
    %c0_18 = arith.constant 0 : index
    %c0_19 = arith.constant 0 : index
    %29 = vector.load %arg2[%c5, %c0_18, %c0_19] : memref<9x128x128xbf16, #tpu.memory_space<vmem>>, vector<1x128x128xbf16>
    %30 = vector.shape_cast %29 : vector<1x128x128xbf16> to vector<128x128xbf16>
    %cst_20 = arith.constant dense<0.000000e+00> : vector<78x128xf32>
    %31 = tpu.matmul %28, %30, %cst_20 {dimension_numbers = #tpu.dot_dimension_numbers<[1], [0], [0], [1], [0, 0, 1, 1], [], []>} : vector<78x128xbf16>, vector<128x128xbf16>, vector<78x128xf32> -> vector<78x128xf32>
    %32 = arith.addf %27, %31 : vector<78x128xf32>
    %33 = vector.extract_strided_slice %1 {offsets = [20, 0], sizes = [78, 128], strides = [1, 1]} : vector<100x128xbf16> to vector<78x128xbf16>
    %c6 = arith.constant 6 : index
    %c0_21 = arith.constant 0 : index
    %c0_22 = arith.constant 0 : index
    %34 = vector.load %arg2[%c6, %c0_21, %c0_22] : memref<9x128x128xbf16, #tpu.memory_space<vmem>>, vector<1x128x128xbf16>
    %35 = vector.shape_cast %34 : vector<1x128x128xbf16> to vector<128x128xbf16>
    %cst_23 = arith.constant dense<0.000000e+00> : vector<78x128xf32>
    %36 = tpu.matmul %33, %35, %cst_23 {dimension_numbers = #tpu.dot_dimension_numbers<[1], [0], [0], [1], [0, 0, 1, 1], [], []>} : vector<78x128xbf16>, vector<128x128xbf16>, vector<78x128xf32> -> vector<78x128xf32>
    %37 = arith.addf %32, %36 : vector<78x128xf32>
    %38 = vector.extract_strided_slice %1 {offsets = [21, 0], sizes = [78, 128], strides = [1, 1]} : vector<100x128xbf16> to vector<78x128xbf16>
    %c7 = arith.constant 7 : index
    %c0_24 = arith.constant 0 : index
    %c0_25 = arith.constant 0 : index
    %39 = vector.load %arg2[%c7, %c0_24, %c0_25] : memref<9x128x128xbf16, #tpu.memory_space<vmem>>, vector<1x128x128xbf16>
    %40 = vector.shape_cast %39 : vector<1x128x128xbf16> to vector<128x128xbf16>
    %cst_26 = arith.constant dense<0.000000e+00> : vector<78x128xf32>
    %41 = tpu.matmul %38, %40, %cst_26 {dimension_numbers = #tpu.dot_dimension_numbers<[1], [0], [0], [1], [0, 0, 1, 1], [], []>} : vector<78x128xbf16>, vector<128x128xbf16>, vector<78x128xf32> -> vector<78x128xf32>
    %42 = arith.addf %37, %41 : vector<78x128xf32>
    %43 = vector.extract_strided_slice %1 {offsets = [22, 0], sizes = [78, 128], strides = [1, 1]} : vector<100x128xbf16> to vector<78x128xbf16>
    %c8 = arith.constant 8 : index
    %c0_27 = arith.constant 0 : index
    %c0_28 = arith.constant 0 : index
    %44 = vector.load %arg2[%c8, %c0_27, %c0_28] : memref<9x128x128xbf16, #tpu.memory_space<vmem>>, vector<1x128x128xbf16>
    %45 = vector.shape_cast %44 : vector<1x128x128xbf16> to vector<128x128xbf16>
    %cst_29 = arith.constant dense<0.000000e+00> : vector<78x128xf32>
    %46 = tpu.matmul %43, %45, %cst_29 {dimension_numbers = #tpu.dot_dimension_numbers<[1], [0], [0], [1], [0, 0, 1, 1], [], []>} : vector<78x128xbf16>, vector<128x128xbf16>, vector<78x128xf32> -> vector<78x128xf32>
    %47 = arith.addf %42, %46 : vector<78x128xf32>
    %c0_30 = arith.constant 0 : index
    %c0_31 = arith.constant 0 : index
    %48 = vector.load %arg3[%c0_30, %c0_31] : memref<1x128xf32, #tpu.memory_space<vmem>>, vector<1x128xf32>
    %49 = vector.broadcast %48 : vector<1x128xf32> to vector<78x128xf32>
    %50 = arith.addf %47, %49 : vector<78x128xf32>
    %cst_32 = arith.constant 0.000000e+00 : f32
    %51 = vector.broadcast %cst_32 : f32 to vector<78x128xf32>
    %52 = arith.maximumf %50, %51 : vector<78x128xf32>
    %53 = vector.extract_strided_slice %52 {offsets = [0, 0], sizes = [8, 128], strides = [1, 1]} : vector<78x128xf32> to vector<8x128xf32>
    %54 = arith.truncf %53 : vector<8x128xf32> to vector<8x128xbf16>
    %c0_33 = arith.constant 0 : index
    %c0_34 = arith.constant 0 : index
    %c0_35 = arith.constant 0 : index
    %c0_36 = arith.constant 0 : index
    %55 = vector.load %arg4[%c0_33, %c0_34, %c0_35, %c0_36] : memref<1x8x8x128xbf16, #tpu.memory_space<vmem>>, vector<1x1x8x128xbf16>
    %56 = vector.shape_cast %55 : vector<1x1x8x128xbf16> to vector<8x128xbf16>
    %57 = vector.shape_cast %54 : vector<8x128xbf16> to vector<1x1x8x128xbf16>
    tpu.vector_store %arg4[%c0_33, %c0_34, %c0_35, %c0_36], %57 {strides = array<i32>} : memref<1x8x8x128xbf16, #tpu.memory_space<vmem>>, vector<1x1x8x128xbf16>,
    %58 = vector.extract_strided_slice %52 {offsets = [10, 0], sizes = [8, 128], strides = [1, 1]} : vector<78x128xf32> to vector<8x128xf32>
    %59 = arith.truncf %58 : vector<8x128xf32> to vector<8x128xbf16>
    %c0_37 = arith.constant 0 : index
    %c1_38 = arith.constant 1 : index
    %c0_39 = arith.constant 0 : index
    %c0_40 = arith.constant 0 : index
    %60 = vector.load %arg4[%c0_37, %c1_38, %c0_39, %c0_40] : memref<1x8x8x128xbf16, #tpu.memory_space<vmem>>, vector<1x1x8x128xbf16>
    %61 = vector.shape_cast %60 : vector<1x1x8x128xbf16> to vector<8x128xbf16>
    %62 = vector.shape_cast %59 : vector<8x128xbf16> to vector<1x1x8x128xbf16>
    tpu.vector_store %arg4[%c0_37, %c1_38, %c0_39, %c0_40], %62 {strides = array<i32>} : memref<1x8x8x128xbf16, #tpu.memory_space<vmem>>, vector<1x1x8x128xbf16>,
    %63 = vector.extract_strided_slice %52 {offsets = [20, 0], sizes = [8, 128], strides = [1, 1]} : vector<78x128xf32> to vector<8x128xf32>
    %64 = arith.truncf %63 : vector<8x128xf32> to vector<8x128xbf16>
    %c0_41 = arith.constant 0 : index
    %c2_42 = arith.constant 2 : index
    %c0_43 = arith.constant 0 : index
    %c0_44 = arith.constant 0 : index
    %65 = vector.load %arg4[%c0_41, %c2_42, %c0_43, %c0_44] : memref<1x8x8x128xbf16, #tpu.memory_space<vmem>>, vector<1x1x8x128xbf16>
    %66 = vector.shape_cast %65 : vector<1x1x8x128xbf16> to vector<8x128xbf16>
    %67 = vector.shape_cast %64 : vector<8x128xbf16> to vector<1x1x8x128xbf16>
    tpu.vector_store %arg4[%c0_41, %c2_42, %c0_43, %c0_44], %67 {strides = array<i32>} : memref<1x8x8x128xbf16, #tpu.memory_space<vmem>>, vector<1x1x8x128xbf16>,
    %68 = vector.extract_strided_slice %52 {offsets = [30, 0], sizes = [8, 128], strides = [1, 1]} : vector<78x128xf32> to vector<8x128xf32>
    %69 = arith.truncf %68 : vector<8x128xf32> to vector<8x128xbf16>
    %c0_45 = arith.constant 0 : index
    %c3_46 = arith.constant 3 : index
    %c0_47 = arith.constant 0 : index
    %c0_48 = arith.constant 0 : index
    %70 = vector.load %arg4[%c0_45, %c3_46, %c0_47, %c0_48] : memref<1x8x8x128xbf16, #tpu.memory_space<vmem>>, vector<1x1x8x128xbf16>
    %71 = vector.shape_cast %70 : vector<1x1x8x128xbf16> to vector<8x128xbf16>
    %72 = vector.shape_cast %69 : vector<8x128xbf16> to vector<1x1x8x128xbf16>
    tpu.vector_store %arg4[%c0_45, %c3_46, %c0_47, %c0_48], %72 {strides = array<i32>} : memref<1x8x8x128xbf16, #tpu.memory_space<vmem>>, vector<1x1x8x128xbf16>,
    %73 = vector.extract_strided_slice %52 {offsets = [40, 0], sizes = [8, 128], strides = [1, 1]} : vector<78x128xf32> to vector<8x128xf32>
    %74 = arith.truncf %73 : vector<8x128xf32> to vector<8x128xbf16>
    %c0_49 = arith.constant 0 : index
    %c4_50 = arith.constant 4 : index
    %c0_51 = arith.constant 0 : index
    %c0_52 = arith.constant 0 : index
    %75 = vector.load %arg4[%c0_49, %c4_50, %c0_51, %c0_52] : memref<1x8x8x128xbf16, #tpu.memory_space<vmem>>, vector<1x1x8x128xbf16>
    %76 = vector.shape_cast %75 : vector<1x1x8x128xbf16> to vector<8x128xbf16>
    %77 = vector.shape_cast %74 : vector<8x128xbf16> to vector<1x1x8x128xbf16>
    tpu.vector_store %arg4[%c0_49, %c4_50, %c0_51, %c0_52], %77 {strides = array<i32>} : memref<1x8x8x128xbf16, #tpu.memory_space<vmem>>, vector<1x1x8x128xbf16>,
    %78 = vector.extract_strided_slice %52 {offsets = [50, 0], sizes = [8, 128], strides = [1, 1]} : vector<78x128xf32> to vector<8x128xf32>
    %79 = arith.truncf %78 : vector<8x128xf32> to vector<8x128xbf16>
    %c0_53 = arith.constant 0 : index
    %c5_54 = arith.constant 5 : index
    %c0_55 = arith.constant 0 : index
    %c0_56 = arith.constant 0 : index
    %80 = vector.load %arg4[%c0_53, %c5_54, %c0_55, %c0_56] : memref<1x8x8x128xbf16, #tpu.memory_space<vmem>>, vector<1x1x8x128xbf16>
    %81 = vector.shape_cast %80 : vector<1x1x8x128xbf16> to vector<8x128xbf16>
    %82 = vector.shape_cast %79 : vector<8x128xbf16> to vector<1x1x8x128xbf16>
    tpu.vector_store %arg4[%c0_53, %c5_54, %c0_55, %c0_56], %82 {strides = array<i32>} : memref<1x8x8x128xbf16, #tpu.memory_space<vmem>>, vector<1x1x8x128xbf16>,
    %83 = vector.extract_strided_slice %52 {offsets = [60, 0], sizes = [8, 128], strides = [1, 1]} : vector<78x128xf32> to vector<8x128xf32>
    %84 = arith.truncf %83 : vector<8x128xf32> to vector<8x128xbf16>
    %c0_57 = arith.constant 0 : index
    %c6_58 = arith.constant 6 : index
    %c0_59 = arith.constant 0 : index
    %c0_60 = arith.constant 0 : index
    %85 = vector.load %arg4[%c0_57, %c6_58, %c0_59, %c0_60] : memref<1x8x8x128xbf16, #tpu.memory_space<vmem>>, vector<1x1x8x128xbf16>
    %86 = vector.shape_cast %85 : vector<1x1x8x128xbf16> to vector<8x128xbf16>
    %87 = vector.shape_cast %84 : vector<8x128xbf16> to vector<1x1x8x128xbf16>
    tpu.vector_store %arg4[%c0_57, %c6_58, %c0_59, %c0_60], %87 {strides = array<i32>} : memref<1x8x8x128xbf16, #tpu.memory_space<vmem>>, vector<1x1x8x128xbf16>,
    %88 = vector.extract_strided_slice %52 {offsets = [70, 0], sizes = [8, 128], strides = [1, 1]} : vector<78x128xf32> to vector<8x128xf32>
    %89 = arith.truncf %88 : vector<8x128xf32> to vector<8x128xbf16>
    %c0_61 = arith.constant 0 : index
    %c7_62 = arith.constant 7 : index
    %c0_63 = arith.constant 0 : index
    %c0_64 = arith.constant 0 : index
    %90 = vector.load %arg4[%c0_61, %c7_62, %c0_63, %c0_64] : memref<1x8x8x128xbf16, #tpu.memory_space<vmem>>, vector<1x1x8x128xbf16>
    %91 = vector.shape_cast %90 : vector<1x1x8x128xbf16> to vector<8x128xbf16>
    %92 = vector.shape_cast %89 : vector<8x128xbf16> to vector<1x1x8x128xbf16>
    tpu.vector_store %arg4[%c0_61, %c7_62, %c0_63, %c0_64], %92 {strides = array<i32>} : memref<1x8x8x128xbf16, #tpu.memory_space<vmem>>, vector<1x1x8x128xbf16>,
    return
  }
  func.func @transform_0(%arg0: i32) -> (i32, i32, i32) {
    %c0_i32 = arith.constant 0 : i32
    %c0_i32_0 = arith.constant 0 : i32
    %c0_i32_1 = arith.constant 0 : i32
    return %arg0, %c0_i32, %c0_i32_0 : i32, i32, i32
  }
  func.func @transform_1(%arg0: i32) -> (i32, i32, i32) {
    %c0_i32 = arith.constant 0 : i32
    %c0_i32_0 = arith.constant 0 : i32
    %c0_i32_1 = arith.constant 0 : i32
    %c0_i32_2 = arith.constant 0 : i32
    return %c0_i32, %c0_i32_0, %c0_i32_1 : i32, i32, i32
  }
  func.func @transform_2(%arg0: i32) -> (i32, i32) {
    %c0_i32 = arith.constant 0 : i32
    %c0_i32_0 = arith.constant 0 : i32
    %c0_i32_1 = arith.constant 0 : i32
    return %c0_i32, %c0_i32_0 : i32, i32
  }
  func.func @transform_3(%arg0: i32) -> (i32, i32, i32, i32) {
    %c0_i32 = arith.constant 0 : i32
    %c0_i32_0 = arith.constant 0 : i32
    %c0_i32_1 = arith.constant 0 : i32
    %c0_i32_2 = arith.constant 0 : i32
    return %arg0, %c0_i32, %c0_i32_0, %c0_i32_1 : i32, i32, i32, i32
  }
}

module attributes {stable_mosaic.version = 11 : i64} {
  func.func @_conv3x3_pool_pred_kernel(%arg0: i32, %arg1: memref<1x36x128xbf16, #tpu.memory_space<vmem>>, %arg2: memref<9x128x256xbf16, #tpu.memory_space<vmem>>, %arg3: memref<1x256xf32, #tpu.memory_space<vmem>>, %arg4: memref<256x128xbf16, #tpu.memory_space<vmem>>, %arg5: memref<1x128xf32, #tpu.memory_space<vmem>>, %arg6: memref<1x4x128xf32, #tpu.memory_space<vmem>>) attributes {dimension_semantics = [#tpu.dimension_semantics<parallel>], iteration_bounds = array<i64: 2>, scalar_prefetch = 0 : i64, scratch_operands = 0 : i64, tpu.core_type = #tpu.core_type<tc>, window_params = [{transform_indices = @transform_0, window_bounds = array<i64: 1, 36, 128>}, {pipeline_mode = #tpu.pipeline_mode<synchronous>, transform_indices = @transform_1, window_bounds = array<i64: 9, 128, 256>}, {pipeline_mode = #tpu.pipeline_mode<synchronous>, transform_indices = @transform_2, window_bounds = array<i64: 1, 256>}, {pipeline_mode = #tpu.pipeline_mode<synchronous>, transform_indices = @transform_3, window_bounds = array<i64: 256, 128>}, {pipeline_mode = #tpu.pipeline_mode<synchronous>, transform_indices = @transform_4, window_bounds = array<i64: 1, 128>}, {transform_indices = @transform_5, window_bounds = array<i64: 1, 4, 128>}]} {
    %c0 = arith.constant 0 : index
    %c0_0 = arith.constant 0 : index
    %c0_1 = arith.constant 0 : index
    %0 = vector.load %arg1[%c0, %c0_0, %c0_1] : memref<1x36x128xbf16, #tpu.memory_space<vmem>>, vector<1x36x128xbf16>
    %1 = vector.shape_cast %0 : vector<1x36x128xbf16> to vector<36x128xbf16>
    %cst = arith.constant 0.000000e+00 : f32
    %2 = vector.broadcast %cst : f32 to vector<22x256xf32>
    %3 = vector.extract_strided_slice %1 {offsets = [0, 0], sizes = [22, 128], strides = [1, 1]} : vector<36x128xbf16> to vector<22x128xbf16>
    %c0_2 = arith.constant 0 : index
    %c0_3 = arith.constant 0 : index
    %c0_4 = arith.constant 0 : index
    %4 = vector.load %arg2[%c0_2, %c0_3, %c0_4] : memref<9x128x256xbf16, #tpu.memory_space<vmem>>, vector<1x128x256xbf16>
    %5 = vector.shape_cast %4 : vector<1x128x256xbf16> to vector<128x256xbf16>
    %cst_5 = arith.constant dense<0.000000e+00> : vector<22x256xf32>
    %6 = tpu.matmul %3, %5, %cst_5 {dimension_numbers = #tpu.dot_dimension_numbers<[1], [0], [0], [1], [0, 0, 1, 1], [], []>} : vector<22x128xbf16>, vector<128x256xbf16>, vector<22x256xf32> -> vector<22x256xf32>
    %7 = arith.addf %2, %6 : vector<22x256xf32>
    %8 = vector.extract_strided_slice %1 {offsets = [1, 0], sizes = [22, 128], strides = [1, 1]} : vector<36x128xbf16> to vector<22x128xbf16>
    %c1 = arith.constant 1 : index
    %c0_6 = arith.constant 0 : index
    %c0_7 = arith.constant 0 : index
    %9 = vector.load %arg2[%c1, %c0_6, %c0_7] : memref<9x128x256xbf16, #tpu.memory_space<vmem>>, vector<1x128x256xbf16>
    %10 = vector.shape_cast %9 : vector<1x128x256xbf16> to vector<128x256xbf16>
    %cst_8 = arith.constant dense<0.000000e+00> : vector<22x256xf32>
    %11 = tpu.matmul %8, %10, %cst_8 {dimension_numbers = #tpu.dot_dimension_numbers<[1], [0], [0], [1], [0, 0, 1, 1], [], []>} : vector<22x128xbf16>, vector<128x256xbf16>, vector<22x256xf32> -> vector<22x256xf32>
    %12 = arith.addf %7, %11 : vector<22x256xf32>
    %13 = vector.extract_strided_slice %1 {offsets = [2, 0], sizes = [22, 128], strides = [1, 1]} : vector<36x128xbf16> to vector<22x128xbf16>
    %c2 = arith.constant 2 : index
    %c0_9 = arith.constant 0 : index
    %c0_10 = arith.constant 0 : index
    %14 = vector.load %arg2[%c2, %c0_9, %c0_10] : memref<9x128x256xbf16, #tpu.memory_space<vmem>>, vector<1x128x256xbf16>
    %15 = vector.shape_cast %14 : vector<1x128x256xbf16> to vector<128x256xbf16>
    %cst_11 = arith.constant dense<0.000000e+00> : vector<22x256xf32>
    %16 = tpu.matmul %13, %15, %cst_11 {dimension_numbers = #tpu.dot_dimension_numbers<[1], [0], [0], [1], [0, 0, 1, 1], [], []>} : vector<22x128xbf16>, vector<128x256xbf16>, vector<22x256xf32> -> vector<22x256xf32>
    %17 = arith.addf %12, %16 : vector<22x256xf32>
    %18 = vector.extract_strided_slice %1 {offsets = [6, 0], sizes = [22, 128], strides = [1, 1]} : vector<36x128xbf16> to vector<22x128xbf16>
    %c3 = arith.constant 3 : index
    %c0_12 = arith.constant 0 : index
    %c0_13 = arith.constant 0 : index
    %19 = vector.load %arg2[%c3, %c0_12, %c0_13] : memref<9x128x256xbf16, #tpu.memory_space<vmem>>, vector<1x128x256xbf16>
    %20 = vector.shape_cast %19 : vector<1x128x256xbf16> to vector<128x256xbf16>
    %cst_14 = arith.constant dense<0.000000e+00> : vector<22x256xf32>
    %21 = tpu.matmul %18, %20, %cst_14 {dimension_numbers = #tpu.dot_dimension_numbers<[1], [0], [0], [1], [0, 0, 1, 1], [], []>} : vector<22x128xbf16>, vector<128x256xbf16>, vector<22x256xf32> -> vector<22x256xf32>
    %22 = arith.addf %17, %21 : vector<22x256xf32>
    %23 = vector.extract_strided_slice %1 {offsets = [7, 0], sizes = [22, 128], strides = [1, 1]} : vector<36x128xbf16> to vector<22x128xbf16>
    %c4 = arith.constant 4 : index
    %c0_15 = arith.constant 0 : index
    %c0_16 = arith.constant 0 : index
    %24 = vector.load %arg2[%c4, %c0_15, %c0_16] : memref<9x128x256xbf16, #tpu.memory_space<vmem>>, vector<1x128x256xbf16>
    %25 = vector.shape_cast %24 : vector<1x128x256xbf16> to vector<128x256xbf16>
    %cst_17 = arith.constant dense<0.000000e+00> : vector<22x256xf32>
    %26 = tpu.matmul %23, %25, %cst_17 {dimension_numbers = #tpu.dot_dimension_numbers<[1], [0], [0], [1], [0, 0, 1, 1], [], []>} : vector<22x128xbf16>, vector<128x256xbf16>, vector<22x256xf32> -> vector<22x256xf32>
    %27 = arith.addf %22, %26 : vector<22x256xf32>
    %28 = vector.extract_strided_slice %1 {offsets = [8, 0], sizes = [22, 128], strides = [1, 1]} : vector<36x128xbf16> to vector<22x128xbf16>
    %c5 = arith.constant 5 : index
    %c0_18 = arith.constant 0 : index
    %c0_19 = arith.constant 0 : index
    %29 = vector.load %arg2[%c5, %c0_18, %c0_19] : memref<9x128x256xbf16, #tpu.memory_space<vmem>>, vector<1x128x256xbf16>
    %30 = vector.shape_cast %29 : vector<1x128x256xbf16> to vector<128x256xbf16>
    %cst_20 = arith.constant dense<0.000000e+00> : vector<22x256xf32>
    %31 = tpu.matmul %28, %30, %cst_20 {dimension_numbers = #tpu.dot_dimension_numbers<[1], [0], [0], [1], [0, 0, 1, 1], [], []>} : vector<22x128xbf16>, vector<128x256xbf16>, vector<22x256xf32> -> vector<22x256xf32>
    %32 = arith.addf %27, %31 : vector<22x256xf32>
    %33 = vector.extract_strided_slice %1 {offsets = [12, 0], sizes = [22, 128], strides = [1, 1]} : vector<36x128xbf16> to vector<22x128xbf16>
    %c6 = arith.constant 6 : index
    %c0_21 = arith.constant 0 : index
    %c0_22 = arith.constant 0 : index
    %34 = vector.load %arg2[%c6, %c0_21, %c0_22] : memref<9x128x256xbf16, #tpu.memory_space<vmem>>, vector<1x128x256xbf16>
    %35 = vector.shape_cast %34 : vector<1x128x256xbf16> to vector<128x256xbf16>
    %cst_23 = arith.constant dense<0.000000e+00> : vector<22x256xf32>
    %36 = tpu.matmul %33, %35, %cst_23 {dimension_numbers = #tpu.dot_dimension_numbers<[1], [0], [0], [1], [0, 0, 1, 1], [], []>} : vector<22x128xbf16>, vector<128x256xbf16>, vector<22x256xf32> -> vector<22x256xf32>
    %37 = arith.addf %32, %36 : vector<22x256xf32>
    %38 = vector.extract_strided_slice %1 {offsets = [13, 0], sizes = [22, 128], strides = [1, 1]} : vector<36x128xbf16> to vector<22x128xbf16>
    %c7 = arith.constant 7 : index
    %c0_24 = arith.constant 0 : index
    %c0_25 = arith.constant 0 : index
    %39 = vector.load %arg2[%c7, %c0_24, %c0_25] : memref<9x128x256xbf16, #tpu.memory_space<vmem>>, vector<1x128x256xbf16>
    %40 = vector.shape_cast %39 : vector<1x128x256xbf16> to vector<128x256xbf16>
    %cst_26 = arith.constant dense<0.000000e+00> : vector<22x256xf32>
    %41 = tpu.matmul %38, %40, %cst_26 {dimension_numbers = #tpu.dot_dimension_numbers<[1], [0], [0], [1], [0, 0, 1, 1], [], []>} : vector<22x128xbf16>, vector<128x256xbf16>, vector<22x256xf32> -> vector<22x256xf32>
    %42 = arith.addf %37, %41 : vector<22x256xf32>
    %43 = vector.extract_strided_slice %1 {offsets = [14, 0], sizes = [22, 128], strides = [1, 1]} : vector<36x128xbf16> to vector<22x128xbf16>
    %c8 = arith.constant 8 : index
    %c0_27 = arith.constant 0 : index
    %c0_28 = arith.constant 0 : index
    %44 = vector.load %arg2[%c8, %c0_27, %c0_28] : memref<9x128x256xbf16, #tpu.memory_space<vmem>>, vector<1x128x256xbf16>
    %45 = vector.shape_cast %44 : vector<1x128x256xbf16> to vector<128x256xbf16>
    %cst_29 = arith.constant dense<0.000000e+00> : vector<22x256xf32>
    %46 = tpu.matmul %43, %45, %cst_29 {dimension_numbers = #tpu.dot_dimension_numbers<[1], [0], [0], [1], [0, 0, 1, 1], [], []>} : vector<22x128xbf16>, vector<128x256xbf16>, vector<22x256xf32> -> vector<22x256xf32>
    %47 = arith.addf %42, %46 : vector<22x256xf32>
    %c0_30 = arith.constant 0 : index
    %c0_31 = arith.constant 0 : index
    %48 = vector.load %arg3[%c0_30, %c0_31] : memref<1x256xf32, #tpu.memory_space<vmem>>, vector<1x256xf32>
    %49 = vector.broadcast %48 : vector<1x256xf32> to vector<22x256xf32>
    %50 = arith.addf %47, %49 : vector<22x256xf32>
    %cst_32 = arith.constant 0.000000e+00 : f32
    %51 = vector.broadcast %cst_32 : f32 to vector<22x256xf32>
    %52 = arith.maximumf %50, %51 : vector<22x256xf32>
    %53 = vector.extract_strided_slice %52 {offsets = [0, 0], sizes = [4, 256], strides = [1, 1]} : vector<22x256xf32> to vector<4x256xf32>
    %54 = vector.extract_strided_slice %52 {offsets = [6, 0], sizes = [4, 256], strides = [1, 1]} : vector<22x256xf32> to vector<4x256xf32>
    %55 = arith.addf %53, %54 : vector<4x256xf32>
    %56 = vector.extract_strided_slice %52 {offsets = [12, 0], sizes = [4, 256], strides = [1, 1]} : vector<22x256xf32> to vector<4x256xf32>
    %57 = arith.addf %55, %56 : vector<4x256xf32>
    %58 = vector.extract_strided_slice %52 {offsets = [18, 0], sizes = [4, 256], strides = [1, 1]} : vector<22x256xf32> to vector<4x256xf32>
    %59 = arith.addf %57, %58 : vector<4x256xf32>
    %cst_33 = arith.constant 2.500000e-01 : f32
    %60 = vector.broadcast %cst_33 : f32 to vector<4x256xf32>
    %61 = arith.mulf %59, %60 : vector<4x256xf32>
    %62 = arith.truncf %61 : vector<4x256xf32> to vector<4x256xbf16>
    %c0_34 = arith.constant 0 : index
    %c0_35 = arith.constant 0 : index
    %63 = vector.load %arg4[%c0_34, %c0_35] : memref<256x128xbf16, #tpu.memory_space<vmem>>, vector<256x128xbf16>
    %cst_36 = arith.constant dense<0.000000e+00> : vector<4x128xf32>
    %64 = tpu.matmul %62, %63, %cst_36 {dimension_numbers = #tpu.dot_dimension_numbers<[1], [0], [0], [1], [0, 0, 1, 1], [], []>} : vector<4x256xbf16>, vector<256x128xbf16>, vector<4x128xf32> -> vector<4x128xf32>
    %c0_37 = arith.constant 0 : index
    %c0_38 = arith.constant 0 : index
    %65 = vector.load %arg5[%c0_37, %c0_38] : memref<1x128xf32, #tpu.memory_space<vmem>>, vector<1x128xf32>
    %66 = vector.broadcast %65 : vector<1x128xf32> to vector<4x128xf32>
    %67 = arith.addf %64, %66 : vector<4x128xf32>
    %c0_39 = arith.constant 0 : index
    %c0_40 = arith.constant 0 : index
    %c0_41 = arith.constant 0 : index
    %68 = vector.load %arg6[%c0_39, %c0_40, %c0_41] : memref<1x4x128xf32, #tpu.memory_space<vmem>>, vector<1x4x128xf32>
    %69 = vector.shape_cast %68 : vector<1x4x128xf32> to vector<4x128xf32>
    %70 = vector.shape_cast %67 : vector<4x128xf32> to vector<1x4x128xf32>
    tpu.vector_store %arg6[%c0_39, %c0_40, %c0_41], %70 {strides = array<i32>} : memref<1x4x128xf32, #tpu.memory_space<vmem>>, vector<1x4x128xf32>,
    return
  }
  func.func @transform_0(%arg0: i32) -> (i32, i32, i32) {
    %c0_i32 = arith.constant 0 : i32
    %c0_i32_0 = arith.constant 0 : i32
    %c0_i32_1 = arith.constant 0 : i32
    return %arg0, %c0_i32, %c0_i32_0 : i32, i32, i32
  }
  func.func @transform_1(%arg0: i32) -> (i32, i32, i32) {
    %c0_i32 = arith.constant 0 : i32
    %c0_i32_0 = arith.constant 0 : i32
    %c0_i32_1 = arith.constant 0 : i32
    %c0_i32_2 = arith.constant 0 : i32
    return %c0_i32, %c0_i32_0, %c0_i32_1 : i32, i32, i32
  }
  func.func @transform_2(%arg0: i32) -> (i32, i32) {
    %c0_i32 = arith.constant 0 : i32
    %c0_i32_0 = arith.constant 0 : i32
    %c0_i32_1 = arith.constant 0 : i32
    return %c0_i32, %c0_i32_0 : i32, i32
  }
  func.func @transform_3(%arg0: i32) -> (i32, i32) {
    %c0_i32 = arith.constant 0 : i32
    %c0_i32_0 = arith.constant 0 : i32
    %c0_i32_1 = arith.constant 0 : i32
    return %c0_i32, %c0_i32_0 : i32, i32
  }
  func.func @transform_4(%arg0: i32) -> (i32, i32) {
    %c0_i32 = arith.constant 0 : i32
    %c0_i32_0 = arith.constant 0 : i32
    %c0_i32_1 = arith.constant 0 : i32
    return %c0_i32, %c0_i32_0 : i32, i32
  }
  func.func @transform_5(%arg0: i32) -> (i32, i32, i32) {
    %c0_i32 = arith.constant 0 : i32
    %c0_i32_0 = arith.constant 0 : i32
    %c0_i32_1 = arith.constant 0 : i32
    return %arg0, %c0_i32, %c0_i32_0 : i32, i32, i32
  }
}

</mosaic_0001>

<bundles_post_ra>
// kernel: _ocr_forward_arrays.4
= control target key start
LH: loop header
LB: loop body
LE: loop exit
PB: predicated region body
PF: predicated region fallthrough
CT: control target
= control target key end

     0   :  { %8 = vsyncpa [#allocation3], 0  ;;  %s2140_s12 = smov 0   ;;  %s2431_s0 = inlined_call_operand.vmem [shape: bf16[2,100,128], index: 0, kind: input, shape index: {}]   ;;  %s2432_s1 = inlined_call_operand.hbm [shape: bf16[9,128,128], index: 1, kind: input, shape index: {}]   ;;  %s2433_s2 = inlined_call_operand.vmem [shape: f32[1,128], index: 2, kind: input, shape index: {}]   ;;  %s2434_s3 = inlined_call_operand.vmem [shape: bf16[2,8,8,128], index: 3, kind: output, shape index: {}]  }
   0x1 LB: > { %s124_s15 = sshll.u32 %s2432_s1, 4  ;;  %s1586_s16 = sadd.s32 4294967295, %s2115_s12   ;;  %s2115_s12 = sphi %s2140_s12, %s14_s12   ;;  %s125_s15 = int_to_ptr.hbm [resolvable:$true] %s124_s15 }
   0x2   : > { %p1588_p0 = scmp.ge.s32.totalorder %s2115_s12, 1  ;;  %p113_p1 = scmp.lt.s32.totalorder %s2115_s12, 3 }
   0x3   : > { %p2061_p2 = scmp.eq.s32.totalorder %s1586_s16, 0  ;;  %s2117_s17 = smov [#allocation2]  }
   0x4   : > { %p114_p3 = pnand %p1588_p0, %p113_p1  ;;  %s126_s18 = sshll.u32 %s2117_s17, 4  ;;  %s127_s18 = int_to_ptr.vmem [resolvable:$true] %s126_s18 }
   0x5   : > { %s2118_s19 = smov 64   ;;  %s2119_s20 = smov 4  }
   0x6   : > { %p2057_p4 = pneg %p114_p3  ;;  %153 = sbr.rel (%p114_p3) target bundleno = 379 (0x17b), region = 32 }
   0x8   : > { %p2058_p5 = pnand %p2061_p2, %p2057_p4 }
   0xa   : > { %2060 = dma.hbm_to_vmem [thread:$0]  (!%p2058_p5), %s125_s15, 9216, %s127_s18, [#allocation3], %s2118_s19, %s2118_s19, %s2119_s20  }
   0xb   : > { %2110 = dma.done.wait (%p2061_p2), [#allocation3], 9216  }
   0xc   : > { %2112 = vsyncadd (%p2061_p2), [#allocation3], 4294958080  ;;  %p178_p6 = scmp.lt.s32.totalorder %s1586_s16, 1  ;;  %v1915_v0 = vld [vmem:[#allocation2 + $0x78] sm:$0xff]  ;;  %v1914_v1 = vld [vmem:[#allocation2 + $0x70] sm:$0xff]  ;;  %vm490_vm1 = vcmask 1046528  }
   0xd   : > { %352 = vmatpush.bf16.msra.mxu0 %v1915_v0  ;;  %2034 = vmatpush.bf16.msra.mxu1 %v1915_v0  ;;  %v1931_v2 = vld [vmem:[#allocation2 + $0xf8] sm:$0xff]  ;;  %v1930_v3 = vld [vmem:[#allocation2 + $0xf0] sm:$0xff]  ;;  %v1913_v4 = vld [vmem:[#allocation2 + $0x68] sm:$0xff]  ;;  %vm259_vm0 = vsmask.f32 7424  ;;  %vm911_vm4 = vcmask 1045504  }
   0xe   : > { %2035 = vmatpush.bf16.msra.mxu2 %v1915_v0  ;;  %s2442_s16 = smov (!%p178_p6, %s1586_s16), 1  ;;  %683 = vmatpush.bf16.msra.mxu3 %v1931_v2  ;;  %v1929_v5 = vld [vmem:[#allocation2 + $0xe8] sm:$0xff]  ;;  %v1912_v6 = vld [vmem:[#allocation2 + $0x60] sm:$0xff]  ;;  %v1911_v8 = vld [vmem:[#allocation2 + $0x58] sm:$0xff]  ;;  %vm747_vm2 = vsmask.f32 6400 }
   0xf   : > { %s2052_s21 = smul.u32 52, %s2442_s16  ;;  %v1928_v7 = vld [vmem:[#allocation2 + $0xe0] sm:$0xff]  ;;  %v1927_v11 = vld [vmem:[#allocation2 + $0xd8] sm:$0xff]  ;;  %v1910_v13 = vld [vmem:[#allocation2 + $0x50] sm:$0xff]  ;;  %vm1166_vm3 = vsmask.f32 5376 }
  0x10   : > { %v1926_v18 = vld [vmem:[#allocation2 + $0xd0] sm:$0xff]  ;;  %v1909_v22 = vld [vmem:[#allocation2 + $0x48] sm:$0xff]  ;;  %v1908_v30 = vld [vmem:[#allocation2 + $0x40] sm:$0xff]  ;;  %vm1314_vm5 = vcmask 1044480   ;;  %s1899_s27 = sshll.u32 %s2442_s16, 5  ;;  %vm1453_vm6 = vcmask 1042432  }
  0x11   : > { %353 = vmatpush.bf16.msra.mxu0 %v1914_v1  ;;  %2036 = vmatpush.bf16.msra.mxu1 %v1914_v1  ;;  %s2157_s24 = scalar_lea.vmem %s2431_s0, %s2052_s21  ;;  %v1925_v27 = vld [vmem:[#allocation2 + $0xc8] sm:$0xff]  ;;  %v1907_v37 = vld [vmem:[#allocation2 + $0x38] sm:$0xff]  ;;  %v1924_v43 = vld [vmem:[#allocation2 + $0xc0] sm:$0xff]  ;;  %s2377_s30 = scalar_lea.vmem %s2434_s3, %s1899_s27  ;;  %vm1454_vm7 = vcmask 1046532   ;;  %vm1465_vm9 = vcmask 1041408   ;;  %vm1466_vm10 = vcmask 1045508  }
  0x12   : > { %2037 = vmatpush.bf16.msra.mxu2 %v1914_v1  ;;  %684 = vmatpush.bf16.msra.mxu3 %v1930_v3  ;;  %v2160_v9 = vld [vmem:[%s2157_s24] sm:$0xff]   ;;  %v2163_v10 = vld [vmem:[%s2157_s24 + $0x10] sm:$0xff]   ;;  %v2167_v14 = vld [vmem:[%s2157_s24 + $0x8] sm:$0xff]   ;;  %vm1477_vm12 = vcmask 1040384   ;;  %vm1478_vm13 = vcmask 1044484  }
  0x13   : > { %v263_v12 = vshll.u32 %v2160_v9, 16  ;;  %v276_v15 = vshll.u32 %v2163_v10, 16  ;;  %v2171_v16 = vld [vmem:[%s2157_s24 + $0x18] sm:$0xff]   ;;  %v2174_v17 = vld [vmem:[%s2157_s24 + $0x20] sm:$0xff]   ;;  %v261_v19 = vshrl.u32 %v2160_v9, 16  ;;  %v268_v21 = vshll.u32 %v2167_v14, 16  ;;  %vm2384_vm8 = vmor %vm1453_vm6, %vm1454_vm7 }
  0x14   : > { %v280_v24 = vshrl.u32 %v2163_v10, 16  ;;  %v284_v25 = vshll.u32 %v2171_v16, 16  ;;  %v292_v26 = vshll.u32 %v2174_v17, 16  ;;  %v296_v34 = vshrl.u32 %v2174_v17, 16  ;;  %v2196_v35 = vld [vmem:[%s2157_s24 + $0x4] sm:$0xff]   ;;  %v2199_v36 = vld [vmem:[%s2157_s24 + $0xc] sm:$0xff]   ;;  %vm2393_vm11 = vmor %vm1465_vm9, %vm1466_vm10 }
  0x15   : > { %354 = vmatpush.bf16.msra.mxu0 %v1913_v4  ;;  %2038 = vmatpush.bf16.msra.mxu1 %v1913_v4  ;;  %v265_v20 = vrot.slane %v263_v12, 1  ;;  %v2180_v23 = vrot.slane %v276_v15, 1  ;;  %v270_v29 = vrot.slane %v268_v21, 1  ;;  %v1923_v38 = vld [vmem:[#allocation2 + $0xb8] sm:$0xff]  ;;  %v621_v44 = vrot.slane %v2196_v35, 1  ;;  %v1906_v46 = vld [vmem:[#allocation2 + $0x30] sm:$0xff]  ;;  %vm2402_vm14 = vmor %vm1477_vm12, %vm1478_vm13 }
  0x16   : > { %2039 = vmatpush.bf16.msra.mxu2 %v1913_v4  ;;  %685 = vmatpush.bf16.msra.mxu3 %v1929_v5  ;;  %v286_v32 = vrot.slane %v284_v25, 1  ;;  %v294_v33 = vrot.slane %v292_v26, 1  ;;  %v1939_v39 = vld [vmem:[#allocation2 + $0x138] sm:$0xff]  ;;  %v622_v45 = vrot.slane %v2199_v36, 1  ;;  %v1922_v48 = vld [vmem:[#allocation2 + $0xb0] sm:$0xff]  ;;  %v1905_v51 = vld [vmem:[#allocation2 + $0x28] sm:$0xff] }
  0x17   : > { %v266_v28 = vor.u32 %v265_v20, %v261_v19  ;;  %v282_v31 = vor.u32 %v280_v24, %v2180_v23  ;;  %v1963_v47 = vld [vmem:[#allocation2 + $0x1f8] sm:$0xff]  ;;  %v1938_v49 = vld [vmem:[#allocation2 + $0x130] sm:$0xff]  ;;  %v1921_v53 = vld [vmem:[#allocation2 + $0xa8] sm:$0xff]  ;;  %v272_v55 = vshrl.u32 %v2167_v14, 16  ;;  %v288_v56 = vshrl.u32 %v2171_v16, 16 }
  0x18   : > { %v298_v42 = vor.u32 %v296_v34, %v294_v33  ;;  %v623_v50 = vsel %vm490_vm1, %v621_v44, %v622_v45  ;;  %v1962_v52 = vld [vmem:[#allocation2 + $0x1f0] sm:$0xff]  ;;  %v1937_v54 = vld [vmem:[#allocation2 + $0x128] sm:$0xff]  ;;  %v1904_v57 = vld [vmem:[#allocation2 + $0x20] sm:$0xff]  ;;  %v752_v12 = vshll.u32 %v2196_v35, 16 }
  0x19   : > { %355 = vmatpush.bf16.msra.mxu0 %v1912_v6  ;;  %2040 = vmatpush.bf16.msra.mxu1 %v1912_v6  ;;  %v271_v40 = vsel %vm259_vm0, %v266_v28, %v270_v29  ;;  %v287_v41 = vsel %vm259_vm0, %v282_v31, %v286_v32  ;;  %v1920_v58 = vld [vmem:[#allocation2 + $0xa0] sm:$0xff]  ;;  %v274_v60 = vor.u32 %v272_v55, %v270_v29  ;;  %v2215_v62 = vld [vmem:[%s2157_s24 + $0x14] sm:$0xff]   ;;  %v1901_v20 = vld [vmem:[#allocation2 + $0x8] sm:$0xff] }
  0x1a   : > { %2041 = vmatpush.bf16.msra.mxu2 %v1912_v6  ;;  %686 = vmatpush.bf16.msra.mxu3 %v1928_v7  ;;  %v1936_v59 = vld [vmem:[#allocation2 + $0x120] sm:$0xff]  ;;  %v290_v61 = vor.u32 %v288_v56, %v286_v32  ;;  %v1903_v63 = vld [vmem:[#allocation2 + $0x18] sm:$0xff]  ;;  %v624_v4 = vrot.slane %v2215_v62, 1  ;;  %v1902_v5 = vld [vmem:[#allocation2 + $0x10] sm:$0xff]  ;;  %v754_v28 = vrot.slane %v752_v12, 2 }
  0x1b   : > { %v1919_v0 = vld [vmem:[#allocation2 + $0x98] sm:$0xff]  ;;  %v279_v2 = vsel %vm259_vm0, %v274_v60, %v2180_v23  ;;  %v1918_v6 = vld [vmem:[#allocation2 + $0x90] sm:$0xff]  ;;  %v1933_v23 = vld [vmem:[#allocation2 + $0x108] sm:$0xff] }
  0x1c   : > { %v1935_v1 = vld [vmem:[#allocation2 + $0x118] sm:$0xff]  ;;  %v295_v3 = vsel %vm259_vm0, %v290_v61, %v294_v33  ;;  %v1934_v7 = vld [vmem:[#allocation2 + $0x110] sm:$0xff]  ;;  %v625_v19 = vsel %vm490_vm1, %v622_v45, %v624_v4  ;;  %v1900_v31 = vld [vmem:[#allocation2] sm:$0xff]  ;;  %v491_v33 = vrot.slane %v2160_v9, 1 }
  0x1d   : > { %356 = vmatpush.bf16.msra.mxu0 %v1911_v8  ;;  %2042 = vmatpush.bf16.msra.mxu1 %v1911_v8  ;;  %v1916_v32 = vld [vmem:[#allocation2 + $0x80] sm:$0xff]  ;;  %v1959_v60 = vld [vmem:[#allocation2 + $0x1d8] sm:$0xff]  ;;  %v1950_v12 = vld [vmem:[#allocation2 + $0x190] sm:$0xff] }
  0x1e   : > { %2043 = vmatpush.bf16.msra.mxu2 %v1911_v8  ;;  %687 = vmatpush.bf16.msra.mxu3 %v1927_v11  ;;  %v749_v8 = vshrl.u32 %v2196_v35, 16  ;;  %v1961_v11 = vld [vmem:[#allocation2 + $0x1e8] sm:$0xff]  ;;  %v2231_v44 = vld [vmem:[%s2157_s24 + $0x1c] sm:$0xff]  }
  0x21   : > { %357 = vmatpush.bf16.msra.mxu0 %v1910_v13  ;;  %2044 = vmatpush.bf16.msra.mxu1 %v1910_v13 }
  0x22   : > { %2045 = vmatpush.bf16.msra.mxu2 %v1910_v13  ;;  %688 = vmatpush.bf16.msra.mxu3 %v1926_v18  ;;  %v757_v13 = vshrl.u32 %v2199_v36, 16  ;;  %v760_v18 = vshll.u32 %v2199_v36, 16 }
  0x24   : > { %v759_v29 = vrot.slane %v757_v13, 1  ;;  %v1967_v13 = vld [vmem:[#allocation2 + $0x218] sm:$0xff] }
  0x25   : > { %358 = vmatpush.bf16.msra.mxu0 %v1909_v22  ;;  %2046 = vmatpush.bf16.msra.mxu1 %v1909_v22 }
  0x26   : > { %2047 = vmatpush.bf16.msra.mxu2 %v1909_v22  ;;  %689 = vmatpush.bf16.msra.mxu3 %v1925_v27  ;;  %v1917_v22 = vld [vmem:[#allocation2 + $0x88] sm:$0xff]  ;;  %v751_v27 = vrot.slane %v749_v8, 1 }
  0x29   : > { %359 = vmatpush.bf16.msra.mxu0 %v1908_v30  ;;  %2048 = vmatpush.bf16.msra.mxu1 %v1908_v30 }
  0x2a   : > { %2049 = vmatpush.bf16.msra.mxu2 %v1908_v30  ;;  %690 = vmatpush.bf16.msra.mxu3 %v1924_v43  ;;  %v762_v30 = vrot.slane %v760_v18, 2  ;;  %v1971_v43 = vld [vmem:[#allocation2 + $0x238] sm:$0xff]  ;;  %v1958_v18 = vld [vmem:[#allocation2 + $0x1d0] sm:$0xff] }
  0x2c   : > { %360 = vmatmul.bf16.vlgmr.msra.gmra.mxu0 %v271_v40  ;;  %370 = vmatmul.bf16.vlgmr.msra.gmra.mxu1 %v287_v41  ;;  %v1947_v40 = vld [vmem:[#allocation2 + $0x178] sm:$0xff]  ;;  %v755_v41 = vor.u32 %v754_v28, %v751_v27  ;;  %v1949_v27 = vld [vmem:[#allocation2 + $0x188] sm:$0xff]  ;;  %v1966_v28 = vld [vmem:[#allocation2 + $0x210] sm:$0xff] }
  0x2d   : > { %439 = vmatpush.bf16.msrb.mxu1 %v1907_v37  ;;  %850 = vmatpush.bf16.msrb.mxu0 %v1939_v39  ;;  %v492_v37 = vrot.slane %v2167_v14, 1  ;;  %v1955_v39 = vld [vmem:[#allocation2 + $0x1b8] sm:$0xff] }
  0x2e   : > { %553 = vmatpush.bf16.msrb.mxu2 %v1923_v38  ;;  %1253 = vmatpush.bf16.msrb.mxu3 %v1963_v47  ;;  %v1932_v38 = vld [vmem:[#allocation2 + $0x100] sm:$0xff]  ;;  %v1954_v47 = vld [vmem:[#allocation2 + $0x1b0] sm:$0xff] }
  0x2f   : > { %380 = vmatmul.bf16.vlgmr.msra.gmra.mxu2 %v298_v42  ;;  %691 = vmatmul.bf16.vlgmr.msra.gmra.mxu3 %v623_v50  ;;  %v763_v42 = vor.u32 %v762_v30, %v759_v29  ;;  %v493_v45 = vsel %vm490_vm1, %v491_v33, %v492_v37  ;;  %v1970_v50 = vld [vmem:[#allocation2 + $0x230] sm:$0xff]  ;;  %v1957_v29 = vld [vmem:[#allocation2 + $0x1c8] sm:$0xff] }
  0x31   : > { %440 = vmatpush.bf16.msrb.mxu1 %v1906_v46  ;;  %851 = vmatpush.bf16.msrb.mxu0 %v1938_v49  ;;  %v764_v46 = vsel %vm747_vm2, %v755_v41, %v763_v42  ;;  %v626_v49 = vrot.slane %v2231_v44, 1 }
  0x32   : > { %554 = vmatpush.bf16.msrb.mxu2 %v1922_v48  ;;  %1254 = vmatpush.bf16.msrb.mxu3 %v1962_v52  ;;  %v1946_v48 = vld [vmem:[#allocation2 + $0x170] sm:$0xff]  ;;  %v766_v52 = vshrl.u32 %v2215_v62, 16 }
  0x35   : > { %441 = vmatpush.bf16.msrb.mxu1 %v1905_v51  ;;  %852 = vmatpush.bf16.msrb.mxu0 %v1937_v54  ;;  %v1960_v51 = vld [vmem:[#allocation2 + $0x1e0] sm:$0xff]  ;;  %v1953_v54 = vld [vmem:[#allocation2 + $0x1a8] sm:$0xff] }
  0x36   : > { %555 = vmatpush.bf16.msrb.mxu2 %v1921_v53  ;;  %1255 = vmatpush.bf16.msrb.mxu3 %v1961_v11  ;;  %v769_v53 = vshll.u32 %v2215_v62, 16 }
  0x38   : > { %v771_v61 = vrot.slane %v769_v53, 2  ;;  %v1170_v53 = vrot.slane %v280_v24, 2 }
  0x39   : > { %442 = vmatpush.bf16.msrb.mxu1 %v1904_v57  ;;  %853 = vmatpush.bf16.msrb.mxu0 %v1936_v59  ;;  %v1945_v57 = vld [vmem:[#allocation2 + $0x168] sm:$0xff] }
  0x3a   : > { %556 = vmatpush.bf16.msrb.mxu2 %v1920_v58  ;;  %v627_v58 = vsel %vm490_vm1, %v624_v4, %v626_v49  ;;  %v1969_v59 = vld [vmem:[#allocation2 + $0x228] sm:$0xff]  ;;  %1256 = vmatpush.bf16.msrb.mxu3 %v1960_v51  ;;  %v1951_v4 = vld [vmem:[#allocation2 + $0x198] sm:$0xff]  ;;  %v1167_v51 = vrot.slane %v272_v55, 2 }
  0x3c   : > { %365 = vmatmul.bf16.gmra.mxu0 %v279_v2  ;;  %375 = vmatmul.bf16.gmra.mxu1 %v295_v3  ;;  %v494_v2 = vrot.slane %v2163_v10, 1 }
  0x3d   : > { %443 = vmatpush.bf16.msrb.mxu1 %v1903_v63  ;;  %854 = vmatpush.bf16.msrb.mxu0 %v1935_v1  ;;  %v1952_v63 = vld [vmem:[#allocation2 + $0x1a0] sm:$0xff] }
  0x3e   : > { %557 = vmatpush.bf16.msrb.mxu2 %v1919_v0  ;;  %v1944_v0 = vld [vmem:[#allocation2 + $0x160] sm:$0xff]  ;;  %1257 = vmatpush.bf16.msrb.mxu3 %v1959_v60 }
  0x3f   : > { %696 = vmatmul.bf16.gmra.mxu3 %v625_v19  ;;  %v1968_v1 = vld [vmem:[#allocation2 + $0x220] sm:$0xff]  ;;  %v1942_v19 = vld [vmem:[#allocation2 + $0x150] sm:$0xff] }
  0x41   : > { %444 = vmatpush.bf16.msrb.mxu1 %v1902_v5  ;;  %855 = vmatpush.bf16.msrb.mxu0 %v1934_v7  ;;  %v2244_v5 = vld [vmem:[%s2157_s24 + $0x24] sm:$0xff]   ;;  %v495_v7 = vsel %vm490_vm1, %v492_v37, %v494_v2 }
  0x42   : > { %558 = vmatpush.bf16.msrb.mxu2 %v1918_v6  ;;  %v1943_v6 = vld [vmem:[#allocation2 + $0x158] sm:$0xff]  ;;  %v628_v11 = vrot.slane %v2244_v5, 1  ;;  %1258 = vmatpush.bf16.msrb.mxu3 %v1958_v18  ;;  %v787_v41 = vshll.u32 %v2244_v5, 16 }
  0x45   : > { %445 = vmatpush.bf16.msrb.mxu1 %v1901_v20  ;;  %856 = vmatpush.bf16.msrb.mxu0 %v1933_v23  ;;  %v775_v20 = vshrl.u32 %v2231_v44, 16  ;;  %v629_v23 = vsel %vm490_vm1, %v626_v49, %v628_v11  ;;  %v498_v49 = vrot.slane %v2174_v17, 1 }
  0x46   : > { %559 = vmatpush.bf16.msrb.mxu2 %v1917_v22  ;;  %v778_v22 = vshll.u32 %v2231_v44, 16  ;;  %1259 = vmatpush.bf16.msrb.mxu3 %v1957_v29  ;;  %v200_v29 = vld [vmem:[%s2157_s24 + $0x30] sm:$0x3] }
  0x47   : > { %v777_v30 = vrot.slane %v775_v20, 1 }
  0x49   : > { %446 = vmatpush.bf16.msrb.mxu1 %v1900_v31  ;;  %857 = vmatpush.bf16.msrb.mxu0 %v1932_v38  ;;  %v780_v31 = vrot.slane %v778_v22, 2  ;;  %v1318_v22 = vrot.slane %v2171_v16, 3 }
  0x4a   : > { %560 = vmatpush.bf16.msrb.mxu2 %v1916_v32  ;;  %v496_v32 = vrot.slane %v2171_v16, 1 }
  0x4b   : > { %v781_v33 = vor.u32 %v780_v31, %v777_v30 }
  0x4c   : > { %447 = vmatmul.bf16.vlgmr.msrb.gmra.mxu1 %v2160_v9  ;;  %858 = vmatmul.bf16.vlgmr.msrb.gmra.mxu0 %v764_v46  ;;  %v768_v9 = vrot.slane %v766_v52, 1  ;;  %v497_v37 = vsel %vm490_vm1, %v494_v2, %v496_v32  ;;  %v1940_v46 = vld [vmem:[#allocation2 + $0x140] sm:$0xff]  ;;  %v1168_v52 = vrot.slane %v268_v21, 3 }
  0x4d   : > { %976 = vmatpush.bf16.msra.mxu1 %v1947_v40  ;;  %1379 = vmatpush.bf16.msra.mxu0 %v1971_v43  ;;  %v784_v40 = vshrl.u32 %v2244_v5, 16  ;;  %v1965_v43 = vld [vmem:[#allocation2 + $0x208] sm:$0xff] }
  0x4e   : > { %1105 = vmatpush.bf16.msra.mxu2 %v1955_v39  ;;  %v772_v3 = vor.u32 %v771_v61, %v768_v9  ;;  %v1941_v39 = vld [vmem:[#allocation2 + $0x148] sm:$0xff]  ;;  %v1169_v61 = vor.u32 %v1168_v52, %v1167_v51 }
  0x4f   : > { %561 = vmatmul.bf16.vlgmr.msrb.gmra.mxu2 %v493_v45  ;;  %701 = vmatmul.bf16.gmra.mxu3 %v627_v58  ;;  %v1956_v45 = vld [vmem:[#allocation2 + $0x1c0] sm:$0xff]  ;;  %v499_v58 = vsel %vm490_vm1, %v496_v32, %v498_v49 }
  0x50   : > { %v773_v8 = vsel %vm747_vm2, %v763_v42, %v772_v3  ;;  %v782_v38 = vsel %vm747_vm2, %v772_v3, %v781_v33  ;;  %v1948_v42 = vld [vmem:[#allocation2 + $0x180] sm:$0xff]  ;;  %1260 = vmatpush.bf16.msrb.mxu3 %v1956_v45 }
  0x51   : > { %977 = vmatpush.bf16.msra.mxu1 %v1946_v48  ;;  %1380 = vmatpush.bf16.msra.mxu0 %v1970_v50  ;;  %v789_v48 = vrot.slane %v787_v41, 2 }
  0x52   : > { %1106 = vmatpush.bf16.msra.mxu2 %v1954_v47  ;;  %v786_v47 = vrot.slane %v784_v40, 1 }
  0x54   : > { %v790_v50 = vor.u32 %v789_v48, %v786_v47  ;;  %v1320_v47 = vrot.slane %v2174_v17, 3 }
  0x55   : > { %978 = vmatpush.bf16.msra.mxu1 %v1945_v57  ;;  %1381 = vmatpush.bf16.msra.mxu0 %v1969_v59  ;;  %v2269_v57 = vld [vmem:[%s2157_s24 + $0x28] sm:$0xff]   ;;  %v1964_v59 = vld [vmem:[#allocation2 + $0x200] sm:$0xff] }
  0x56   : > { %1107 = vmatpush.bf16.msra.mxu2 %v1953_v54  ;;  %v1171_v54 = vrot.slane %v276_v15, 3  ;;  %v791_v60 = vsel %vm747_vm2, %v781_v33, %v790_v50  ;;  %v1995_v9 = vunpack.c.h.b16 %v2269_v57 }
  0x58   : > { %v1172_v55 = vor.u32 %v1171_v54, %v1170_v53  ;;  %v2275_v21 = vpack.c.b16 %v1995_v9, %v1995_v9  ;;  %v1321_v54 = vsel %vm1314_vm5, %v1318_v22, %v1320_v47 }
  0x59   : > { %979 = vmatpush.bf16.msra.mxu1 %v1944_v0  ;;  %1382 = vmatpush.bf16.msra.mxu0 %v1968_v1  ;;  %v1174_v0 = vrot.slane %v288_v56, 2  ;;  %v1175_v1 = vrot.slane %v284_v25, 3  ;;  %v1178_v56 = vrot.slane %v296_v34, 2  ;;  %v912_v25 = vrot.slane %v2196_v35, 2 }
  0x5a   : > { %1108 = vmatpush.bf16.msra.mxu2 %v1952_v63  ;;  %v1173_v15 = vsel %vm1166_vm3, %v1169_v61, %v1172_v55  ;;  %v793_v24 = vshll.u32 %v2275_v21, 16  ;;  %v1048_v61 = vrot.slane %v2269_v57, 2 }
  0x5b   : > { %v1176_v3 = vor.u32 %v1175_v1, %v1174_v0 }
  0x5c   : > { %452 = vmatmul.bf16.gmra.mxu1 %v2167_v14  ;;  %863 = vmatmul.bf16.gmra.mxu0 %v773_v8  ;;  %v795_v63 = vrot.slane %v793_v24, 2  ;;  %v913_v8 = vrot.slane %v2199_v36, 2  ;;  %v915_v36 = vrot.slane %v2215_v62, 2  ;;  %v919_v24 = vrot.slane %v2244_v5, 2 }
  0x5d   : > { %980 = vmatpush.bf16.msra.mxu1 %v1943_v6  ;;  %1383 = vmatpush.bf16.msra.mxu0 %v1967_v13  ;;  %v1041_v6 = vrot.slane %v2167_v14, 2  ;;  %v1179_v13 = vrot.slane %v292_v26, 3  ;;  %v1044_v26 = vrot.slane %v2171_v16, 2 }
  0x5e   : > { %1109 = vmatpush.bf16.msra.mxu2 %v1951_v4  ;;  %v796_v2 = vsel %vm747_vm2, %v790_v50, %v795_v63  ;;  %v1177_v4 = vsel %vm1166_vm3, %v1172_v55, %v1176_v3  ;;  %v916_v32 = vsel %vm911_vm4, %v913_v8, %v915_v36  ;;  %v1322_v63 = vrot.slane %v2269_v57, 3 }
  0x5f   : > { %566 = vmatmul.bf16.gmra.mxu2 %v495_v7  ;;  %706 = vmatmul.bf16.gmra.mxu3 %v629_v23  ;;  %v1042_v7 = vrot.slane %v2163_v10, 2  ;;  %v1180_v20 = vor.u32 %v1179_v13, %v1178_v56 }
  0x61   : > { %981 = vmatpush.bf16.msra.mxu1 %v1942_v19  ;;  %1384 = vmatpush.bf16.msra.mxu0 %v1966_v28  ;;  %v1043_v18 = vsel %vm911_vm4, %v1041_v6, %v1042_v7  ;;  %v914_v19 = vsel %vm911_vm4, %v912_v25, %v913_v8  ;;  %v1181_v35 = vsel %vm1166_vm3, %v1176_v3, %v1180_v20 }
  0x62   : > { %1110 = vmatpush.bf16.msra.mxu2 %v1950_v12  ;;  %v1316_v12 = vrot.slane %v2163_v10, 3  ;;  %v1045_v28 = vsel %vm911_vm4, %v1042_v7, %v1044_v26 }
  0x64   : > { %v1319_v33 = vsel %vm1314_vm5, %v1316_v12, %v1318_v22 }
  0x65   : > { %982 = vmatpush.bf16.msra.mxu1 %v1941_v39  ;;  %1385 = vmatpush.bf16.msra.mxu0 %v1965_v43  ;;  %v1046_v43 = vrot.slane %v2174_v17, 2 }
  0x66   : > { %1111 = vmatpush.bf16.msra.mxu2 %v1949_v27 }
  0x67   : > { %v1047_v50 = vsel %vm911_vm4, %v1044_v26, %v1046_v43  ;;  %v1049_v0 = vsel %vm911_vm4, %v1046_v43, %v1048_v61 }
  0x69   : > { %983 = vmatpush.bf16.msra.mxu1 %v1940_v46  ;;  %1386 = vmatpush.bf16.msra.mxu0 %v1964_v59  ;;  %v917_v46 = vrot.slane %v2231_v44, 2 }
  0x6a   : > { %1112 = vmatpush.bf16.msra.mxu2 %v1948_v42 }
  0x6b   : > { %v918_v53 = vsel %vm911_vm4, %v915_v36, %v917_v46  ;;  %v920_v3 = vsel %vm911_vm4, %v917_v46, %v919_v24 }
  0x6c   : > { %457 = vmatmul.bf16.gmra.mxu1 %v2163_v10  ;;  %868 = vmatmul.bf16.gmra.mxu0 %v782_v38  ;;  %v1183_v10 = vshrl.u32 %v2269_v57, 16  ;;  %v1038_v38 = vunpack.c.l.b16 %v200_v29 }
  0x6e   : > { %v1185_v23 = vrot.slane %v1183_v10, 2 }
  0x6f   : > { %571 = vmatmul.bf16.gmra.mxu2 %v497_v37  ;;  %711 = vmatmul.bf16.gmra.mxu3 %v628_v11  ;;  %v1315_v11 = vrot.slane %v2167_v14, 3  ;;  %v1186_v14 = vshll.u32 %v2269_v57, 16 }
  0x71   : > { %v1317_v34 = vsel %vm1314_vm5, %v1315_v11, %v1316_v12  ;;  %v1188_v27 = vrot.slane %v1186_v14, 3 }
  0x73   : > { %v1189_v37 = vor.u32 %v1188_v27, %v1185_v23 }
  0x75   : > { %v1190_v62 = vsel %vm1166_vm3, %v1180_v20, %v1189_v37 }
  0x7c   : > { %462 = vmatmul.bf16.gmra.mxu1 %v2171_v16  ;;  %873 = vmatmul.bf16.gmra.mxu0 %v791_v60  ;;  %v1040_v16 = vpack.c.b16 %v1038_v38, %v1038_v38 }
  0x7e   : > { %v1192_v41 = vshrl.u32 %v1040_v16, 16  ;;  %v1195_v42 = vshll.u32 %v1040_v16, 16  ;;  %v1050_v13 = vrot.slane %v1040_v16, 2  ;;  %v1324_v20 = vrot.slane %v1040_v16, 3 }
  0x7f   : > { %576 = vmatmul.bf16.gmra.mxu2 %v499_v58  ;;  %1261 = vmatmul.bf16.vlgmr.msrb.gmra.mxu3 %v1173_v15 }
  0x80   : > { %v1194_v48 = vrot.slane %v1192_v41, 2  ;;  %v1051_v10 = vsel %vm911_vm4, %v1048_v61, %v1050_v13  ;;  %v1325_v23 = vsel %vm1314_vm5, %v1322_v63, %v1324_v20 }
  0x8c   : > { %467 = vmatmul.bf16.gmra.mxu1 %v2174_v17  ;;  %878 = vmatmul.bf16.gmra.mxu0 %v796_v2 }
  0x8f   : > { %581 = vmatmul.bf16.gmra.mxu2 %v498_v49  ;;  %1266 = vmatmul.bf16.gmra.mxu3 %v1177_v4  ;;  %v1197_v49 = vrot.slane %v1195_v42, 3  ;;  %v1323_v4 = vsel %vm1314_vm5, %v1320_v47, %v1322_v63 }
  0x91   : > { %v1198_v58 = vor.u32 %v1197_v49, %v1194_v48 }
  0x93   : > { %v1199_v17 = vsel %vm1166_vm3, %v1189_v37, %v1198_v58 }
  0x9c   : > { %984 = vmatmul.bf16.vlgmr.msra.gmra.mxu1 %v914_v19  ;;  %1387 = vmatmul.bf16.vlgmr.msra.gmra.mxu0 %v1317_v34  ;;  %v921_v34 = vrot.slane %v2275_v21, 2 }
  0x9e   : > { %v922_v22 = vsel %vm911_vm4, %v919_v24, %v921_v34 }
  0x9f   : > { %1113 = vmatmul.bf16.vlgmr.msra.gmra.mxu2 %v1043_v18  ;;  %1271 = vmatmul.bf16.gmra.mxu3 %v1181_v35 }
  0xa9   : > { %v361_v30 = vpop.f32.mrf.mxu0  ;;  %v2307_v31 = vpop.f32.mrf.mxu1 }
  0xac   : > { %989 = vmatmul.bf16.gmra.mxu1 %v916_v32  ;;  %1392 = vmatmul.bf16.gmra.mxu0 %v1319_v33 }
  0xaf   : > { %1118 = vmatmul.bf16.gmra.mxu2 %v1045_v28  ;;  %1276 = vmatmul.bf16.gmra.mxu3 %v1190_v62 }
  0xb1   : > { %v363_v39 = vpop.f32.mrf.mxu0  ;;  %v2312_v40 = vpop.f32.mrf.mxu1 }
  0xb2   : > { %v692_v45 = vpop.f32.mrf.mxu3  ;;  %v2322_v59 = vpop.f32.mrf.mxu2 }
  0xb9   : > { %v366_v51 = vpop.f32.mrf.mxu0  ;;  %v2318_v52 = vpop.f32.mrf.mxu1 }
  0xba   : > { %v694_v60 = vpop.f32.mrf.mxu3  ;;  %v2328_v15 = vpop.f32.mrf.mxu2 }
  0xbc   : > { %994 = vmatmul.bf16.gmra.mxu1 %v918_v53  ;;  %1397 = vmatmul.bf16.gmra.mxu0 %v1321_v54 }
  0xbf   : > { %1123 = vmatmul.bf16.gmra.mxu2 %v1047_v50  ;;  %1281 = vmatmul.bf16.gmra.mxu3 %v1199_v17 }
  0xc1   : > { %v368_v44 = vpop.f32.mrf.mxu0  ;;  %v2325_v9 = vpop.f32.mrf.mxu1 }
  0xc2   : > { %v697_v55 = vpop.f32.mrf.mxu3 }
  0xc9   : > { %v448_v1 = vpop.f32.mrf.mxu1  ;;  %v859_v2 = vpop.f32.mrf.mxu0 }
  0xca   : > { %v449_v6 = vadd.f32 %v448_v1, %v361_v30  ;;  %v699_v7 = vpop.f32.mrf.mxu3 }
  0xcc   : > { %999 = vmatmul.bf16.gmra.mxu1 %v920_v3  ;;  %1402 = vmatmul.bf16.gmra.mxu0 %v1323_v4 }
  0xcf   : > { %1128 = vmatmul.bf16.gmra.mxu2 %v1049_v0 }
  0xd1   : > { %v450_v11 = vpop.f32.mrf.mxu1  ;;  %v861_v5 = vpop.f32.mrf.mxu0 }
  0xd2   : > { %v562_v56 = vpop.f32.mrf.mxu2  ;;  %v451_v12 = vadd.f32 %v450_v11, %v363_v39  ;;  %v702_v18 = vpop.f32.mrf.mxu3 }
  0xd3   : > { %v587_v25 = vadd.f32 %v562_v56, %v449_v6 }
  0xd5   : > { %v717_v8 = vadd.f32 %v692_v45, %v587_v25 }
  0xd7   : > { %v2335_v57 = vadd.f32 %v859_v2, %v717_v8 }
  0xd9   : > { %v453_v26 = vpop.f32.mrf.mxu1  ;;  %v864_v36 = vpop.f32.mrf.mxu0 }
  0xda   : > { %v564_v19 = vpop.f32.mrf.mxu2  ;;  %v454_v27 = vadd.f32 %v453_v26, %v366_v51  ;;  %v704_v29 = vpop.f32.mrf.mxu3 }
  0xdb   : > { %v588_v35 = vadd.f32 %v564_v19, %v451_v12 }
  0xdc   : > { %1004 = vmatmul.bf16.gmra.mxu1 %v922_v22  ;;  %1407 = vmatmul.bf16.gmra.mxu0 %v1325_v23 }
  0xdd   : > { %v718_v14 = vadd.f32 %v694_v60, %v588_v35 }
  0xdf   : > { %1133 = vmatmul.bf16.gmra.mxu2 %v1051_v10  ;;  %v2341_v28 = vadd.f32 %v861_v5, %v718_v14 }
  0xe1   : > { %v455_v33 = vpop.f32.mrf.mxu1  ;;  %v866_v37 = vpop.f32.mrf.mxu0 }
  0xe2   : > { %v567_v30 = vpop.f32.mrf.mxu2  ;;  %v456_v38 = vadd.f32 %v455_v33, %v368_v44  ;;  %v707_v16 = vpop.f32.mrf.mxu3 }
  0xe3   : > { %v589_v21 = vadd.f32 %v567_v30, %v454_v27 }
  0xe5   : > { %v719_v32 = vadd.f32 %v697_v55, %v589_v21 }
  0xe7   : > { %v2343_v62 = vadd.f32 %v864_v36, %v719_v32 }
  0xe9   : > { %v458_v43 = vpop.f32.mrf.mxu1  ;;  %v869_v45 = vpop.f32.mrf.mxu0 }
  0xea   : > { %v569_v39 = vpop.f32.mrf.mxu2  ;;  %v459_v46 = vadd.f32 %v458_v43, %v2307_v31  ;;  %v709_v50 = vpop.f32.mrf.mxu3 }
  0xeb   : > { %v590_v41 = vadd.f32 %v569_v39, %v456_v38 }
  0xed   : > { %v720_v42 = vadd.f32 %v699_v7, %v590_v41 }
  0xef   : > { %v2346_v47 = vadd.f32 %v866_v37, %v720_v42 }
  0xf1   : > { %v460_v53 = vpop.f32.mrf.mxu1  ;;  %v871_v54 = vpop.f32.mrf.mxu0 }
  0xf2   : > { %v572_v48 = vpop.f32.mrf.mxu2  ;;  %v461_v58 = vadd.f32 %v460_v53, %v2312_v40  ;;  %v712_v55 = vpop.f32.mrf.mxu3 }
  0xf3   : > { %v591_v49 = vadd.f32 %v572_v48, %v459_v46 }
  0xf5   : > { %v721_v51 = vadd.f32 %v702_v18, %v591_v49 }
  0xf7   : > { %v2349_v60 = vadd.f32 %v869_v45, %v721_v51 }
  0xf9   : > { %v463_v24 = vpop.f32.mrf.mxu1  ;;  %v874_v63 = vpop.f32.mrf.mxu0 }
  0xfa   : > { %v574_v17 = vpop.f32.mrf.mxu2  ;;  %v464_v31 = vadd.f32 %v463_v24, %v2318_v52  ;;  %v714_v40 = vpop.f32.mrf.mxu3 }
  0xfb   : > { %v592_v44 = vadd.f32 %v574_v17, %v461_v58 }
  0xfd   : > { %v722_v61 = vadd.f32 %v704_v29, %v592_v44 }
  0xff   : > { %v2352_v0 = vadd.f32 %v871_v54, %v722_v61 }
 0x101   : > { %v465_v4 = vpop.f32.mrf.mxu1  ;;  %v876_v6 = vpop.f32.mrf.mxu0 }
 0x102   : > { %v577_v1 = vpop.f32.mrf.mxu2  ;;  %v466_v7 = vadd.f32 %v465_v4, %v2325_v9  ;;  %v1262_v18 = vpop.f32.mrf.mxu3 }
 0x103   : > { %v593_v2 = vadd.f32 %v577_v1, %v464_v31 }
 0x105   : > { %v723_v3 = vadd.f32 %v707_v16, %v593_v2 }
 0x107   : > { %v2355_v56 = vadd.f32 %v874_v63, %v723_v3 }
 0x109   : > { %v468_v5 = vpop.f32.mrf.mxu1  ;;  %v879_v12 = vpop.f32.mrf.mxu0 }
 0x10a   : > { %v579_v25 = vpop.f32.mrf.mxu2  ;;  %v469_v13 = vadd.f32 %v468_v5, %v2322_v59  ;;  %v1264_v22 = vpop.f32.mrf.mxu3 }
 0x10b   : > { %v594_v8 = vadd.f32 %v579_v25, %v466_v7 }
 0x10d   : > { %v724_v11 = vadd.f32 %v709_v50, %v594_v8 }
 0x10f   : > { %v2358_v52 = vadd.f32 %v876_v6, %v724_v11 }
 0x111   : > { %v470_v35 = vpop.f32.mrf.mxu1  ;;  %v881_v10 = vpop.f32.mrf.mxu0 }
 0x112   : > { %v582_v19 = vpop.f32.mrf.mxu2  ;;  %v471_v9 = vadd.f32 %v470_v35, %v2328_v15  ;;  %v2369_v15 = vld [vmem:[%s2433_s2] ss:$0 sm:$0xff]  ;;  %v1267_v37 = vpop.f32.mrf.mxu3 }
 0x113   : > { %v595_v34 = vadd.f32 %v582_v19, %v469_v13 }
 0x115   : > { %v725_v20 = vadd.f32 %v712_v55, %v595_v34 }
 0x117   : > { %v2361_v14 = vadd.f32 %v879_v12, %v725_v20 }
 0x119   : > { %v985_v27 = vpop.f32.mrf.mxu1  ;;  %v1388_v29 = vpop.f32.mrf.mxu0 }
 0x11a   : > { %v584_v26 = vpop.f32.mrf.mxu2  ;;  %v1010_v59 = vadd.f32 %v985_v27, %v2335_v57  ;;  %v1269_v53 = vpop.f32.mrf.mxu3 }
 0x11b   : > { %v596_v36 = vadd.f32 %v584_v26, %v471_v9 }
 0x11d   : > { %v726_v23 = vadd.f32 %v714_v40, %v596_v36 }
 0x11f   : > { %v2364_v30 = vadd.f32 %v881_v10, %v726_v23 }
 0x121   : > { %v987_v38 = vpop.f32.mrf.mxu1  ;;  %v1390_v16 = vpop.f32.mrf.mxu0 }
 0x122   : > { %v1114_v21 = vpop.f32.mrf.mxu2  ;;  %v1011_v41 = vadd.f32 %v987_v38, %v2341_v28  ;;  %v1272_v3 = vpop.f32.mrf.mxu3 }
 0x123   : > { %v1139_v32 = vadd.f32 %v1114_v21, %v1010_v59 }
 0x125   : > { %v1287_v33 = vadd.f32 %v1262_v18, %v1139_v32 }
 0x127   : > { %v1413_v39 = vadd.f32 %v1388_v29, %v1287_v33 }
 0x129   : > { %v1427_v42 = vadd.f32 %v2369_v15, %v1413_v39  ;;  %v990_v49 = vpop.f32.mrf.mxu1  ;;  %v1393_v50 = vpop.f32.mrf.mxu0 }
 0x12a   : > { %v1116_v57 = vpop.f32.mrf.mxu2  ;;  %v1012_v28 = vadd.f32 %v990_v49, %v2343_v62  ;;  %v1274_v10 = vpop.f32.mrf.mxu3 }
 0x12b   : > { %v1437_v43 = vmax.f32 %v1427_v42, 0.0  ;;  %v1140_v45 = vadd.f32 %v1116_v57, %v1011_v41 }
 0x12d   : > { %v1447_v46 = vpack.c.bf16 %v1437_v43, %v1437_v43  ;;  %v1288_v48 = vadd.f32 %v1264_v22, %v1140_v45 }
 0x12f   : > { %1448 = vst [vmem:[%s2377_s30] sm:$0xf] %v1447_v46  ;;  %v1414_v51 = vadd.f32 %v1390_v16, %v1288_v48 }
 0x131   : > { %v1428_v58 = vadd.f32 %v2369_v15, %v1414_v51  ;;  %v992_v61 = vpop.f32.mrf.mxu1  ;;  %v1395_v55 = vpop.f32.mrf.mxu0 }
 0x132   : > { %v1119_v54 = vpop.f32.mrf.mxu2  ;;  %v1013_v31 = vadd.f32 %v992_v61, %v2346_v47  ;;  %v1277_v42 = vpop.f32.mrf.mxu3 }
 0x133   : > { %v1141_v17 = vadd.f32 %v1119_v54, %v1012_v28  ;;  %v1438_v24 = vmax.f32 %v1428_v58, 0.0 }
 0x135   : > { %v1289_v44 = vadd.f32 %v1267_v37, %v1141_v17  ;;  %v1449_v4 = vpack.c.bf16 %v1438_v24, %v1438_v24 }
 0x137   : > { %v1415_v63 = vadd.f32 %v1393_v50, %v1289_v44  ;;  %v1884_v5 = vrot.slane %v1449_v4, 9 }
 0x139   : > { %v1429_v1 = vadd.f32 %v2369_v15, %v1415_v63  ;;  %v995_v8 = vpop.f32.mrf.mxu1  ;;  %v1398_v11 = vpop.f32.mrf.mxu0 }
 0x13a   : > { %v1121_v2 = vpop.f32.mrf.mxu2  ;;  %v1014_v13 = vadd.f32 %v995_v8, %v2349_v60 }
 0x13b   : > { %v1439_v62 = vmax.f32 %v1429_v1, 0.0  ;;  %v1142_v6 = vadd.f32 %v1121_v2, %v1013_v31 }
 0x13d   : > { %v1450_v7 = vpack.c.bf16 %v1439_v62, %v1439_v62  ;;  %v1290_v40 = vadd.f32 %v1269_v53, %v1142_v6 }
 0x13f   : > { %v1458_v47 = vrot.slane %v1450_v7, 5  ;;  %v1416_v12 = vadd.f32 %v1395_v55, %v1290_v40  ;;  %v1886_v23 = vrot.slane %v1450_v7, 10  ;;  %v1279_v55 = vpop.f32.mrf.mxu3 }
 0x141   : > { %v1459_v18 = vsel %vm2384_vm8, %v1884_v5, %v1458_v47  ;;  %v1430_v19 = vadd.f32 %v2369_v15, %v1416_v12  ;;  %v997_v60 = vpop.f32.mrf.mxu1  ;;  %v1400_v22 = vpop.f32.mrf.mxu0 }
 0x142   : > { %1885 = vst [vmem:[%s2377_s30 + $0x4] sm:$0xf] %v1459_v18  ;;  %v1124_v34 = vpop.f32.mrf.mxu2  ;;  %v1015_v59 = vadd.f32 %v997_v60, %v2352_v0 }
 0x143   : > { %v1440_v20 = vmax.f32 %v1430_v19, 0.0  ;;  %v1143_v35 = vadd.f32 %v1124_v34, %v1014_v13 }
 0x145   : > { %v1463_v9 = vpack.c.bf16 %v1440_v20, %v1440_v20  ;;  %v1291_v26 = vadd.f32 %v1272_v3, %v1143_v35 }
 0x147   : > { %v1470_v27 = vrot.slane %v1463_v9, 6  ;;  %v1417_v29 = vadd.f32 %v1398_v11, %v1291_v26  ;;  %v1888_v57 = vrot.slane %v1463_v9, 11  ;;  %v1282_v7 = vpop.f32.mrf.mxu3 }
 0x149   : > { %v1471_v21 = vsel %vm2393_vm11, %v1886_v23, %v1470_v27  ;;  %v1431_v32 = vadd.f32 %v2369_v15, %v1417_v29  ;;  %v1000_v0 = vpop.f32.mrf.mxu1  ;;  %v1403_v48 = vpop.f32.mrf.mxu0 }
 0x14a   : > { %1887 = vst [vmem:[%s2377_s30 + $0x8] sm:$0xf] %v1471_v21  ;;  %v1126_v33 = vpop.f32.mrf.mxu2  ;;  %v1016_v46 = vadd.f32 %v1000_v0, %v2355_v56 }
 0x14b   : > { %v1441_v37 = vmax.f32 %v1431_v32, 0.0  ;;  %v1144_v38 = vadd.f32 %v1126_v33, %v1015_v59 }
 0x14d   : > { %v1475_v16 = vpack.c.bf16 %v1441_v37, %v1441_v37  ;;  %v1292_v39 = vadd.f32 %v1274_v10, %v1144_v38 }
 0x14f   : > { %v1482_v43 = vrot.slane %v1475_v16, 7  ;;  %v1418_v45 = vadd.f32 %v1400_v22, %v1292_v39  ;;  %v1284_v60 = vpop.f32.mrf.mxu3 }
 0x151   : > { %v1483_v49 = vsel %vm2402_vm14, %v1888_v57, %v1482_v43  ;;  %v1432_v50 = vadd.f32 %v2369_v15, %v1418_v45  ;;  %v1002_v17 = vpop.f32.mrf.mxu1  ;;  %v1405_v24 = vpop.f32.mrf.mxu0 }
 0x152   : > { %1889 = vst [vmem:[%s2377_s30 + $0xc] sm:$0xf] %v1483_v49  ;;  %v1129_v51 = vpop.f32.mrf.mxu2  ;;  %v1017_v61 = vadd.f32 %v1002_v17, %v2358_v52 }
 0x153   : > { %v1442_v28 = vmax.f32 %v1432_v50, 0.0  ;;  %v1145_v53 = vadd.f32 %v1129_v51, %v1016_v46 }
 0x155   : > { %v1487_v54 = vpack.c.bf16 %v1442_v28, %v1442_v28  ;;  %v1293_v58 = vadd.f32 %v1277_v42, %v1145_v53 }
 0x157   : > { %1890 = vst [vmem:[%s2377_s30 + $0x10] sm:$0xf] %v1487_v54  ;;  %v1419_v44 = vadd.f32 %v1403_v48, %v1293_v58 }
 0x159   : > { %v1433_v63 = vadd.f32 %v2369_v15, %v1419_v44  ;;  %v1005_v2 = vpop.f32.mrf.mxu1  ;;  %v1408_v5 = vpop.f32.mrf.mxu0 }
 0x15a   : > { %v1131_v56 = vpop.f32.mrf.mxu2  ;;  %v1018_v62 = vadd.f32 %v1005_v2, %v2361_v14 }
 0x15b   : > { %v1146_v31 = vadd.f32 %v1131_v56, %v1017_v61  ;;  %v1443_v3 = vmax.f32 %v1433_v63, 0.0 }
 0x15d   : > { %v1294_v1 = vadd.f32 %v1279_v55, %v1146_v31  ;;  %v1490_v8 = vpack.c.bf16 %v1443_v3, %v1443_v3 }
 0x15f   : > { %v1420_v4 = vadd.f32 %v1405_v24, %v1294_v1  ;;  %v1891_v18 = vrot.slane %v1490_v8, 9 }
 0x161   : > { %v1434_v6 = vadd.f32 %v2369_v15, %v1420_v4  ;;  %v1007_v13 = vpop.f32.mrf.mxu1  ;;  %v1410_v27 = vpop.f32.mrf.mxu0 }
 0x162   : > { %v1134_v40 = vpop.f32.mrf.mxu2  ;;  %v1019_v20 = vadd.f32 %v1007_v13, %v2364_v30 }
 0x163   : > { %v1444_v11 = vmax.f32 %v1434_v6, 0.0  ;;  %v1147_v52 = vadd.f32 %v1134_v40, %v1018_v62 }
 0x165   : > { %v1491_v47 = vpack.c.bf16 %v1444_v11, %v1444_v11  ;;  %v1295_v12 = vadd.f32 %v1282_v7, %v1147_v52 }
 0x167   : > { %v1496_v19 = vrot.slane %v1491_v47, 5  ;;  %v1421_v34 = vadd.f32 %v1408_v5, %v1295_v12  ;;  %v1893_v29 = vrot.slane %v1491_v47, 10 }
 0x169   : > { %v1497_v14 = vsel %vm2384_vm8, %v1891_v18, %v1496_v19  ;;  %v1435_v35 = vadd.f32 %v2369_v15, %v1421_v34 }
 0x16a   : > { %1892 = vst [vmem:[%s2377_s30 + $0x14] sm:$0xf] %v1497_v14  ;;  %v1136_v10 = vpop.f32.mrf.mxu2 }
 0x16b   : > { %v1445_v9 = vmax.f32 %v1435_v35, 0.0  ;;  %v1148_v26 = vadd.f32 %v1136_v10, %v1019_v20 }
 0x16d   : > { %v1501_v22 = vpack.c.bf16 %v1445_v9, %v1445_v9  ;;  %v1296_v23 = vadd.f32 %v1284_v60, %v1148_v26 }
 0x16f   : > { %v1505_v59 = vrot.slane %v1501_v22, 6  ;;  %v1422_v21 = vadd.f32 %v1410_v27, %v1296_v23  ;;  %v1895_v37 = vrot.slane %v1501_v22, 11 }
 0x171   : > { %v1506_v30 = vsel %vm2393_vm11, %v1893_v29, %v1505_v59  ;;  %v1436_v25 = vadd.f32 %v2369_v15, %v1422_v21 }
 0x172   : > { %1894 = vst [vmem:[%s2377_s30 + $0x18] sm:$0xf] %v1506_v30 }
 0x173   : > { %v1446_v32 = vmax.f32 %v1436_v25, 0.0 }
 0x175   : > { %v1510_v33 = vpack.c.bf16 %v1446_v32, %v1446_v32 }
 0x177   : > { %v1514_v38 = vrot.slane %v1510_v33, 7 }
 0x179   : > { %v1515_v16 = vsel %vm2402_vm14, %v1895_v37, %v1514_v38 }
 0x17a   : > { %1896 = vst [vmem:[%s2377_s30 + $0x1c] sm:$0xf] %v1515_v16 }
 0x17b PF: > { %s14_s12 = sadd.s32 1, %s2115_s12  }
 0x17c   : > { %p11_p7 = scmp.ge.s32.totalorder %s14_s12, 4  }
 0x17e   :  { %13 = sbr.rel (!%p11_p7) target bundleno = 1 (0x1), region = 82 }
 0x183   :  { %1540 = vsyncpa [#allocation3], 1 }
 0x184   :  { %1542 = vsyncpa [#allocation3 + $0x1], 1 }

// kernel: _ocr_forward_arrays.3
= control target key start
LH: loop header
LB: loop body
LE: loop exit
PB: predicated region body
PF: predicated region fallthrough
CT: control target
= control target key end

     0   :  { %8 = vsyncpa [#allocation3], 0  ;;  %s4349_s0 = inlined_call_operand.vmem [shape: bf16[2,324,3], index: 0, kind: input, shape index: {}]   ;;  %s4350_s1 = inlined_call_operand.hbm [shape: bf16[9,3,128], index: 1, kind: input, shape index: {}]   ;;  %s4351_s2 = inlined_call_operand.hbm [shape: f32[1,128], index: 2, kind: input, shape index: {}]   ;;  %s4352_s3 = inlined_call_operand.vmem [shape: bf16[2,16,16,128], index: 3, kind: output, shape index: {}]  }
   0x1   :  { %9 = vsyncpa [#allocation5], 0  ;;  %s3221_s12 = smov 0  }
   0x2 LB: > { %s125_s15 = sshll.u32 %s4350_s1, 4  ;;  %s3230_s16 = sadd.s32 4294967295, %s3194_s12   ;;  %s3194_s12 = sphi %s3221_s12, %s15_s12   ;;  %s126_s15 = int_to_ptr.hbm [resolvable:$true] %s125_s15 }
   0x3   : > { %p2726_p0 = scmp.ge.s32.totalorder %s3194_s12, 1  ;;  %p114_p1 = scmp.lt.s32.totalorder %s3194_s12, 3 }
   0x4   : > { %p3085_p2 = scmp.eq.s32.totalorder %s3230_s16, 0  ;;  %s3196_s18 = smov [#allocation2]  }
   0x5   : > { %p3235_p3 = pnand %p2726_p0, %p114_p1  ;;  %s127_s19 = sshll.u32 %s3196_s18, 4  ;;  %s128_s19 = int_to_ptr.vmem [resolvable:$true] %s127_s19 }
   0x6   : > { %s140_s22 = sshll.u32 %s4351_s2, 4  ;;  %s3197_s23 = smov [#allocation4]   ;;  %s141_s22 = int_to_ptr.hbm [resolvable:$true] %s140_s22 }
   0x7   : > { %p3078_p4 = pneg %p3235_p3  ;;  %s142_s24 = sshll.u32 %s3197_s23, 4  ;;  %s143_s24 = int_to_ptr.vmem [resolvable:$true] %s142_s24 }
   0x8   : > { %s3198_s25 = smov 32   ;;  %s3199_s26 = smov 2  }
   0x9   : > { %p3079_p5 = pnand %p3085_p2, %p3078_p4  ;;  %163 = sbr.rel (%p3235_p3) target bundleno = 828 (0x33c), region = 32 }
   0xb   : > { %3081 = dma.hbm_to_vmem [thread:$0]  (!%p3079_p5), %s126_s15, 288, %s128_s19, [#allocation3], %s3198_s25, %s3198_s25, %s3199_s26  }
   0xc   : > { %3084 = dma.hbm_to_vmem [thread:$0]  (!%p3079_p5), %s141_s22, 16, %s143_s24, [#allocation5]  }
   0xe   : > { %3185 = dma.done.wait (%p3085_p2), [#allocation3], 288  }
   0xf   : > { %3187 = vsyncadd (%p3085_p2), [#allocation3], 4294967008 }
  0x10   : > { %3189 = dma.done.wait (%p3085_p2), [#allocation5], 16  }
  0x11   : > { %3191 = vsyncadd (%p3085_p2), [#allocation5], 4294967280  ;;  %vm537_vm0 = vcmask 1040384   ;;  %p193_p6 = scmp.lt.s32.totalorder %s3230_s16, 1  ;;  %vm538_vm1 = vcmask 1041408   ;;  %v3200_v0 = vmov 65535  }
  0x12   : > { %v539_v1 = vsel %vm537_vm0, 4294967295, %v3200_v0  ;;  %v247_v3 = vld [vmem:[#allocation2 + $0x2] sm:$0x3]  ;;  %vm338_vm2 = vsmask.f32 7424  ;;  %vm482_vm3 = vcmask 23552  }
  0x13   : > { %s4494_s16 = smov (!%p193_p6, %s3230_s16), 1  ;;  %v3263_v2 = vsel %vm538_vm1, %v539_v1, 0  ;;  %v782_v9 = vld [vmem:[#allocation2 + $0x4] sm:$0x3]  ;;  %v245_v19 = vld [vmem:[#allocation2] sm:$0x3] }
  0x14   : > { %s3069_s27 = smul.u32 164, %s4494_s16  ;;  %v542_v6 = vand.u32 %v3263_v2, %v247_v3  ;;  %v874_v13 = vand.u32 %v782_v9, %v3263_v2  ;;  %v1165_v24 = vld [vmem:[#allocation2 + $0x8] sm:$0x3]  ;;  %v680_v28 = vand.u32 %v3263_v2, %v245_v19  ;;  %v1012_v47 = vld [vmem:[#allocation2 + $0x6] sm:$0x3]  ;;  %vm783_vm4 = vcmask 1046528  }
  0x15   : > { %v1306_v31 = vand.u32 %v1165_v24, %v3263_v2  ;;  %v1027_v54 = vand.u32 %v1012_v47, %v3263_v2  ;;  %vm1169_vm5 = vsmask.f32 6400  ;;  %vm1833_vm6 = vsmask.f32 5376  ;;  %s3018_s4 = sshll.u32 %s4494_s16, 7 }
  0x16   : > { %s3268_s30 = scalar_lea.vmem %s4349_s0, %s3069_s27  ;;  %3066 = vmatpush.bf16.msra.mxu1 %v542_v6  ;;  %3067 = vmatpush.bf16.msra.mxu2 %v542_v6  ;;  %vm1445_vm7 = vcmask 1045504   ;;  %vm2113_vm8 = vcmask 1044480   ;;  %s4053_s7 = scalar_lea.vmem %s4352_s3, %s3018_s4  ;;  %vm2429_vm9 = vcmask 1042432   ;;  %vm2430_vm10 = vcmask 1046532  }
  0x17   : > { %v3271_v4 = vld [vmem:[%s3268_s30 + $0x28] sm:$0xff]  ;;  %v3274_v5 = vld [vmem:[%s3268_s30 + $0x30] sm:$0xff]  ;;  %v3281_v8 = vld [vmem:[%s3268_s30 + $0x58] sm:$0xff]  ;;  %551 = vmatpush.bf16.msra.mxu0 %v542_v6  ;;  %3068 = vmatpush.bf16.msra.mxu3 %v542_v6  ;;  %vm2449_vm12 = vcmask 1045508   ;;  %vm2468_vm14 = vcmask 1044484  }
  0x18   : > { %v3278_v7 = vld [vmem:[%s3268_s30 + $0x50] sm:$0xff]  ;;  %v3284_v10 = vshll.u32 %v3271_v4, 16  ;;  %v3287_v11 = vshrl.u32 %v3271_v4, 16  ;;  %v3290_v12 = vshll.u32 %v3274_v5, 16  ;;  %v3294_v14 = vld [vmem:[%s3268_s30] sm:$0xff]  ;;  %v3297_v15 = vld [vmem:[%s3268_s30 + $0x8] sm:$0xff] }
  0x19   : > { %v3300_v16 = vshll.u32 %v3278_v7, 16  ;;  %v3303_v17 = vshrl.u32 %v3278_v7, 16  ;;  %v3306_v18 = vshll.u32 %v3281_v8, 16  ;;  %v340_v22 = vshrl.u32 %v3294_v14, 16  ;;  %v3321_v32 = vld [vmem:[%s3268_s30 + $0x78] sm:$0xff]  ;;  %v3329_v35 = vld [vmem:[%s3268_s30 + $0x80] sm:$0xff]  ;;  %vm4075_vm11 = vmor %vm2429_vm9, %vm2430_vm10 }
  0x1a   : > { %4384 = vst [vmem:[#allocation8_spill] sm:$0xff] %v3284_v10  ;;  %v381_v20 = vrot.slane %v3284_v10, 1  ;;  %v389_v21 = vrot.slane %v3290_v12, 1  ;;  %883 = vmatpush.bf16.msrb.mxu2 %v874_v13  ;;  %v342_v23 = vshll.u32 %v3294_v14, 16  ;;  %v4353_v27 = vshll.u32 %v3297_v15, 16  ;;  %689 = vmatpush.bf16.msrb.mxu1 %v680_v28  ;;  %v3337_v40 = vld [vmem:[%s3268_s30 + $0x38] sm:$0xff]  ;;  %vm4110_vm13 = vmor %vm538_vm1, %vm2449_vm12 }
  0x1b   : > { %4385 = vst [vmem:[#allocation9_spill] sm:$0xff] %v3287_v11  ;;  %v421_v25 = vrot.slane %v3300_v16, 1  ;;  %v429_v26 = vrot.slane %v3306_v18, 1  ;;  %1315 = vmatpush.bf16.msrb.mxu0 %v1306_v31  ;;  %v3340_v41 = vshll.u32 %v3321_v32, 16  ;;  %v3344_v42 = vld [vmem:[%s3268_s30 + $0x60] sm:$0xff]  ;;  %v3347_v43 = vshrl.u32 %v3321_v32, 16  ;;  %1036 = vmatpush.bf16.msrb.mxu3 %v1027_v54  ;;  %vm4145_vm15 = vmor %vm537_vm0, %vm2468_vm14 }
  0x1c   : > { %4386 = vst [vmem:[#allocation10_spill] sm:$0xff] %v3290_v12  ;;  %v385_v29 = vor.u32 %v3287_v11, %v381_v20  ;;  %v344_v30 = vrot.slane %v342_v23, 1  ;;  %v349_v34 = vrot.slane %v4353_v27, 1  ;;  %v3350_v44 = vshll.u32 %v3329_v35, 16  ;;  %v3353_v45 = vld [vmem:[%s3268_s30 + $0x10] sm:$0xff]  ;;  %v3382_v60 = vld [vmem:[%s3268_s30 + $0x88] sm:$0xff] }
  0x1d   : > { %4387 = vst [vmem:[#allocation11_spill] sm:$0xff] %v3300_v16  ;;  %v425_v33 = vor.u32 %v3303_v17, %v421_v25  ;;  %v4355_v46 = vrot.slane %v3340_v41, 1  ;;  %v3358_v49 = vshrl.u32 %v3274_v5, 16  ;;  %v3361_v50 = vshll.u32 %v3337_v40, 16  ;;  %v3387_v63 = vld [vmem:[%s3268_s30 + $0x48] sm:$0xff] }
  0x1e   : > { %4388 = vst [vmem:[#allocation12_spill] sm:$0xff] %v3303_v17  ;;  %v390_v36 = vsel %vm338_vm2, %v385_v29, %v389_v21  ;;  %v345_v37 = vor.u32 %v344_v30, %v340_v22  ;;  %v469_v48 = vrot.slane %v3350_v44, 1  ;;  %v3367_v52 = vshrl.u32 %v3281_v8, 16  ;;  %v3407_v22 = vld [vmem:[%s3268_s30 + $0x40] sm:$0xff]  ;;  %v3420_v30 = vld [vmem:[%s3268_s30 + $0x18] sm:$0xff] }
  0x1f   : > { %2813 = vmatmul.msk.bf16.vlgmr.msra.gmra.mxu1 %vm482_vm3, %v390_v36  ;;  %v430_v38 = vsel %vm338_vm2, %v425_v33, %v429_v26  ;;  %4389 = vst [vmem:[#allocation13_spill] sm:$0xff] %v3353_v45  ;;  %v465_v51 = vor.u32 %v3347_v43, %v4355_v46  ;;  %v3370_v53 = vshll.u32 %v3344_v42, 16  ;;  %v4354_v55 = vshrl.u32 %v3297_v15, 16 }
  0x20   : > { %2818 = vmatmul.msk.bf16.vlgmr.msra.gmra.mxu2 %vm482_vm3, %v430_v38  ;;  %v350_v39 = vsel %vm338_vm2, %v345_v37, %v349_v34  ;;  %4390 = vst [vmem:[#allocation14_spill] sm:$0xff] %v3358_v49  ;;  %v3375_v56 = vshll.u32 %v3353_v45, 16  ;;  %v393_v58 = vor.u32 %v3358_v49, %v389_v21  ;;  %v397_v59 = vrot.slane %v3361_v50, 1 }
  0x21   : > { %2808 = vmatmul.msk.bf16.vlgmr.msra.gmra.mxu0 %vm482_vm3, %v350_v39  ;;  %4391 = vst [vmem:[#allocation15_spill] sm:$0xff] %v3361_v50  ;;  %v470_v57 = vsel %vm338_vm2, %v465_v51, %v469_v48  ;;  %v433_v61 = vor.u32 %v3367_v52, %v429_v26  ;;  %v437_v62 = vrot.slane %v3370_v53, 1  ;;  %v353_v0 = vor.u32 %v4354_v55, %v349_v34  ;;  %v3413_v26 = vld [vmem:[%s3268_s30 + $0x68] sm:$0xff]  ;;  %v3437_v39 = vld [vmem:[%s3268_s30 + $0x20] sm:$0xff] }
  0x22   : > { %2823 = vmatmul.msk.bf16.vlgmr.msra.gmra.mxu3 %vm482_vm3, %v470_v57  ;;  %v357_v1 = vrot.slane %v3375_v56, 1  ;;  %v398_v3 = vsel %vm338_vm2, %v393_v58, %v397_v59  ;;  %v3394_v6 = vshrl.u32 %v3329_v35, 16  ;;  %v3397_v9 = vshll.u32 %v3382_v60, 16  ;;  %4395 = vst [vmem:[#allocation19_spill] sm:$0xff] %v3420_v30 }
  0x23   : > { %v438_v13 = vsel %vm338_vm2, %v433_v61, %v437_v62  ;;  %v3401_v19 = vshll.u32 %v3387_v63, 16  ;;  %v3417_v29 = vshrl.u32 %v3387_v63, 16  ;;  %v3424_v33 = vshrl.u32 %v3337_v40, 16  ;;  %4398 = vst [vmem:[#allocation22_spill] sm:$0xff] %v3437_v39 }
  0x24   : > { %4392 = vst [vmem:[#allocation16_spill] sm:$0xff] %v3397_v9  ;;  %v358_v21 = vsel %vm338_vm2, %v353_v0, %v357_v1  ;;  %v473_v23 = vor.u32 %v3394_v6, %v469_v48  ;;  %v477_v24 = vrot.slane %v3397_v9, 1  ;;  %v3427_v34 = vshll.u32 %v3407_v22, 16 }
  0x25   : > { %4393 = vst [vmem:[#allocation17_spill] sm:$0xff] %v3401_v19  ;;  %v413_v28 = vrot.slane %v3401_v19, 1  ;;  %v3431_v37 = vshrl.u32 %v3344_v42, 16  ;;  %v3434_v38 = vshll.u32 %v3413_v26, 16  ;;  %v3443_v48 = vshrl.u32 %v3353_v45, 16 }
  0x26   : > { %4394 = vst [vmem:[#allocation18_spill] sm:$0xff] %v3417_v29  ;;  %v478_v36 = vsel %vm338_vm2, %v473_v23, %v477_v24  ;;  %v3446_v51 = vshll.u32 %v3420_v30, 16  ;;  %v401_v54 = vor.u32 %v3424_v33, %v397_v59  ;;  %v405_v57 = vrot.slane %v3427_v34, 1 }
  0x27   : > { %v417_v31 = vor.u32 %v3417_v29, %v413_v28  ;;  %4396 = vst [vmem:[#allocation20_spill] sm:$0xff] %v3424_v33  ;;  %v441_v58 = vor.u32 %v3431_v37, %v437_v62  ;;  %v445_v61 = vrot.slane %v3434_v38, 1  ;;  %v3454_v0 = vshll.u32 %v3437_v39, 16 }
  0x28   : > { %4397 = vst [vmem:[#allocation21_spill] sm:$0xff] %v3427_v34  ;;  %v3462_v23 = vshrl.u32 %v3437_v39, 16 }
  0x29   : > { %v422_v47 = vsel %vm338_vm2, %v417_v31, %v421_v25  ;;  %4399 = vst [vmem:[#allocation23_spill] sm:$0xff] %v3446_v51  ;;  %v361_v25 = vor.u32 %v3443_v48, %v357_v1  ;;  %v373_v59 = vrot.slane %v3454_v0, 1  ;;  %v3467_v31 = vshrl.u32 %v3382_v60, 16 }
  0x2a   : > { %4400 = vst [vmem:[#allocation24_spill] sm:$0xff] %v3454_v0 }
  0x2b   : > { %4401 = vst [vmem:[#allocation25_spill] sm:$0xff] %v3462_v23  ;;  %v377_v1 = vor.u32 %v3462_v23, %v373_v59 }
  0x2c   : > { %4402 = vst [vmem:[#allocation26_spill] sm:$0xff] %v3467_v31 }
  0x2f   : > { %2814 = vmatmul.msk.bf16.gmra.mxu1 %vm482_vm3, %v398_v3  ;;  %v365_v3 = vrot.slane %v3446_v51, 1 }
  0x30   : > { %2819 = vmatmul.msk.bf16.gmra.mxu2 %vm482_vm3, %v438_v13  ;;  %v406_v13 = vsel %vm338_vm2, %v401_v54, %v405_v57  ;;  %v382_v54 = vsel %vm338_vm2, %v377_v1, %v381_v20 }
  0x31   : > { %2809 = vmatmul.msk.bf16.gmra.mxu0 %vm482_vm3, %v358_v21  ;;  %v446_v21 = vsel %vm338_vm2, %v441_v58, %v445_v61  ;;  %v366_v62 = vsel %vm338_vm2, %v361_v25, %v365_v3  ;;  %v481_v58 = vor.u32 %v3467_v31, %v477_v24  ;;  %v3480_v25 = vshrl.u32 %v3407_v22, 16  ;;  %v1676_v31 = vld [vmem:[#allocation2 + $0xc] sm:$0x3] }
  0x32   : > { %2824 = vmatmul.msk.bf16.gmra.mxu3 %vm482_vm3, %v478_v36  ;;  %v3473_v36 = vld [vmem:[%s3268_s30 + $0x70] sm:$0xff] }
  0x33   : > { %4403 = vst [vmem:[#allocation27_spill] sm:$0xff] %v3480_v25  ;;  %v3486_v27 = vshll.u32 %v3473_v36, 16 }
  0x35   : > { %v453_v24 = vrot.slane %v3486_v27, 1 }
  0x3f   : > { %2815 = vmatmul.msk.bf16.gmra.mxu1 %vm482_vm3, %v406_v13  ;;  %v3483_v13 = vshrl.u32 %v3413_v26, 16 }
  0x40   : > { %2820 = vmatmul.msk.bf16.gmra.mxu2 %vm482_vm3, %v446_v21  ;;  %v3489_v21 = vshrl.u32 %v3420_v30, 16 }
  0x41   : > { %2810 = vmatmul.msk.bf16.gmra.mxu0 %vm482_vm3, %v366_v62  ;;  %v409_v62 = vor.u32 %v3480_v25, %v405_v57  ;;  %v449_v20 = vor.u32 %v3483_v13, %v445_v61  ;;  %v787_v57 = vrot.slane %v3353_v45, 1  ;;  %v1694_v61 = vand.u32 %v1676_v31, %v3263_v2 }
  0x42   : > { %2825 = vmatmul.msk.bf16.gmra.mxu3 %vm482_vm3, %v481_v58  ;;  %v369_v1 = vor.u32 %v3489_v21, %v365_v3  ;;  %v785_v58 = vrot.slane %v3297_v15, 1  ;;  %v1832_v3 = vld [vmem:[#allocation2 + $0xe] sm:$0x3]  ;;  %v4404_v31 = vrot.slane %v3340_v41, 1 }
  0x43   : > { %v414_v55 = vsel %vm338_vm2, %v409_v62, %v413_v28  ;;  %v454_v46 = vsel %vm338_vm2, %v449_v20, %v453_v24  ;;  %v1444_v28 = vld [vmem:[#allocation2 + $0xa] sm:$0x3]  ;;  %v1974_v62 = vand.u32 %v1832_v3, %v3263_v2  ;;  %v2112_v20 = vld [vmem:[#allocation2 + $0x10] sm:$0x3]  ;;  %1703 = vmatpush.bf16.msra.mxu2 %v1694_v61 }
  0x44   : > { %v374_v9 = vsel %vm338_vm2, %v369_v1, %v373_v59  ;;  %v1538_v59 = vand.u32 %v1444_v28, %v3263_v2  ;;  %v3510_v1 = vshrl.u32 %v3473_v36, 16  ;;  %v4405_v28 = vshrl.u32 %v3297_v15, 16 }
  0x45   : > { %1983 = vmatpush.bf16.msra.mxu3 %v1974_v62 }
  0x46   : > { %1547 = vmatpush.bf16.msra.mxu1 %v1538_v59  ;;  %v1170_v62 = vrot.slane %v4405_v28, 1  ;;  %v4406_v59 = vshll.u32 %v3297_v15, 16 }
  0x4f   : > { %2816 = vmatmul.msk.bf16.gmra.mxu1 %vm482_vm3, %v414_v55  ;;  %v788_v55 = vsel %vm783_vm4, %v785_v58, %v787_v57 }
  0x50   : > { %2821 = vmatmul.msk.bf16.gmra.mxu2 %vm482_vm3, %v454_v46  ;;  %v2206_v46 = vand.u32 %v2112_v20, %v3263_v2  ;;  %v789_v2 = vrot.slane %v3420_v30, 1  ;;  %v1173_v20 = vrot.slane %v3443_v48, 1 }
  0x51   : > { %2811 = vmatmul.msk.bf16.gmra.mxu0 %vm482_vm3, %v374_v9  ;;  %v457_v9 = vor.u32 %v3510_v1, %v453_v24  ;;  %v1171_v24 = vrot.slane %v4406_v59, 2  ;;  %v1177_v59 = vrot.slane %v3489_v21, 1 }
  0x52   : > { %2215 = vmatpush.bf16.msra.mxu0 %v2206_v46  ;;  %2866 = vmatmul.msk.bf16.vlgmr.msrb.gmra.mxu3 %vm482_vm3, %v788_v55  ;;  %v790_v61 = vsel %vm783_vm4, %v787_v57, %v789_v2  ;;  %v1174_v46 = vrot.slane %v3375_v56, 2 }
  0x53   : > { %v462_v3 = vsel %vm338_vm2, %v457_v9, %v4404_v31  ;;  %v1172_v9 = vor.u32 %v1171_v24, %v1170_v62  ;;  %v1178_v62 = vrot.slane %v3446_v51, 2 }
  0x54   : > { %v1175_v31 = vor.u32 %v1174_v46, %v1173_v20  ;;  %v1181_v20 = vrot.slane %v3462_v23, 1  ;;  %v1182_v46 = vrot.slane %v3454_v0, 2 }
  0x56   : > { %v1176_v57 = vsel %vm1169_vm5, %v1172_v9, %v1175_v31 }
  0x5f   : > { %2817 = vmatmul.msk.bf16.gmra.mxu1 %vm482_vm3, %v422_v47  ;;  %v784_v47 = vrot.slane %v3294_v14, 1 }
  0x60   : > { %2822 = vmatmul.msk.bf16.gmra.mxu2 %vm482_vm3, %v462_v3  ;;  %v791_v3 = vrot.slane %v3437_v39, 1 }
  0x61   : > { %2812 = vmatmul.msk.bf16.gmra.mxu0 %vm482_vm3, %v382_v54  ;;  %v786_v54 = vsel %vm783_vm4, %v784_v47, %v785_v58  ;;  %v1179_v58 = vor.u32 %v1178_v62, %v1177_v59  ;;  %v1183_v47 = vor.u32 %v1182_v46, %v1181_v20  ;;  %v1189_v46 = vrot.slane %v3358_v49, 1 }
  0x62   : > { %2867 = vmatmul.msk.bf16.gmra.mxu3 %vm482_vm3, %v790_v61  ;;  %v792_v28 = vsel %vm783_vm4, %v789_v2, %v791_v3 }
  0x63   : > { %v1180_v24 = vsel %vm1169_vm5, %v1175_v31, %v1179_v58  ;;  %v1184_v9 = vsel %vm1169_vm5, %v1179_v58, %v1183_v47  ;;  %v1185_v31 = vrot.slane %v3287_v11, 1 }
  0x6f   : > { %2826 = vmatmul.msk.bf16.vlgmr.msrb.gmra.mxu1 %vm482_vm3, %v3294_v14  ;;  %v793_v14 = vrot.slane %v3271_v4, 1 }
  0x70   : > { %2844 = vmatmul.msk.bf16.vlgmr.msrb.gmra.mxu2 %vm482_vm3, %v786_v54  ;;  %v1186_v54 = vrot.slane %v3284_v10, 2 }
  0x71   : > { %2884 = vmatmul.msk.bf16.vlgmr.msrb.gmra.mxu0 %vm482_vm3, %v1176_v57  ;;  %v794_v2 = vsel %vm783_vm4, %v791_v3, %v793_v14 }
  0x72   : > { %2868 = vmatmul.msk.bf16.gmra.mxu3 %vm482_vm3, %v792_v28  ;;  %v1187_v57 = vor.u32 %v1186_v54, %v1185_v31 }
  0x74   : > { %v1188_v62 = vsel %vm1169_vm5, %v1183_v47, %v1187_v57  ;;  %v1190_v47 = vrot.slane %v3290_v12, 2 }
  0x7f   : > { %2827 = vmatmul.msk.bf16.gmra.mxu1 %vm482_vm3, %v3297_v15  ;;  %v795_v15 = vrot.slane %v3274_v5, 1 }
  0x80   : > { %2845 = vmatmul.msk.bf16.gmra.mxu2 %vm482_vm3, %v788_v55 }
  0x81   : > { %2885 = vmatmul.msk.bf16.gmra.mxu0 %vm482_vm3, %v1180_v24  ;;  %v796_v55 = vsel %vm783_vm4, %v793_v14, %v795_v15 }
  0x82   : > { %2869 = vmatmul.msk.bf16.gmra.mxu3 %vm482_vm3, %v794_v2 }
  0x8f   : > { %2828 = vmatmul.msk.bf16.gmra.mxu1 %vm482_vm3, %v3353_v45 }
  0x90   : > { %2846 = vmatmul.msk.bf16.gmra.mxu2 %vm482_vm3, %v790_v61  ;;  %v797_v61 = vrot.slane %v3337_v40, 1 }
  0x91   : > { %2886 = vmatmul.msk.bf16.gmra.mxu0 %vm482_vm3, %v1184_v9  ;;  %v1191_v9 = vor.u32 %v1190_v47, %v1189_v46 }
  0x92   : > { %2870 = vmatmul.msk.bf16.gmra.mxu3 %vm482_vm3, %v796_v55  ;;  %v798_v14 = vsel %vm783_vm4, %v795_v15, %v797_v61  ;;  %v799_v15 = vrot.slane %v3407_v22, 1 }
  0x94   : > { %v800_v12 = vsel %vm783_vm4, %v797_v61, %v799_v15  ;;  %v801_v61 = vrot.slane %v3387_v63, 1 }
  0x9c   : > { %v3561_v3 = vpop.f32.mrf.mxu1 }
  0x9e   : > { %v3563_v59 = vpop.f32.mrf.mxu0 }
  0x9f   : > { %2829 = vmatmul.msk.bf16.gmra.mxu1 %vm482_vm3, %v3420_v30 }
  0xa0   : > { %2847 = vmatmul.msk.bf16.gmra.mxu2 %vm482_vm3, %v792_v28 }
  0xa1   : > { %2887 = vmatmul.msk.bf16.gmra.mxu0 %vm482_vm3, %v1188_v62 }
  0xa2   : > { %2871 = vmatmul.msk.bf16.gmra.mxu3 %vm482_vm3, %v798_v14 }
  0xa3   : > { %v3571_v58 = vpop.f32.mrf.mxu2 }
  0xa4   : > { %4407 = vst [vmem:[#allocation28_spill] sm:$0xff] %v3571_v58  ;;  %v3573_v24 = vpop.f32.mrf.mxu1  ;;  %v1192_v58 = vsel %vm1169_vm5, %v1187_v57, %v1191_v9  ;;  %v1193_v57 = vrot.slane %v3424_v33, 1 }
  0xa5   : > { %v3581_v28 = vpop.f32.mrf.mxu3 }
  0xa6   : > { %v3576_v20 = vpop.f32.mrf.mxu0  ;;  %4408 = vst [vmem:[#allocation29_spill] sm:$0xff] %v3581_v28 }
  0xab   : > { %v3583_v31 = vpop.f32.mrf.mxu2 }
  0xac   : > { %4409 = vst [vmem:[#allocation30_spill] sm:$0xff] %v3583_v31  ;;  %v3585_v54 = vpop.f32.mrf.mxu1  ;;  %v1194_v31 = vrot.slane %v3361_v50, 2  ;;  %v802_v50 = vsel %vm783_vm4, %v799_v15, %v801_v61  ;;  %v803_v15 = vrot.slane %v3278_v7, 1 }
  0xad   : > { %v3595_v46 = vpop.f32.mrf.mxu3 }
  0xae   : > { %v3587_v62 = vpop.f32.mrf.mxu0  ;;  %4410 = vst [vmem:[#allocation31_spill] sm:$0xff] %v3595_v46 }
  0xaf   : > { %2830 = vmatmul.msk.bf16.gmra.mxu1 %vm482_vm3, %v3437_v39 }
  0xb0   : > { %2848 = vmatmul.msk.bf16.gmra.mxu2 %vm482_vm3, %v794_v2  ;;  %v1195_v2 = vor.u32 %v1194_v31, %v1193_v57 }
  0xb1   : > { %2888 = vmatmul.msk.bf16.gmra.mxu0 %vm482_vm3, %v1192_v58 }
  0xb2   : > { %2872 = vmatmul.msk.bf16.gmra.mxu3 %vm482_vm3, %v800_v12  ;;  %v1196_v10 = vsel %vm1169_vm5, %v1191_v9, %v1195_v2  ;;  %v1197_v9 = vrot.slane %v3480_v25, 1 }
  0xb3   : > { %v3597_v47 = vpop.f32.mrf.mxu2 }
  0xb4   : > { %4411 = vst [vmem:[#allocation32_spill] sm:$0xff] %v3597_v47  ;;  %v3599_v28 = vpop.f32.mrf.mxu1 }
  0xb5   : > { %v3607_v39 = vpop.f32.mrf.mxu3 }
  0xb6   : > { %v3602_v49 = vpop.f32.mrf.mxu0  ;;  %4412 = vst [vmem:[#allocation33_spill] sm:$0xff] %v3607_v39 }
  0xbb   : > { %v3609_v58 = vpop.f32.mrf.mxu2 }
  0xbc   : > { %4413 = vst [vmem:[#allocation34_spill] sm:$0xff] %v3609_v58  ;;  %v3611_v46 = vpop.f32.mrf.mxu1 }
  0xbd   : > { %v3621_v31 = vpop.f32.mrf.mxu3 }
  0xbe   : > { %v3613_v47 = vpop.f32.mrf.mxu0  ;;  %4414 = vst [vmem:[#allocation35_spill] sm:$0xff] %v3621_v31 }
  0xbf   : > { %2831 = vmatmul.msk.bf16.gmra.mxu1 %vm482_vm3, %v3271_v4  ;;  %v1198_v4 = vrot.slane %v3427_v34, 2  ;;  %v804_v34 = vsel %vm783_vm4, %v801_v61, %v803_v15  ;;  %v805_v61 = vrot.slane %v3281_v8, 1 }
  0xc0   : > { %2849 = vmatmul.msk.bf16.gmra.mxu2 %vm482_vm3, %v796_v55 }
  0xc1   : > { %2889 = vmatmul.msk.bf16.gmra.mxu0 %vm482_vm3, %v1196_v10  ;;  %v1199_v55 = vor.u32 %v1198_v4, %v1197_v9 }
  0xc2   : > { %2873 = vmatmul.msk.bf16.gmra.mxu3 %vm482_vm3, %v802_v50 }
  0xc3   : > { %v3623_v57 = vpop.f32.mrf.mxu2  ;;  %v1200_v11 = vsel %vm1169_vm5, %v1195_v2, %v1199_v55  ;;  %v1201_v2 = vrot.slane %v3417_v29, 1  ;;  %v3676_v29 = vsel %vm783_vm4, %v803_v15, %v805_v61  ;;  %v807_v15 = vrot.slane %v3344_v42, 1 }
  0xc4   : > { %4415 = vst [vmem:[#allocation36_spill] sm:$0xff] %v3623_v57  ;;  %v3625_v39 = vpop.f32.mrf.mxu1 }
  0xc5   : > { %v3633_v58 = vpop.f32.mrf.mxu3 }
  0xc6   : > { %v3628_v33 = vpop.f32.mrf.mxu0  ;;  %4416 = vst [vmem:[#allocation37_spill] sm:$0xff] %v3633_v58 }
  0xcb   : > { %v3635_v10 = vpop.f32.mrf.mxu2 }
  0xcc   : > { %4417 = vst [vmem:[#allocation38_spill] sm:$0xff] %v3635_v10  ;;  %v3637_v31 = vpop.f32.mrf.mxu1 }
  0xcd   : > { %4418 = vst [vmem:[#allocation39_spill] sm:$0xff] %v3637_v31  ;;  %v3647_v9 = vpop.f32.mrf.mxu3 }
  0xce   : > { %v3639_v57 = vpop.f32.mrf.mxu0  ;;  %4419 = vst [vmem:[#allocation40_spill] sm:$0xff] %v3647_v9 }
  0xcf   : > { %2832 = vmatmul.msk.bf16.gmra.mxu1 %vm482_vm3, %v3274_v5  ;;  %v1202_v5 = vrot.slane %v3401_v19, 2 }
  0xd0   : > { %2850 = vmatmul.msk.bf16.gmra.mxu2 %vm482_vm3, %v798_v14 }
  0xd1   : > { %2890 = vmatmul.msk.bf16.gmra.mxu0 %vm482_vm3, %v1200_v11  ;;  %v1203_v14 = vor.u32 %v1202_v5, %v1201_v2 }
  0xd2   : > { %2874 = vmatmul.msk.bf16.gmra.mxu3 %vm482_vm3, %v804_v34 }
  0xd3   : > { %v3649_v4 = vpop.f32.mrf.mxu2 }
  0xd4   : > { %4420 = vst [vmem:[#allocation41_spill] sm:$0xff] %v3649_v4  ;;  %v3651_v58 = vpop.f32.mrf.mxu1  ;;  %v1204_v4 = vsel %vm1169_vm5, %v1199_v55, %v1203_v14  ;;  %v1205_v55 = vrot.slane %v3303_v17, 1 }
  0xd5   : > { %4421 = vst [vmem:[#allocation42_spill] sm:$0xff] %v3651_v58  ;;  %v1038_v10 = vpop.f32.mrf.mxu3  ;;  %v1209_v58 = vrot.slane %v3367_v52, 1 }
  0xd6   : > { %v3654_v25 = vpop.f32.mrf.mxu0 }
  0xdb   : > { %v3659_v30 = vpop.f32.mrf.mxu2 }
  0xdc   : > { %4422 = vst [vmem:[#allocation43_spill] sm:$0xff] %v3659_v30  ;;  %v3661_v11 = vpop.f32.mrf.mxu1 }
  0xdd   : > { %4423 = vst [vmem:[#allocation44_spill] sm:$0xff] %v3661_v11  ;;  %v1040_v19 = vpop.f32.mrf.mxu3 }
  0xde   : > { %v3663_v9 = vpop.f32.mrf.mxu0 }
  0xdf   : > { %2833 = vmatmul.msk.bf16.gmra.mxu1 %vm482_vm3, %v3337_v40  ;;  %v1206_v40 = vrot.slane %v3300_v16, 2 }
  0xe0   : > { %2851 = vmatmul.msk.bf16.gmra.mxu2 %vm482_vm3, %v800_v12 }
  0xe1   : > { %2891 = vmatmul.msk.bf16.gmra.mxu0 %vm482_vm3, %v1204_v4  ;;  %v1207_v12 = vor.u32 %v1206_v40, %v1205_v55 }
  0xe2   : > { %2875 = vmatmul.msk.bf16.gmra.mxu3 %vm482_vm3, %v3676_v29 }
  0xe3   : > { %v3671_v2 = vpop.f32.mrf.mxu2 }
  0xe4   : > { %4424 = vst [vmem:[#allocation45_spill] sm:$0xff] %v3671_v2  ;;  %v3673_v5 = vpop.f32.mrf.mxu1 }
  0xe5   : > { %4425 = vst [vmem:[#allocation46_spill] sm:$0xff] %v3673_v5  ;;  %v1043_v45 = vpop.f32.mrf.mxu3  ;;  %v1208_v5 = vsel %vm1169_vm5, %v1203_v14, %v1207_v12 }
  0xe6   : > { %v3678_v30 = vpop.f32.mrf.mxu0 }
  0xeb   : > { %v3684_v4 = vpop.f32.mrf.mxu2 }
  0xec   : > { %4426 = vst [vmem:[#allocation47_spill] sm:$0xff] %v3684_v4  ;;  %v691_v11 = vpop.f32.mrf.mxu1  ;;  %v3694_v4 = vsel %vm783_vm4, %v805_v61, %v807_v15 }
  0xed   : > { %v692_v16 = vadd.f32 %v691_v11, %v3563_v59  ;;  %v1045_v17 = vpop.f32.mrf.mxu3 }
  0xee   : > { %v1317_v2 = vpop.f32.mrf.mxu0 }
  0xef   : > { %2834 = vmatmul.msk.bf16.gmra.mxu1 %vm482_vm3, %v3407_v22  ;;  %v1210_v22 = vrot.slane %v3306_v18, 2 }
  0xf0   : > { %2852 = vmatmul.msk.bf16.gmra.mxu2 %vm482_vm3, %v802_v50 }
  0xf1   : > { %2892 = vmatmul.msk.bf16.gmra.mxu0 %vm482_vm3, %v1208_v5  ;;  %v1211_v11 = vor.u32 %v1210_v22, %v1209_v58 }
  0xf2   : > { %2876 = vmatmul.msk.bf16.gmra.mxu3 %vm482_vm3, %v3694_v4 }
  0xf3   : > { %v885_v55 = vpop.f32.mrf.mxu2 }
  0xf4   : > { %v975_v40 = vadd.f32 %v885_v55, %v692_v16  ;;  %v693_v0 = vpop.f32.mrf.mxu1 }
  0xf5   : > { %v694_v59 = vadd.f32 %v693_v0, %v3576_v20  ;;  %v1048_v5 = vpop.f32.mrf.mxu3 }
  0xf6   : > { %v1128_v23 = vadd.f32 %v1038_v10, %v975_v40  ;;  %v1319_v14 = vpop.f32.mrf.mxu0  ;;  %v1212_v10 = vsel %vm1169_vm5, %v1207_v12, %v1211_v11  ;;  %v809_v40 = vrot.slane %v3413_v26, 1 }
  0xf8   : > { %v3700_v50 = vadd.f32 %v1317_v2, %v1128_v23  ;;  %v3713_v22 = vsel %vm783_vm4, %v807_v15, %v809_v40 }
  0xfb   : > { %v887_v16 = vpop.f32.mrf.mxu2 }
  0xfc   : > { %v976_v55 = vadd.f32 %v887_v16, %v694_v59  ;;  %v696_v31 = vpop.f32.mrf.mxu1 }
  0xfd   : > { %v697_v0 = vadd.f32 %v696_v31, %v3587_v62  ;;  %v1050_v20 = vpop.f32.mrf.mxu3 }
  0xfe   : > { %v1129_v61 = vadd.f32 %v1040_v19, %v976_v55  ;;  %v1322_v51 = vpop.f32.mrf.mxu0 }
  0xff   : > { %2835 = vmatmul.msk.bf16.gmra.mxu1 %vm482_vm3, %v3387_v63  ;;  %v1213_v63 = vrot.slane %v3431_v37, 1 }
 0x100   : > { %2853 = vmatmul.msk.bf16.gmra.mxu2 %vm482_vm3, %v804_v34  ;;  %v3708_v23 = vadd.f32 %v1319_v14, %v1129_v61  ;;  %v1214_v34 = vrot.slane %v3370_v53, 2 }
 0x101   : > { %2893 = vmatmul.msk.bf16.gmra.mxu0 %vm482_vm3, %v1212_v10 }
 0x102   : > { %2877 = vmatmul.msk.bf16.gmra.mxu3 %vm482_vm3, %v3713_v22  ;;  %v1215_v31 = vor.u32 %v1214_v34, %v1213_v63  ;;  %v1217_v34 = vrot.slane %v3483_v13, 1 }
 0x103   : > { %v890_v58 = vpop.f32.mrf.mxu2 }
 0x104   : > { %v977_v2 = vadd.f32 %v890_v58, %v697_v0  ;;  %v698_v19 = vpop.f32.mrf.mxu1 }
 0x105   : > { %v699_v62 = vadd.f32 %v698_v19, %v3602_v49  ;;  %v1053_v16 = vpop.f32.mrf.mxu3 }
 0x106   : > { %v1130_v12 = vadd.f32 %v1043_v45, %v977_v2  ;;  %v1324_v59 = vpop.f32.mrf.mxu0  ;;  %v1216_v45 = vsel %vm1169_vm5, %v1211_v11, %v1215_v31 }
 0x108   : > { %v3719_v14 = vadd.f32 %v1322_v51, %v1130_v12  ;;  %v811_v51 = vrot.slane %v3473_v36, 1 }
 0x10a   : > { %v3733_v11 = vsel %vm783_vm4, %v809_v40, %v811_v51 }
 0x10b   : > { %v892_v55 = vpop.f32.mrf.mxu2 }
 0x10c   : > { %v978_v61 = vadd.f32 %v892_v55, %v699_v62  ;;  %v701_v10 = vpop.f32.mrf.mxu1 }
 0x10d   : > { %v702_v49 = vadd.f32 %v701_v10, %v3613_v47  ;;  %v1055_v2 = vpop.f32.mrf.mxu3 }
 0x10e   : > { %v1131_v15 = vadd.f32 %v1045_v17, %v978_v61  ;;  %v1327_v0 = vpop.f32.mrf.mxu0 }
 0x10f   : > { %2836 = vmatmul.msk.bf16.gmra.mxu1 %vm482_vm3, %v3278_v7 }
 0x110   : > { %2854 = vmatmul.msk.bf16.gmra.mxu2 %vm482_vm3, %v3676_v29  ;;  %v3728_v58 = vadd.f32 %v1324_v59, %v1131_v15  ;;  %v1218_v29 = vrot.slane %v3434_v38, 2 }
 0x111   : > { %2894 = vmatmul.msk.bf16.gmra.mxu0 %vm482_vm3, %v1216_v45 }
 0x112   : > { %2878 = vmatmul.msk.bf16.gmra.mxu3 %vm482_vm3, %v3733_v11  ;;  %v1219_v62 = vor.u32 %v1218_v29, %v1217_v34  ;;  %v1221_v34 = vrot.slane %v3510_v1, 1 }
 0x113   : > { %v895_v19 = vpop.f32.mrf.mxu2 }
 0x114   : > { %v979_v17 = vadd.f32 %v895_v19, %v702_v49  ;;  %v703_v12 = vpop.f32.mrf.mxu1 }
 0x115   : > { %v704_v47 = vadd.f32 %v703_v12, %v3628_v33  ;;  %v1058_v55 = vpop.f32.mrf.mxu3 }
 0x116   : > { %v1132_v63 = vadd.f32 %v1048_v5, %v979_v17  ;;  %v1329_v7 = vpop.f32.mrf.mxu0  ;;  %v1220_v5 = vsel %vm1169_vm5, %v1215_v31, %v1219_v62 }
 0x118   : > { %v3739_v59 = vadd.f32 %v1327_v0, %v1132_v63  ;;  %v813_v0 = vrot.slane %v3321_v32, 1 }
 0x11a   : > { %v3753_v31 = vsel %vm783_vm4, %v811_v51, %v813_v0 }
 0x11b   : > { %v897_v61 = vpop.f32.mrf.mxu2 }
 0x11c   : > { %v980_v10 = vadd.f32 %v897_v61, %v704_v47  ;;  %v706_v15 = vpop.f32.mrf.mxu1 }
 0x11d   : > { %v707_v33 = vadd.f32 %v706_v15, %v3639_v57  ;;  %v1060_v19 = vpop.f32.mrf.mxu3 }
 0x11e   : > { %v1133_v40 = vadd.f32 %v1050_v20, %v980_v10  ;;  %v1332_v45 = vpop.f32.mrf.mxu0 }
 0x11f   : > { %2837 = vmatmul.msk.bf16.gmra.mxu1 %vm482_vm3, %v3281_v8 }
 0x120   : > { %2855 = vmatmul.msk.bf16.gmra.mxu2 %vm482_vm3, %v3694_v4  ;;  %v3748_v49 = vadd.f32 %v1329_v7, %v1133_v40  ;;  %v1222_v4 = vrot.slane %v3486_v27, 2 }
 0x121   : > { %2895 = vmatmul.msk.bf16.gmra.mxu0 %vm482_vm3, %v1220_v5 }
 0x122   : > { %2879 = vmatmul.msk.bf16.gmra.mxu3 %vm482_vm3, %v3753_v31  ;;  %v1223_v29 = vor.u32 %v1222_v4, %v1221_v34 }
 0x123   : > { %v900_v17 = vpop.f32.mrf.mxu2 }
 0x124   : > { %v981_v20 = vadd.f32 %v900_v17, %v707_v33  ;;  %v708_v12 = vpop.f32.mrf.mxu1 }
 0x125   : > { %v709_v57 = vadd.f32 %v708_v12, %v3654_v25  ;;  %v1063_v47 = vpop.f32.mrf.mxu3 }
 0x126   : > { %v1134_v63 = vadd.f32 %v1053_v16, %v981_v20  ;;  %v1334_v8 = vpop.f32.mrf.mxu0  ;;  %v1224_v16 = vsel %vm1169_vm5, %v1219_v62, %v1223_v29 }
 0x128   : > { %v3759_v7 = vadd.f32 %v1332_v45, %v1134_v63  ;;  %v815_v45 = vrot.slane %v3329_v35, 1  ;;  %v1225_v63 = vrot.slane %v3347_v43, 1 }
 0x12a   : > { %v3773_v62 = vsel %vm783_vm4, %v813_v0, %v815_v45 }
 0x12b   : > { %v902_v61 = vpop.f32.mrf.mxu2 }
 0x12c   : > { %v982_v10 = vadd.f32 %v902_v61, %v709_v57  ;;  %v711_v15 = vpop.f32.mrf.mxu1 }
 0x12d   : > { %v712_v25 = vadd.f32 %v711_v15, %v3663_v9  ;;  %v1065_v33 = vpop.f32.mrf.mxu3 }
 0x12e   : > { %v1135_v51 = vadd.f32 %v1055_v2, %v982_v10  ;;  %v1337_v40 = vpop.f32.mrf.mxu0 }
 0x12f   : > { %2838 = vmatmul.msk.bf16.gmra.mxu1 %vm482_vm3, %v3344_v42 }
 0x130   : > { %2856 = vmatmul.msk.bf16.gmra.mxu2 %vm482_vm3, %v3713_v22  ;;  %v3768_v5 = vadd.f32 %v1334_v8, %v1135_v51  ;;  %v1226_v22 = vrot.slane %v3340_v41, 2  ;;  %v3788_v51 = vrot.slane %v3382_v60, 1 }
 0x131   : > { %2896 = vmatmul.msk.bf16.gmra.mxu0 %vm482_vm3, %v1224_v16 }
 0x132   : > { %2880 = vmatmul.msk.bf16.gmra.mxu3 %vm482_vm3, %v3773_v62  ;;  %v1227_v34 = vor.u32 %v1226_v22, %v1225_v63 }
 0x133   : > { %v905_v17 = vpop.f32.mrf.mxu2 }
 0x134   : > { %v983_v2 = vadd.f32 %v905_v17, %v712_v25  ;;  %v713_v20 = vpop.f32.mrf.mxu1 }
 0x135   : > { %v714_v9 = vadd.f32 %v713_v20, %v3678_v30  ;;  %v1068_v4 = vpop.f32.mrf.mxu3  ;;  %v1230_v20 = vrot.slane %v3350_v44, 2 }
 0x136   : > { %v1136_v12 = vadd.f32 %v1058_v55, %v983_v2  ;;  %v1339_v42 = vpop.f32.mrf.mxu0  ;;  %v1228_v55 = vsel %vm1169_vm5, %v1223_v29, %v1227_v34  ;;  %v1229_v2 = vrot.slane %v3394_v6, 1 }
 0x138   : > { %v3779_v8 = vadd.f32 %v1337_v40, %v1136_v12 }
 0x13b   : > { %v907_v57 = vpop.f32.mrf.mxu2 }
 0x13c   : > { %v984_v61 = vadd.f32 %v907_v57, %v714_v9  ;;  %v716_v10 = vpop.f32.mrf.mxu1 }
 0x13d   : > { %v717_v30 = vadd.f32 %v716_v10, %v3561_v3  ;;  %v1070_v16 = vpop.f32.mrf.mxu3 }
 0x13e   : > { %v1137_v0 = vadd.f32 %v1060_v19, %v984_v61  ;;  %v1342_v15 = vpop.f32.mrf.mxu0 }
 0x13f   : > { %2839 = vmatmul.msk.bf16.gmra.mxu1 %vm482_vm3, %v3413_v26  ;;  %v3796_v26 = vsel %vm783_vm4, %v815_v45, %v3788_v51  ;;  %v3806_v45 = vld [vmem:[%s3268_s30 + $0x90] sm:$0xff] }
 0x140   : > { %2857 = vmatmul.msk.bf16.gmra.mxu2 %vm482_vm3, %v3733_v11  ;;  %v3790_v40 = vadd.f32 %v1339_v42, %v1137_v0  ;;  %v1231_v42 = vor.u32 %v1230_v20, %v1229_v2  ;;  %v1018_v0 = vrot.slane %v3806_v45, 1 }
 0x141   : > { %2897 = vmatmul.msk.bf16.gmra.mxu0 %vm482_vm3, %v1228_v55 }
 0x142   : > { %2881 = vmatmul.msk.bf16.gmra.mxu3 %vm482_vm3, %v3796_v26  ;;  %v1232_v10 = vsel %vm1169_vm5, %v1227_v34, %v1231_v42  ;;  %v1019_v34 = vsel %vm783_vm4, %v3788_v51, %v1018_v0 }
 0x143   : > { %v910_v19 = vpop.f32.mrf.mxu2 }
 0x144   : > { %v985_v25 = vadd.f32 %v910_v19, %v717_v30  ;;  %v718_v29 = vpop.f32.mrf.mxu1 }
 0x145   : > { %v719_v3 = vadd.f32 %v718_v29, %v3573_v24  ;;  %v1073_v63 = vpop.f32.mrf.mxu3  ;;  %v4427_v29 = vld [vmem:[#allocation26_spill] sm:$0xff] }
 0x146   : > { %v1138_v17 = vadd.f32 %v1063_v47, %v985_v25  ;;  %v1344_v11 = vpop.f32.mrf.mxu0 }
 0x148   : > { %v3802_v12 = vadd.f32 %v1342_v15, %v1138_v17  ;;  %v1233_v17 = vrot.slane %v4427_v29, 1 }
 0x14b   : > { %v912_v22 = vpop.f32.mrf.mxu2 }
 0x14c   : > { %v986_v9 = vadd.f32 %v912_v22, %v719_v3  ;;  %v721_v57 = vpop.f32.mrf.mxu1 }
 0x14d   : > { %v722_v15 = vadd.f32 %v721_v57, %v3585_v54  ;;  %v1075_v55 = vpop.f32.mrf.mxu3 }
 0x14e   : > { %v1139_v47 = vadd.f32 %v1065_v33, %v986_v9  ;;  %v1347_v61 = vpop.f32.mrf.mxu0 }
 0x14f   : > { %2840 = vmatmul.msk.bf16.gmra.mxu1 %vm482_vm3, %v3473_v36 }
 0x150   : > { %2858 = vmatmul.msk.bf16.gmra.mxu2 %vm482_vm3, %v3753_v31  ;;  %v3814_v24 = vadd.f32 %v1344_v11, %v1139_v47  ;;  %v4428_v31 = vld [vmem:[#allocation16_spill] sm:$0xff] }
 0x151   : > { %2898 = vmatmul.msk.bf16.gmra.mxu0 %vm482_vm3, %v1232_v10  ;;  %v1234_v2 = vrot.slane %v4428_v31, 2 }
 0x152   : > { %2882 = vmatmul.msk.bf16.gmra.mxu3 %vm482_vm3, %v1019_v34 }
 0x153   : > { %v915_v30 = vpop.f32.mrf.mxu2  ;;  %v1235_v54 = vor.u32 %v1234_v2, %v1233_v17 }
 0x154   : > { %v987_v33 = vadd.f32 %v915_v30, %v722_v15  ;;  %v723_v19 = vpop.f32.mrf.mxu1 }
 0x155   : > { %v724_v20 = vadd.f32 %v723_v19, %v3599_v28  ;;  %v1078_v3 = vpop.f32.mrf.mxu3 }
 0x156   : > { %v1140_v25 = vadd.f32 %v1068_v4, %v987_v33  ;;  %v1349_v36 = vpop.f32.mrf.mxu0  ;;  %v1236_v4 = vsel %vm1169_vm5, %v1231_v42, %v1235_v54 }
 0x158   : > { %v3823_v11 = vadd.f32 %v1347_v61, %v1140_v25  ;;  %v4382_v61 = vshrl.u32 %v3806_v45, 16 }
 0x15b   : > { %v917_v22 = vpop.f32.mrf.mxu2 }
 0x15c   : > { %v988_v9 = vadd.f32 %v917_v22, %v724_v20  ;;  %v726_v57 = vpop.f32.mrf.mxu1  ;;  %v3062_v22 = vld [vmem:[%s3268_s30 + $0x98] sm:$0xff]  }
 0x15d   : > { %v727_v28 = vadd.f32 %v726_v57, %v3611_v46  ;;  %v1080_v30 = vpop.f32.mrf.mxu3 }
 0x15e   : > { %v1141_v47 = vadd.f32 %v1070_v16, %v988_v9  ;;  %v1352_v10 = vpop.f32.mrf.mxu0  ;;  %v4381_v16 = vshll.u32 %v3806_v45, 16  ;;  %v1834_v9 = vrot.slane %v3443_v48, 2 }
 0x15f   : > { %2841 = vmatmul.msk.bf16.gmra.mxu1 %vm482_vm3, %v3321_v32 }
 0x160   : > { %2859 = vmatmul.msk.bf16.gmra.mxu2 %vm482_vm3, %v3773_v62  ;;  %v3831_v15 = vadd.f32 %v1349_v36, %v1141_v47  ;;  %v1240_v62 = vrot.slane %v4382_v61, 1  ;;  %v1243_v25 = vrot.slane %v4381_v16, 2  ;;  %v1835_v47 = vrot.slane %v3375_v56, 3  ;;  %v4430_v56 = vld [vmem:[#allocation39_spill] sm:$0xff]  ;;  %v4446_v61 = vld [vmem:[#allocation10_spill] sm:$0xff] }
 0x161   : > { %2899 = vmatmul.msk.bf16.gmra.mxu0 %vm482_vm3, %v1236_v4  ;;  %v1837_v4 = vrot.slane %v3489_v21, 2 }
 0x162   : > { %2883 = vmatmul.msk.bf16.gmra.mxu3 %vm482_vm3, %v1018_v0  ;;  %v1244_v17 = vor.u32 %v1243_v25, %v1240_v62 }
 0x163   : > { %v920_v33 = vpop.f32.mrf.mxu2 }
 0x164   : > { %v989_v42 = vadd.f32 %v920_v33, %v727_v28  ;;  %v728_v19 = vpop.f32.mrf.mxu1  ;;  %v4429_v28 = vld [vmem:[#allocation23_spill] sm:$0xff] }
 0x165   : > { %v729_v36 = vadd.f32 %v728_v19, %v3625_v39  ;;  %v1083_v2 = vpop.f32.mrf.mxu3  ;;  %v1838_v33 = vrot.slane %v4429_v28, 3  ;;  %v1836_v39 = vor.u32 %v1835_v47, %v1834_v9  ;;  %v4431_v9 = vld [vmem:[#allocation42_spill] sm:$0xff] }
 0x166   : > { %v1142_v34 = vadd.f32 %v1073_v63, %v989_v42  ;;  %v1354_v32 = vpop.f32.mrf.mxu0 }
 0x167   : > { %v1839_v48 = vor.u32 %v1838_v33, %v1837_v4 }
 0x168   : > { %v3842_v46 = vadd.f32 %v1352_v10, %v1142_v34  ;;  %v1245_v10 = vsel %vm1169_vm5, %v1235_v54, %v1244_v17  ;;  %v3040_v34 = vunpack.c.l.b16 %v3062_v22 }
 0x16b   : > { %v922_v20 = vpop.f32.mrf.mxu2 }
 0x16c   : > { %v990_v63 = vadd.f32 %v922_v20, %v729_v36  ;;  %v731_v57 = vpop.f32.mrf.mxu1 }
 0x16d   : > { %v732_v21 = vadd.f32 %v731_v57, %v4430_v56  ;;  %v1085_v62 = vpop.f32.mrf.mxu3 }
 0x16e   : > { %v1143_v42 = vadd.f32 %v1075_v55, %v990_v63  ;;  %v1357_v0 = vpop.f32.mrf.mxu0  ;;  %v3859_v55 = vpack.c.b16 %v3040_v34, %v3040_v34  ;;  %v4433_v34 = vld [vmem:[#allocation24_spill] sm:$0xff] }
 0x16f   : > { %2842 = vmatmul.msk.bf16.gmra.mxu1 %vm482_vm3, %v3329_v35  ;;  %v1840_v35 = vsel %vm1833_vm6, %v1836_v39, %v1839_v48  ;;  %v1842_v56 = vrot.slane %v4433_v34, 3 }
 0x170   : > { %2860 = vmatmul.msk.bf16.gmra.mxu2 %vm482_vm3, %v3796_v26  ;;  %v3855_v19 = vadd.f32 %v1354_v32, %v1143_v42  ;;  %v1247_v26 = vshll.u32 %v3859_v55, 16  ;;  %v4432_v42 = vld [vmem:[#allocation25_spill] sm:$0xff] }
 0x171   : > { %2900 = vmatmul.msk.bf16.gmra.mxu0 %vm482_vm3, %v1245_v10  ;;  %v1841_v10 = vrot.slane %v4432_v42, 2 }
 0x172   : > { %2938 = vmatmul.msk.bf16.vlgmr.msra.gmra.mxu3 %vm482_vm3, %v1840_v35  ;;  %v1249_v47 = vrot.slane %v1247_v26, 2 }
 0x173   : > { %v925_v54 = vpop.f32.mrf.mxu2 }
 0x174   : > { %v991_v25 = vadd.f32 %v925_v54, %v732_v21  ;;  %v733_v36 = vpop.f32.mrf.mxu1  ;;  %v1250_v21 = vsel %vm1169_vm5, %v1244_v17, %v1249_v47 }
 0x175   : > { %v734_v63 = vadd.f32 %v733_v36, %v4431_v9  ;;  %v1088_v57 = vpop.f32.mrf.mxu3 }
 0x176   : > { %v1144_v20 = vadd.f32 %v1078_v3, %v991_v25  ;;  %v1359_v22 = vpop.f32.mrf.mxu0  ;;  %v4434_v25 = vld [vmem:[#allocation44_spill] sm:$0xff] }
 0x178   : > { %v3864_v32 = vadd.f32 %v1357_v0, %v1144_v20  ;;  %v1843_v0 = vor.u32 %v1842_v56, %v1841_v10 }
 0x17a   : > { %v1844_v9 = vsel %vm1833_vm6, %v1839_v48, %v1843_v0 }
 0x17b   : > { %v927_v4 = vpop.f32.mrf.mxu2 }
 0x17c   : > { %v992_v28 = vadd.f32 %v927_v4, %v734_v63  ;;  %v736_v33 = vpop.f32.mrf.mxu1 }
 0x17d   : > { %v737_v36 = vadd.f32 %v736_v33, %v4434_v25  ;;  %v1090_v35 = vpop.f32.mrf.mxu3  ;;  %v4437_v33 = vld [vmem:[#allocation46_spill] sm:$0xff] }
 0x17e   : > { %v1145_v39 = vadd.f32 %v1080_v30, %v992_v28  ;;  %v1362_v3 = vpop.f32.mrf.mxu0  ;;  %v4436_v28 = vld [vmem:[#allocation19_spill] sm:$0xff] }
 0x17f   : > { %2843 = vmatmul.msk.bf16.gmra.mxu1 %vm482_vm3, %v3382_v60  ;;  %v3103_v60 = vld [vmem:[%s3268_s30 + $0x8] sm:$0xff]  ;;  %v1449_v42 = vrot.slane %v4436_v28, 2  ;;  %v2115_v56 = vrot.slane %v4436_v28, 3 }
 0x180   : > { %2861 = vmatmul.msk.bf16.gmra.mxu2 %vm482_vm3, %v3788_v51  ;;  %v3874_v54 = vadd.f32 %v1359_v22, %v1145_v39  ;;  %v1446_v47 = vrot.slane %v3103_v60, 2  ;;  %v4435_v51 = vld [vmem:[#allocation13_spill] sm:$0xff] }
 0x181   : > { %2901 = vmatmul.msk.bf16.gmra.mxu0 %vm482_vm3, %v1250_v21  ;;  %v1447_v4 = vrot.slane %v4435_v51, 2  ;;  %v2114_v34 = vrot.slane %v4435_v51, 3 }
 0x182   : > { %2939 = vmatmul.msk.bf16.gmra.mxu3 %vm482_vm3, %v1844_v9 }
 0x183   : > { %v930_v20 = vpop.f32.mrf.mxu2  ;;  %v1448_v25 = vsel %vm1445_vm7, %v1446_v47, %v1447_v4  ;;  %v1450_v9 = vsel %vm1445_vm7, %v1447_v4, %v1449_v42  ;;  %v4441_v47 = vld [vmem:[#allocation28_spill] sm:$0xff] }
 0x184   : > { %v993_v30 = vadd.f32 %v930_v20, %v737_v36  ;;  %v738_v26 = vpop.f32.mrf.mxu1  ;;  %v4438_v36 = vld [vmem:[#allocation9_spill] sm:$0xff] }
 0x185   : > { %v739_v10 = vadd.f32 %v738_v26, %v4437_v33  ;;  %v1093_v48 = vpop.f32.mrf.mxu3  ;;  %v1845_v20 = vrot.slane %v4438_v36, 2  ;;  %v2116_v26 = vsel %vm2113_vm8, %v2114_v34, %v2115_v56 }
 0x186   : > { %v1146_v17 = vadd.f32 %v1083_v2, %v993_v30  ;;  %v1364_v63 = vpop.f32.mrf.mxu0 }
 0x188   : > { %v3882_v22 = vadd.f32 %v1362_v3, %v1146_v17  ;;  %v4439_v3 = vld [vmem:[#allocation8_spill] sm:$0xff] }
 0x189   : > { %v1846_v30 = vrot.slane %v4439_v3, 3 }
 0x18b   : > { %v932_v2 = vpop.f32.mrf.mxu2  ;;  %v1847_v51 = vor.u32 %v1846_v30, %v1845_v20 }
 0x18c   : > { %v994_v39 = vadd.f32 %v932_v2, %v739_v10  ;;  %v741_v21 = vpop.f32.mrf.mxu1 }
 0x18d   : > { %v742_v33 = vadd.f32 %v741_v21, %v4441_v47  ;;  %v1095_v10 = vpop.f32.mrf.mxu3 }
 0x18e   : > { %v1147_v17 = vadd.f32 %v1085_v62, %v994_v39  ;;  %v1367_v60 = vpop.f32.mrf.mxu0  ;;  %v1848_v62 = vsel %vm1833_vm6, %v1843_v0, %v1847_v51  ;;  %v1850_v0 = vrot.slane %v4446_v61, 3 }
 0x18f   : > { %2902 = vmatmul.msk.bf16.vlgmr.msra.gmra.mxu1 %vm482_vm3, %v1448_v25  ;;  %v4443_v25 = vld [vmem:[#allocation22_spill] sm:$0xff] }
 0x190   : > { %2920 = vmatmul.msk.bf16.vlgmr.msra.gmra.mxu2 %vm482_vm3, %v1450_v9  ;;  %v3895_v28 = vadd.f32 %v1364_v63, %v1147_v17  ;;  %v1451_v20 = vrot.slane %v4443_v25, 2  ;;  %v4444_v63 = vld [vmem:[#allocation30_spill] sm:$0xff]  ;;  %v2117_v17 = vrot.slane %v4443_v25, 3  ;;  %v4448_v25 = vld [vmem:[#allocation32_spill] sm:$0xff] }
 0x191   : > { %2956 = vmatmul.msk.bf16.vlgmr.msra.gmra.mxu0 %vm482_vm3, %v2116_v26 }
 0x192   : > { %4440 = vst [vmem:[#allocation26_spill] sm:$0xff] %v3895_v28  ;;  %2940 = vmatmul.msk.bf16.gmra.mxu3 %vm482_vm3, %v1848_v62 }
 0x193   : > { %v935_v2 = vpop.f32.mrf.mxu2 }
 0x194   : > { %v995_v36 = vadd.f32 %v935_v2, %v742_v33  ;;  %v743_v3 = vpop.f32.mrf.mxu1  ;;  %v4445_v33 = vld [vmem:[#allocation14_spill] sm:$0xff] }
 0x195   : > { %v744_v30 = vadd.f32 %v743_v3, %v4444_v63  ;;  %v1098_v26 = vpop.f32.mrf.mxu3  ;;  %v1849_v2 = vrot.slane %v4445_v33, 2  ;;  %v3104_v33 = vld [vmem:[%s3268_s30 + $0x28] sm:$0xff] }
 0x196   : > { %v1148_v4 = vadd.f32 %v1088_v57, %v995_v36  ;;  %v1369_v39 = vpop.f32.mrf.mxu0  ;;  %v1452_v57 = vsel %vm1445_vm7, %v1449_v42, %v1451_v20 }
 0x197   : > { %v1851_v3 = vor.u32 %v1850_v0, %v1849_v2  ;;  %v1453_v2 = vrot.slane %v3104_v33, 2 }
 0x198   : > { %v3901_v34 = vadd.f32 %v1367_v60, %v1148_v4  ;;  %v2118_v60 = vsel %vm2113_vm8, %v2115_v56, %v2117_v17 }
 0x19a   : > { %4442 = vst [vmem:[#allocation16_spill] sm:$0xff] %v3901_v34  ;;  %v4451_v34 = vld [vmem:[#allocation20_spill] sm:$0xff] }
 0x19b   : > { %v937_v21 = vpop.f32.mrf.mxu2 }
 0x19c   : > { %v996_v47 = vadd.f32 %v937_v21, %v744_v30  ;;  %v746_v16 = vpop.f32.mrf.mxu1 }
 0x19d   : > { %v747_v63 = vadd.f32 %v746_v16, %v4448_v25  ;;  %v1100_v30 = vpop.f32.mrf.mxu3 }
 0x19e   : > { %v1149_v36 = vadd.f32 %v1090_v35, %v996_v47  ;;  %v1372_v62 = vpop.f32.mrf.mxu0  ;;  %v1852_v35 = vsel %vm1833_vm6, %v1847_v51, %v1851_v3 }
 0x19f   : > { %2903 = vmatmul.msk.bf16.gmra.mxu1 %vm482_vm3, %v1450_v9 }
 0x1a0   : > { %2921 = vmatmul.msk.bf16.gmra.mxu2 %vm482_vm3, %v1452_v57  ;;  %v3912_v4 = vadd.f32 %v1369_v39, %v1149_v36  ;;  %v4450_v39 = vld [vmem:[#allocation34_spill] sm:$0xff]  ;;  %v2119_v36 = vrot.slane %v3104_v33, 3 }
 0x1a1   : > { %2957 = vmatmul.msk.bf16.gmra.mxu0 %vm482_vm3, %v2118_v60 }
 0x1a2   : > { %4447 = vst [vmem:[#allocation23_spill] sm:$0xff] %v3912_v4  ;;  %2941 = vmatmul.msk.bf16.gmra.mxu3 %vm482_vm3, %v1852_v35 }
 0x1a3   : > { %v940_v61 = vpop.f32.mrf.mxu2 }
 0x1a4   : > { %v997_v21 = vadd.f32 %v940_v61, %v747_v63  ;;  %v748_v42 = vpop.f32.mrf.mxu1  ;;  %v1853_v63 = vrot.slane %v4451_v34, 2  ;;  %v4452_v61 = vld [vmem:[#allocation15_spill] sm:$0xff] }
 0x1a5   : > { %v749_v0 = vadd.f32 %v748_v42, %v4450_v39  ;;  %v1103_v60 = vpop.f32.mrf.mxu3  ;;  %v1854_v28 = vrot.slane %v4452_v61, 3 }
 0x1a6   : > { %v1150_v47 = vadd.f32 %v1093_v48, %v997_v21  ;;  %v1374_v56 = vpop.f32.mrf.mxu0  ;;  %v1454_v48 = vsel %vm1445_vm7, %v1451_v20, %v1453_v2 }
 0x1a7   : > { %v1855_v42 = vor.u32 %v1854_v28, %v1853_v63 }
 0x1a8   : > { %v3918_v9 = vadd.f32 %v1372_v62, %v1150_v47  ;;  %v2120_v62 = vsel %vm2113_vm8, %v2117_v17, %v2119_v36 }
 0x1aa   : > { %4449 = vst [vmem:[#allocation39_spill] sm:$0xff] %v3918_v9 }
 0x1ab   : > { %v942_v4 = vpop.f32.mrf.mxu2 }
 0x1ac   : > { %v998_v16 = vadd.f32 %v942_v4, %v749_v0  ;;  %v751_v25 = vpop.f32.mrf.mxu1  ;;  %v4454_v4 = vld [vmem:[#allocation36_spill] sm:$0xff] }
 0x1ad   : > { %v752_v34 = vadd.f32 %v751_v25, %v4454_v4  ;;  %v1105_v47 = vpop.f32.mrf.mxu3 }
 0x1ae   : > { %v1151_v51 = vadd.f32 %v1095_v10, %v998_v16  ;;  %v1377_v21 = vpop.f32.mrf.mxu0  ;;  %v1856_v10 = vsel %vm1833_vm6, %v1851_v3, %v1855_v42  ;;  %v3105_v16 = vld [vmem:[%s3268_s30 + $0x30] sm:$0xff] }
 0x1af   : > { %2904 = vmatmul.msk.bf16.gmra.mxu1 %vm482_vm3, %v1452_v57  ;;  %v1455_v28 = vrot.slane %v3105_v16, 2  ;;  %v2121_v61 = vrot.slane %v3105_v16, 3 }
 0x1b0   : > { %2922 = vmatmul.msk.bf16.gmra.mxu2 %vm482_vm3, %v1454_v48  ;;  %v3928_v35 = vadd.f32 %v1374_v56, %v1151_v51  ;;  %v4456_v56 = vld [vmem:[#allocation38_spill] sm:$0xff] }
 0x1b1   : > { %2958 = vmatmul.msk.bf16.gmra.mxu0 %vm482_vm3, %v2120_v62 }
 0x1b2   : > { %4453 = vst [vmem:[#allocation42_spill] sm:$0xff] %v3928_v35  ;;  %2942 = vmatmul.msk.bf16.gmra.mxu3 %vm482_vm3, %v1856_v10  ;;  %v4457_v35 = vld [vmem:[#allocation27_spill] sm:$0xff] }
 0x1b3   : > { %v945_v33 = vpop.f32.mrf.mxu2 }
 0x1b4   : > { %v999_v39 = vadd.f32 %v945_v33, %v752_v34  ;;  %v753_v20 = vpop.f32.mrf.mxu1  ;;  %v1857_v34 = vrot.slane %v4457_v35, 2  ;;  %v4458_v33 = vld [vmem:[#allocation21_spill] sm:$0xff] }
 0x1b5   : > { %v754_v63 = vadd.f32 %v753_v20, %v4456_v56  ;;  %v1108_v51 = vpop.f32.mrf.mxu3  ;;  %v1858_v9 = vrot.slane %v4458_v33, 3 }
 0x1b6   : > { %v1152_v0 = vadd.f32 %v1098_v26, %v999_v39  ;;  %v1379_v17 = vpop.f32.mrf.mxu0  ;;  %v1456_v26 = vsel %vm1445_vm7, %v1453_v2, %v1455_v28 }
 0x1b7   : > { %v1859_v20 = vor.u32 %v1858_v9, %v1857_v34 }
 0x1b8   : > { %v3934_v57 = vadd.f32 %v1377_v21, %v1152_v0  ;;  %v2122_v21 = vsel %vm2113_vm8, %v2119_v36, %v2121_v61  ;;  %v4460_v0 = vld [vmem:[#allocation41_spill] sm:$0xff] }
 0x1ba   : > { %4455 = vst [vmem:[#allocation25_spill] sm:$0xff] %v3934_v57 }
 0x1bb   : > { %v947_v62 = vpop.f32.mrf.mxu2 }
 0x1bc   : > { %v1000_v25 = vadd.f32 %v947_v62, %v754_v63  ;;  %v756_v4 = vpop.f32.mrf.mxu1 }
 0x1bd   : > { %v757_v35 = vadd.f32 %v756_v4, %v4460_v0  ;;  %v1110_v16 = vpop.f32.mrf.mxu3 }
 0x1be   : > { %v1153_v3 = vadd.f32 %v1100_v30, %v1000_v25  ;;  %v1382_v39 = vpop.f32.mrf.mxu0  ;;  %v1860_v30 = vsel %vm1833_vm6, %v1855_v42, %v1859_v20  ;;  %v3106_v25 = vld [vmem:[%s3268_s30 + $0x38] sm:$0xff] }
 0x1bf   : > { %2905 = vmatmul.msk.bf16.gmra.mxu1 %vm482_vm3, %v1454_v48  ;;  %v1457_v9 = vrot.slane %v3106_v25, 2  ;;  %v2123_v33 = vrot.slane %v3106_v25, 3 }
 0x1c0   : > { %2923 = vmatmul.msk.bf16.gmra.mxu2 %vm482_vm3, %v1456_v26  ;;  %v3944_v10 = vadd.f32 %v1379_v17, %v1153_v3  ;;  %v4462_v17 = vld [vmem:[#allocation43_spill] sm:$0xff] }
 0x1c1   : > { %2959 = vmatmul.msk.bf16.gmra.mxu0 %vm482_vm3, %v2122_v21 }
 0x1c2   : > { %4459 = vst [vmem:[#allocation24_spill] sm:$0xff] %v3944_v10  ;;  %2943 = vmatmul.msk.bf16.gmra.mxu3 %vm482_vm3, %v1860_v30  ;;  %v4463_v10 = vld [vmem:[#allocation18_spill] sm:$0xff] }
 0x1c3   : > { %v950_v56 = vpop.f32.mrf.mxu2 }
 0x1c4   : > { %v1001_v63 = vadd.f32 %v950_v56, %v757_v35  ;;  %v758_v2 = vpop.f32.mrf.mxu1  ;;  %v1861_v35 = vrot.slane %v4463_v10, 2  ;;  %v4464_v56 = vld [vmem:[#allocation17_spill] sm:$0xff] }
 0x1c5   : > { %v759_v34 = vadd.f32 %v758_v2, %v4462_v17  ;;  %v1113_v3 = vpop.f32.mrf.mxu3  ;;  %v1862_v57 = vrot.slane %v4464_v56, 3 }
 0x1c6   : > { %v1154_v62 = vadd.f32 %v1103_v60, %v1001_v63  ;;  %v1384_v36 = vpop.f32.mrf.mxu0  ;;  %v1458_v60 = vsel %vm1445_vm7, %v1455_v28, %v1457_v9 }
 0x1c7   : > { %v1863_v2 = vor.u32 %v1862_v57, %v1861_v35 }
 0x1c8   : > { %v3950_v48 = vadd.f32 %v1382_v39, %v1154_v62  ;;  %v2124_v39 = vsel %vm2113_vm8, %v2121_v61, %v2123_v33  ;;  %v4466_v62 = vld [vmem:[#allocation45_spill] sm:$0xff] }
 0x1ca   : > { %4461 = vst [vmem:[#allocation44_spill] sm:$0xff] %v3950_v48 }
 0x1cb   : > { %v952_v21 = vpop.f32.mrf.mxu2 }
 0x1cc   : > { %v1002_v4 = vadd.f32 %v952_v21, %v759_v34  ;;  %v761_v0 = vpop.f32.mrf.mxu1 }
 0x1cd   : > { %v762_v10 = vadd.f32 %v761_v0, %v4466_v62  ;;  %v1115_v25 = vpop.f32.mrf.mxu3 }
 0x1ce   : > { %v1155_v42 = vadd.f32 %v1105_v47, %v1002_v4  ;;  %v1387_v63 = vpop.f32.mrf.mxu0  ;;  %v1864_v47 = vsel %vm1833_vm6, %v1859_v20, %v1863_v2  ;;  %v3107_v4 = vld [vmem:[%s3268_s30 + $0x40] sm:$0xff] }
 0x1cf   : > { %2906 = vmatmul.msk.bf16.gmra.mxu1 %vm482_vm3, %v1456_v26  ;;  %v1459_v57 = vrot.slane %v3107_v4, 2  ;;  %v2125_v56 = vrot.slane %v3107_v4, 3 }
 0x1d0   : > { %2924 = vmatmul.msk.bf16.gmra.mxu2 %vm482_vm3, %v1458_v60  ;;  %v3960_v30 = vadd.f32 %v1384_v36, %v1155_v42  ;;  %v4467_v36 = vld [vmem:[#allocation47_spill] sm:$0xff] }
 0x1d1   : > { %2960 = vmatmul.msk.bf16.gmra.mxu0 %vm482_vm3, %v2124_v39 }
 0x1d2   : > { %4465 = vst [vmem:[#allocation13_spill] sm:$0xff] %v3960_v30  ;;  %2944 = vmatmul.msk.bf16.gmra.mxu3 %vm482_vm3, %v1864_v47  ;;  %v4468_v30 = vld [vmem:[#allocation12_spill] sm:$0xff] }
 0x1d3   : > { %v955_v17 = vpop.f32.mrf.mxu2 }
 0x1d4   : > { %v1003_v34 = vadd.f32 %v955_v17, %v762_v10  ;;  %v763_v28 = vpop.f32.mrf.mxu1  ;;  %v1865_v10 = vrot.slane %v4468_v30, 2  ;;  %v4469_v17 = vld [vmem:[#allocation11_spill] sm:$0xff] }
 0x1d5   : > { %v764_v35 = vadd.f32 %v763_v28, %v4467_v36  ;;  %v1118_v42 = vpop.f32.mrf.mxu3  ;;  %v1866_v48 = vrot.slane %v4469_v17, 3 }
 0x1d6   : > { %v1156_v21 = vadd.f32 %v1108_v51, %v1003_v34  ;;  %v1389_v61 = vpop.f32.mrf.mxu0  ;;  %v1460_v51 = vsel %vm1445_vm7, %v1457_v9, %v1459_v57 }
 0x1d7   : > { %v1867_v28 = vor.u32 %v1866_v48, %v1865_v10 }
 0x1d8   : > { %v3966_v26 = vadd.f32 %v1387_v63, %v1156_v21  ;;  %v2126_v63 = vsel %vm2113_vm8, %v2123_v33, %v2125_v56  ;;  %v4470_v21 = vld [vmem:[#allocation29_spill] sm:$0xff] }
 0x1db   : > { %v957_v39 = vpop.f32.mrf.mxu2 }
 0x1dc   : > { %v1004_v0 = vadd.f32 %v957_v39, %v764_v35  ;;  %v766_v62 = vpop.f32.mrf.mxu1 }
 0x1dd   : > { %v767_v30 = vadd.f32 %v766_v62, %v4470_v21  ;;  %v1120_v4 = vpop.f32.mrf.mxu3 }
 0x1de   : > { %v1157_v20 = vadd.f32 %v1110_v16, %v1004_v0  ;;  %v1392_v34 = vpop.f32.mrf.mxu0  ;;  %v1868_v16 = vsel %vm1833_vm6, %v1863_v2, %v1867_v28  ;;  %v3108_v0 = vld [vmem:[%s3268_s30 + $0x48] sm:$0xff] }
 0x1df   : > { %2907 = vmatmul.msk.bf16.gmra.mxu1 %vm482_vm3, %v1458_v60  ;;  %v1461_v48 = vrot.slane %v3108_v0, 2  ;;  %v2127_v17 = vrot.slane %v3108_v0, 3 }
 0x1e0   : > { %2925 = vmatmul.msk.bf16.gmra.mxu2 %vm482_vm3, %v1460_v51  ;;  %v3976_v47 = vadd.f32 %v1389_v61, %v1157_v20  ;;  %v4471_v61 = vld [vmem:[#allocation31_spill] sm:$0xff] }
 0x1e1   : > { %2961 = vmatmul.msk.bf16.gmra.mxu0 %vm482_vm3, %v2126_v63 }
 0x1e2   : > { %2945 = vmatmul.msk.bf16.gmra.mxu3 %vm482_vm3, %v1868_v16 }
 0x1e3   : > { %v960_v36 = vpop.f32.mrf.mxu2 }
 0x1e4   : > { %v1005_v35 = vadd.f32 %v960_v36, %v767_v30  ;;  %v768_v9 = vpop.f32.mrf.mxu1  ;;  %v1869_v30 = vrot.slane %v3367_v52, 2  ;;  %v1870_v36 = vrot.slane %v3306_v18, 3 }
 0x1e5   : > { %v769_v10 = vadd.f32 %v768_v9, %v4471_v61  ;;  %v1123_v20 = vpop.f32.mrf.mxu3 }
 0x1e6   : > { %v1158_v39 = vadd.f32 %v1113_v3, %v1005_v35  ;;  %v1394_v33 = vpop.f32.mrf.mxu0  ;;  %v1462_v3 = vsel %vm1445_vm7, %v1459_v57, %v1461_v48  ;;  %v1871_v9 = vor.u32 %v1870_v36, %v1869_v30 }
 0x1e8   : > { %v3982_v60 = vadd.f32 %v1392_v34, %v1158_v39  ;;  %v2128_v34 = vsel %vm2113_vm8, %v2125_v56, %v2127_v17  ;;  %v4472_v39 = vld [vmem:[#allocation33_spill] sm:$0xff] }
 0x1eb   : > { %v962_v63 = vpop.f32.mrf.mxu2 }
 0x1ec   : > { %v1006_v62 = vadd.f32 %v962_v63, %v769_v10  ;;  %v771_v21 = vpop.f32.mrf.mxu1  ;;  %v3109_v63 = vld [vmem:[%s3268_s30 + $0x50] sm:$0xff] }
 0x1ed   : > { %v772_v52 = vadd.f32 %v771_v21, %v4472_v39  ;;  %v1125_v0 = vpop.f32.mrf.mxu3  ;;  %v2129_v36 = vrot.slane %v3109_v63, 3 }
 0x1ee   : > { %v1159_v2 = vadd.f32 %v1115_v25, %v1006_v62  ;;  %v1397_v35 = vpop.f32.mrf.mxu0  ;;  %v1872_v25 = vsel %vm1833_vm6, %v1867_v28, %v1871_v9  ;;  %v1463_v62 = vrot.slane %v3109_v63, 2 }
 0x1ef   : > { %2908 = vmatmul.msk.bf16.gmra.mxu1 %vm482_vm3, %v1460_v51 }
 0x1f0   : > { %2926 = vmatmul.msk.bf16.gmra.mxu2 %vm482_vm3, %v1462_v3  ;;  %v3992_v16 = vadd.f32 %v1394_v33, %v1159_v2  ;;  %v4473_v33 = vld [vmem:[#allocation35_spill] sm:$0xff] }
 0x1f1   : > { %2962 = vmatmul.msk.bf16.gmra.mxu0 %vm482_vm3, %v2128_v34 }
 0x1f2   : > { %2946 = vmatmul.msk.bf16.gmra.mxu3 %vm482_vm3, %v1872_v25 }
 0x1f3   : > { %v965_v18 = vpop.f32.mrf.mxu2 }
 0x1f4   : > { %v1007_v61 = vadd.f32 %v965_v18, %v772_v52  ;;  %v773_v57 = vpop.f32.mrf.mxu1  ;;  %v1873_v52 = vrot.slane %v3431_v37, 2  ;;  %v1874_v18 = vrot.slane %v3370_v53, 3 }
 0x1f5   : > { %v774_v30 = vadd.f32 %v773_v57, %v4473_v33  ;;  %v1985_v2 = vpop.f32.mrf.mxu3 }
 0x1f6   : > { %v1160_v10 = vadd.f32 %v1118_v42, %v1007_v61  ;;  %v1399_v56 = vpop.f32.mrf.mxu0  ;;  %v1464_v42 = vsel %vm1445_vm7, %v1461_v48, %v1463_v62  ;;  %v1875_v57 = vor.u32 %v1874_v18, %v1873_v52 }
 0x1f8   : > { %v3998_v51 = vadd.f32 %v1397_v35, %v1160_v10  ;;  %v2130_v35 = vsel %vm2113_vm8, %v2127_v17, %v2129_v36  ;;  %v4474_v10 = vld [vmem:[#allocation37_spill] sm:$0xff] }
 0x1fb   : > { %v967_v34 = vpop.f32.mrf.mxu2 }
 0x1fc   : > { %v1008_v21 = vadd.f32 %v967_v34, %v774_v30  ;;  %v776_v39 = vpop.f32.mrf.mxu1  ;;  %v3110_v34 = vld [vmem:[%s3268_s30 + $0x58] sm:$0xff] }
 0x1fd   : > { %v777_v37 = vadd.f32 %v776_v39, %v4474_v10  ;;  %v1987_v63 = vpop.f32.mrf.mxu3  ;;  %v2131_v18 = vrot.slane %v3110_v34, 3 }
 0x1fe   : > { %v1161_v28 = vadd.f32 %v1120_v4, %v1008_v21  ;;  %v1402_v61 = vpop.f32.mrf.mxu0  ;;  %v1876_v4 = vsel %vm1833_vm6, %v1871_v9, %v1875_v57  ;;  %v1465_v21 = vrot.slane %v3110_v34, 2 }
 0x1ff   : > { %2909 = vmatmul.msk.bf16.gmra.mxu1 %vm482_vm3, %v1462_v3 }
 0x200   : > { %2927 = vmatmul.msk.bf16.gmra.mxu2 %vm482_vm3, %v1464_v42  ;;  %v4008_v25 = vadd.f32 %v1399_v56, %v1161_v28  ;;  %v4475_v56 = vld [vmem:[#allocation40_spill] sm:$0xff] }
 0x201   : > { %2963 = vmatmul.msk.bf16.gmra.mxu0 %vm482_vm3, %v2130_v35 }
 0x202   : > { %2947 = vmatmul.msk.bf16.gmra.mxu3 %vm482_vm3, %v1876_v4 }
 0x203   : > { %v970_v53 = vpop.f32.mrf.mxu2 }
 0x204   : > { %v1009_v33 = vadd.f32 %v970_v53, %v777_v37  ;;  %v778_v48 = vpop.f32.mrf.mxu1  ;;  %v1877_v37 = vrot.slane %v3483_v13, 2  ;;  %v1878_v53 = vrot.slane %v3434_v38, 3 }
 0x205   : > { %v779_v52 = vadd.f32 %v778_v48, %v4475_v56  ;;  %v1990_v28 = vpop.f32.mrf.mxu3 }
 0x206   : > { %v1162_v30 = vadd.f32 %v1123_v20, %v1009_v33  ;;  %v1404_v17 = vpop.f32.mrf.mxu0  ;;  %v1466_v20 = vsel %vm1445_vm7, %v1463_v62, %v1465_v21  ;;  %v1879_v48 = vor.u32 %v1878_v53, %v1877_v37 }
 0x208   : > { %v4014_v3 = vadd.f32 %v1402_v61, %v1162_v30  ;;  %v2132_v61 = vsel %vm2113_vm8, %v2129_v36, %v2131_v18 }
 0x20b   : > { %v972_v35 = vpop.f32.mrf.mxu2 }
 0x20c   : > { %v1010_v39 = vadd.f32 %v972_v35, %v779_v52  ;;  %v1549_v10 = vpop.f32.mrf.mxu1 }
 0x20d   : > { %v1639_v13 = vadd.f32 %v1549_v10, %v3700_v50  ;;  %v1992_v30 = vpop.f32.mrf.mxu3  ;;  %v4034_v50 = vld [vmem:[#allocation4] ss:$0 sm:$0xff] }
 0x20e   : > { %v1163_v9 = vadd.f32 %v1125_v0, %v1010_v39  ;;  %v2217_v33 = vpop.f32.mrf.mxu0  ;;  %v1880_v0 = vsel %vm1833_vm6, %v1875_v57, %v1879_v48  ;;  %v1881_v57 = vrot.slane %v3510_v1, 2 }
 0x20f   : > { %2910 = vmatmul.msk.bf16.gmra.mxu1 %vm482_vm3, %v1464_v42  ;;  %v3111_v42 = vld [vmem:[%s3268_s30 + $0x60] sm:$0xff] }
 0x210   : > { %2928 = vmatmul.msk.bf16.gmra.mxu2 %vm482_vm3, %v1466_v20  ;;  %v4024_v4 = vadd.f32 %v1404_v17, %v1163_v9  ;;  %v1467_v52 = vrot.slane %v3111_v42, 2  ;;  %v2133_v17 = vrot.slane %v3111_v42, 3 }
 0x211   : > { %2964 = vmatmul.msk.bf16.gmra.mxu0 %vm482_vm3, %v2132_v61  ;;  %v1882_v61 = vrot.slane %v3486_v27, 3 }
 0x212   : > { %2948 = vmatmul.msk.bf16.gmra.mxu3 %vm482_vm3, %v1880_v0 }
 0x213   : > { %v1705_v38 = vpop.f32.mrf.mxu2 }
 0x214   : > { %v1795_v34 = vadd.f32 %v1705_v38, %v1639_v13  ;;  %v1551_v62 = vpop.f32.mrf.mxu1 }
 0x215   : > { %v1640_v35 = vadd.f32 %v1551_v62, %v3708_v23  ;;  %v4032_v39 = vpop.f32.mrf.mxu3  ;;  %v2134_v23 = vsel %vm2113_vm8, %v2131_v18, %v2133_v17  ;;  %v1883_v62 = vor.u32 %v1882_v61, %v1881_v57 }
 0x216   : > { %v2219_v56 = vpop.f32.mrf.mxu0  ;;  %v2075_v36 = vadd.f32 %v1985_v2, %v1795_v34  ;;  %v1468_v2 = vsel %vm1445_vm7, %v1465_v21, %v1467_v52 }
 0x218   : > { %v2307_v53 = vadd.f32 %v2217_v33, %v2075_v36 }
 0x21a   : > { %v2347_v34 = vadd.f32 %v4034_v50, %v2307_v53  ;;  %v3112_v53 = vld [vmem:[%s3268_s30 + $0x68] sm:$0xff] }
 0x21b   : > { %v1707_v37 = vpop.f32.mrf.mxu2  ;;  %v2135_v57 = vrot.slane %v3112_v53, 3 }
 0x21c   : > { %v1796_v10 = vadd.f32 %v1707_v37, %v1640_v35  ;;  %v1554_v9 = vpop.f32.mrf.mxu1  ;;  %v2383_v18 = vmax.f32 %v2347_v34, 0.0 }
 0x21d   : > { %v1641_v27 = vadd.f32 %v1554_v9, %v3719_v14 }
 0x21e   : > { %v2076_v13 = vadd.f32 %v1987_v63, %v1796_v10  ;;  %v2222_v38 = vpop.f32.mrf.mxu0  ;;  %v4047_v63 = vpop.f32.mrf.mxu3  ;;  %v1469_v10 = vrot.slane %v3112_v53, 2 }
 0x21f   : > { %2911 = vmatmul.msk.bf16.gmra.mxu1 %vm482_vm3, %v1466_v20 }
 0x220   : > { %v2308_v33 = vadd.f32 %v2219_v56, %v2076_v13  ;;  %2929 = vmatmul.msk.bf16.gmra.mxu2 %vm482_vm3, %v1468_v2  ;;  %v1884_v56 = vsel %vm1833_vm6, %v1879_v48, %v1883_v62 }
 0x221   : > { %2965 = vmatmul.msk.bf16.gmra.mxu0 %vm482_vm3, %v2134_v23 }
 0x222   : > { %v2348_v1 = vadd.f32 %v4034_v50, %v2308_v33  ;;  %2949 = vmatmul.msk.bf16.gmra.mxu3 %vm482_vm3, %v1884_v56  ;;  %v1885_v33 = vrot.slane %v3347_v43, 2 }
 0x223   : > { %v1710_v21 = vpop.f32.mrf.mxu2 }
 0x224   : > { %v2384_v0 = vmax.f32 %v2348_v1, 0.0  ;;  %v1797_v20 = vadd.f32 %v1710_v21, %v1641_v27  ;;  %v1556_v36 = vpop.f32.mrf.mxu1  ;;  %v1470_v1 = vsel %vm1445_vm7, %v1467_v52, %v1469_v10  ;;  %v2136_v21 = vsel %vm2113_vm8, %v2133_v17, %v2135_v57 }
 0x225   : > { %v1642_v9 = vadd.f32 %v1556_v36, %v3728_v58 }
 0x226   : > { %v3045_v42 = vpack.c.bf16 %v2384_v0, %v2383_v18  ;;  %v2077_v35 = vadd.f32 %v1990_v28, %v1797_v20  ;;  %v2224_v37 = vpop.f32.mrf.mxu0  ;;  %v4059_v61 = vpop.f32.mrf.mxu3  ;;  %v1886_v28 = vrot.slane %v3340_v41, 3 }
 0x228   : > { %3046 = vst [vmem:[%s4053_s7] sm:$0xff] %v3045_v42   ;;  %v2309_v14 = vadd.f32 %v2222_v38, %v2077_v35  ;;  %v1887_v0 = vor.u32 %v1886_v28, %v1885_v33 }
 0x22a   : > { %v2349_v13 = vadd.f32 %v4034_v50, %v2309_v14  ;;  %v1888_v56 = vsel %vm1833_vm6, %v1883_v62, %v1887_v0 }
 0x22b   : > { %v1712_v48 = vpop.f32.mrf.mxu2 }
 0x22c   : > { %v1798_v23 = vadd.f32 %v1712_v48, %v1642_v9  ;;  %v1559_v34 = vpop.f32.mrf.mxu1  ;;  %v2385_v58 = vmax.f32 %v2349_v13, 0.0  ;;  %v4081_v48 = vld [vmem:[%s3268_s30 + $0x70] sm:$0xff] }
 0x22d   : > { %v1643_v43 = vadd.f32 %v1559_v34, %v3739_v59  ;;  %v1471_v13 = vrot.slane %v4081_v48, 2  ;;  %v2137_v34 = vrot.slane %v4081_v48, 3 }
 0x22e   : > { %v2078_v27 = vadd.f32 %v1992_v30, %v1798_v23  ;;  %v2227_v38 = vpop.f32.mrf.mxu0  ;;  %v4071_v41 = vpop.f32.mrf.mxu3  ;;  %v2423_v52 = vpack.c.bf16 %v2385_v58, %v2385_v58  ;;  %v1889_v58 = vrot.slane %v3394_v6, 2 }
 0x22f   : > { %2912 = vmatmul.msk.bf16.gmra.mxu1 %vm482_vm3, %v1468_v2 }
 0x230   : > { %v2310_v18 = vadd.f32 %v2224_v37, %v2078_v27  ;;  %2930 = vmatmul.msk.bf16.gmra.mxu2 %vm482_vm3, %v1470_v1  ;;  %v2974_v59 = vrot.slane %v2423_v52, 9  ;;  %v2138_v52 = vsel %vm2113_vm8, %v2135_v57, %v2137_v34 }
 0x231   : > { %2966 = vmatmul.msk.bf16.gmra.mxu0 %vm482_vm3, %v2136_v21 }
 0x232   : > { %v2350_v20 = vadd.f32 %v4034_v50, %v2310_v18  ;;  %2950 = vmatmul.msk.bf16.gmra.mxu3 %vm482_vm3, %v1888_v56  ;;  %v1890_v18 = vrot.slane %v3350_v44, 3 }
 0x233   : > { %v1715_v30 = vpop.f32.mrf.mxu2 }
 0x234   : > { %v2386_v17 = vmax.f32 %v2350_v20, 0.0  ;;  %v1799_v2 = vadd.f32 %v1715_v30, %v1643_v43  ;;  %v1561_v36 = vpop.f32.mrf.mxu1  ;;  %v1472_v20 = vsel %vm1445_vm7, %v1469_v10, %v1471_v13  ;;  %v1891_v56 = vor.u32 %v1890_v18, %v1889_v58 }
 0x236   : > { %v2424_v42 = vpack.c.bf16 %v2386_v17, %v2386_v17  ;;  %v2079_v35 = vadd.f32 %v4032_v39, %v1799_v2  ;;  %v2229_v37 = vpop.f32.mrf.mxu0  ;;  %v1644_v39 = vadd.f32 %v1561_v36, %v3748_v49  ;;  %v4089_v33 = vpop.f32.mrf.mxu3 }
 0x238   : > { %v2434_v53 = vrot.slane %v2424_v42, 5  ;;  %v2311_v9 = vadd.f32 %v2227_v38, %v2079_v35 }
 0x23a   : > { %v2435_v62 = vsel %vm4075_vm11, %v2974_v59, %v2434_v53  ;;  %v2351_v23 = vadd.f32 %v4034_v50, %v2311_v9  ;;  %v2436_v17 = vrot.slane %v2434_v53, 4 }
 0x23b   : > { %2975 = vst [vmem:[%s4053_s7 + $0x8] sm:$0xf] %v2435_v62  ;;  %v1717_v28 = vpop.f32.mrf.mxu2 }
 0x23c   : > { %v2387_v27 = vmax.f32 %v2351_v23, 0.0  ;;  %v1800_v21 = vadd.f32 %v1717_v28, %v1644_v39  ;;  %v1564_v38 = vpop.f32.mrf.mxu1  ;;  %v4116_v39 = vld [vmem:[%s3268_s30 + $0x78] sm:$0xff] }
 0x23d   : > { %v1473_v28 = vrot.slane %v4116_v39, 2 }
 0x23e   : > { %v2425_v43 = vpack.c.bf16 %v2387_v27, %v2387_v27  ;;  %v2080_v30 = vadd.f32 %v4047_v63, %v1800_v21  ;;  %v2232_v49 = vpop.f32.mrf.mxu0  ;;  %v1645_v63 = vadd.f32 %v1564_v38, %v3759_v7  ;;  %v4104_v10 = vpop.f32.mrf.mxu3  ;;  %v2139_v21 = vrot.slane %v4116_v39, 3  ;;  %v3115_v39 = vld [vmem:[%s3268_s30 + $0x80] sm:$0xff] }
 0x23f   : > { %2913 = vmatmul.msk.bf16.gmra.mxu1 %vm482_vm3, %v1470_v1 }
 0x240   : > { %v2437_v2 = vrot.slane %v2425_v43, 5  ;;  %v2312_v36 = vadd.f32 %v2229_v37, %v2080_v30  ;;  %2931 = vmatmul.msk.bf16.gmra.mxu2 %vm482_vm3, %v1472_v20  ;;  %v1892_v37 = vsel %vm1833_vm6, %v1887_v0, %v1891_v56  ;;  %v2977_v7 = vrot.slane %v2425_v43, 10 }
 0x241   : > { %2967 = vmatmul.msk.bf16.gmra.mxu0 %vm482_vm3, %v2138_v52  ;;  %v1894_v52 = vrot.slane %v4428_v31, 3 }
 0x242   : > { %v2438_v44 = vsel %vm4075_vm11, %v2436_v17, %v2437_v2  ;;  %v2352_v6 = vadd.f32 %v4034_v50, %v2312_v36  ;;  %2951 = vmatmul.msk.bf16.gmra.mxu3 %vm482_vm3, %v1892_v37  ;;  %v1474_v17 = vsel %vm1445_vm7, %v1471_v13, %v1473_v28 }
 0x243   : > { %2976 = vst [vmem:[%s4053_s7 + $0xc] sm:$0xf] %v2438_v44  ;;  %v1720_v57 = vpop.f32.mrf.mxu2  ;;  %v2140_v44 = vsel %vm2113_vm8, %v2137_v34, %v2139_v21 }
 0x244   : > { %v2388_v1 = vmax.f32 %v2352_v6, 0.0  ;;  %v1801_v42 = vadd.f32 %v1720_v57, %v1645_v63  ;;  %v1566_v35 = vpop.f32.mrf.mxu1 }
 0x245   : > { %v1646_v27 = vadd.f32 %v1566_v35, %v3768_v5 }
 0x246   : > { %v2444_v59 = vpack.c.bf16 %v2388_v1, %v2388_v1  ;;  %v2081_v53 = vadd.f32 %v4059_v61, %v1801_v42  ;;  %v2234_v9 = vpop.f32.mrf.mxu0  ;;  %v4124_v38 = vpop.f32.mrf.mxu3 }
 0x248   : > { %v2453_v62 = vrot.slane %v2444_v59, 6  ;;  %v2313_v23 = vadd.f32 %v2232_v49, %v2081_v53  ;;  %v1893_v49 = vrot.slane %v4427_v29, 2 }
 0x24a   : > { %v2454_v0 = vsel %vm4110_vm13, %v2977_v7, %v2453_v62  ;;  %v2353_v61 = vadd.f32 %v4034_v50, %v2313_v23  ;;  %v2455_v6 = vrot.slane %v2453_v62, 4  ;;  %v1895_v1 = vor.u32 %v1894_v52, %v1893_v49 }
 0x24b   : > { %2978 = vst [vmem:[%s4053_s7 + $0x10] sm:$0xf] %v2454_v0  ;;  %v1722_v58 = vpop.f32.mrf.mxu2  ;;  %v1475_v0 = vrot.slane %v3115_v39, 2  ;;  %v4482_v52 = vshrl.u32 %v3806_v45, 16 }
 0x24c   : > { %v2389_v18 = vmax.f32 %v2353_v61, 0.0  ;;  %v1802_v43 = vadd.f32 %v1722_v58, %v1646_v27  ;;  %v1569_v30 = vpop.f32.mrf.mxu1  ;;  %v1896_v37 = vsel %vm1833_vm6, %v1891_v56, %v1895_v1  ;;  %v2141_v27 = vrot.slane %v3115_v39, 3 }
 0x24e   : > { %v2445_v2 = vpack.c.bf16 %v2389_v18, %v2389_v18  ;;  %v2082_v36 = vadd.f32 %v4071_v41, %v1802_v43  ;;  %v2237_v5 = vpop.f32.mrf.mxu0  ;;  %v1647_v41 = vadd.f32 %v1569_v30, %v3779_v8  ;;  %v4139_v13 = vpop.f32.mrf.mxu3 }
 0x24f   : > { %2914 = vmatmul.msk.bf16.gmra.mxu1 %vm482_vm3, %v1472_v20 }
 0x250   : > { %v2456_v63 = vrot.slane %v2445_v2, 6  ;;  %v2314_v57 = vadd.f32 %v2234_v9, %v2082_v36  ;;  %2932 = vmatmul.msk.bf16.gmra.mxu2 %vm482_vm3, %v1474_v17  ;;  %v2980_v8 = vrot.slane %v2445_v2, 11  ;;  %v1897_v2 = vrot.slane %v4482_v52, 2 }
 0x251   : > { %2968 = vmatmul.msk.bf16.gmra.mxu0 %vm482_vm3, %v2140_v44  ;;  %v4483_v36 = vshll.u32 %v3806_v45, 16  ;;  %v1476_v44 = vsel %vm1445_vm7, %v1473_v28, %v1475_v0 }
 0x252   : > { %v2457_v29 = vsel %vm4110_vm13, %v2455_v6, %v2456_v63  ;;  %v2354_v31 = vadd.f32 %v4034_v50, %v2314_v57  ;;  %2952 = vmatmul.msk.bf16.gmra.mxu3 %vm482_vm3, %v1896_v37 }
 0x253   : > { %2979 = vst [vmem:[%s4053_s7 + $0x14] sm:$0xf] %v2457_v29  ;;  %v1725_v34 = vpop.f32.mrf.mxu2 }
 0x254   : > { %v2390_v20 = vmax.f32 %v2354_v31, 0.0  ;;  %v1803_v42 = vadd.f32 %v1725_v34, %v1647_v41  ;;  %v1571_v35 = vpop.f32.mrf.mxu1 }
 0x256   : > { %v2463_v59 = vpack.c.bf16 %v2390_v20, %v2390_v20  ;;  %v2083_v53 = vadd.f32 %v4089_v33, %v1803_v42  ;;  %v2239_v9 = vpop.f32.mrf.mxu0  ;;  %v1648_v33 = vadd.f32 %v1571_v35, %v3790_v40  ;;  %v4155_v58 = vpop.f32.mrf.mxu3  ;;  %v2142_v40 = vsel %vm2113_vm8, %v2139_v21, %v2141_v27 }
 0x258   : > { %v2472_v62 = vrot.slane %v2463_v59, 7  ;;  %v2315_v23 = vadd.f32 %v2237_v5, %v2083_v53  ;;  %v1898_v5 = vrot.slane %v4483_v36, 3 }
 0x25a   : > { %v2473_v56 = vsel %vm4145_vm15, %v2980_v8, %v2472_v62  ;;  %v2355_v61 = vadd.f32 %v4034_v50, %v2315_v23  ;;  %v2474_v29 = vrot.slane %v2472_v62, 4  ;;  %v1899_v41 = vor.u32 %v1898_v5, %v1897_v2  ;;  %v4179_v8 = vld [vmem:[%s3268_s30 + $0x98] sm:$0xff]  }
 0x25b   : > { %2981 = vst [vmem:[%s4053_s7 + $0x18] sm:$0xf] %v2473_v56  ;;  %v1727_v18 = vpop.f32.mrf.mxu2  ;;  %v1905_v62 = vshll.u32 %v4179_v8, 16 }
 0x25c   : > { %v2391_v43 = vmax.f32 %v2355_v61, 0.0  ;;  %v1804_v30 = vadd.f32 %v1727_v18, %v1648_v33  ;;  %v1574_v49 = vpop.f32.mrf.mxu1  ;;  %v1900_v42 = vsel %vm1833_vm6, %v1895_v1, %v1899_v41 }
 0x25d   : > { %v1649_v28 = vadd.f32 %v1574_v49, %v3802_v12  ;;  %v1902_v12 = vshrl.u32 %v4179_v8, 16  ;;  %v1907_v52 = vrot.slane %v1905_v62, 3 }
 0x25e   : > { %v2464_v6 = vpack.c.bf16 %v2391_v43, %v2391_v43  ;;  %v2242_v63 = vpop.f32.mrf.mxu0  ;;  %v2084_v57 = vadd.f32 %v4104_v10, %v1804_v30  ;;  %v4171_v34 = vpop.f32.mrf.mxu3 }
 0x25f   : > { %2915 = vmatmul.msk.bf16.gmra.mxu1 %vm482_vm3, %v1474_v17  ;;  %v1904_v49 = vrot.slane %v1902_v12, 2 }
 0x260   : > { %v2475_v31 = vrot.slane %v2464_v6, 7  ;;  %2933 = vmatmul.msk.bf16.gmra.mxu2 %vm482_vm3, %v1476_v44  ;;  %v2316_v10 = vadd.f32 %v2239_v9, %v2084_v57  ;;  %v3117_v9 = vld [vmem:[%s3268_s30 + $0x88] sm:$0xff] }
 0x261   : > { %2969 = vmatmul.msk.bf16.gmra.mxu0 %vm482_vm3, %v2142_v40  ;;  %v1477_v23 = vrot.slane %v3117_v9, 2 }
 0x262   : > { %v2476_v45 = vsel %vm4145_vm15, %v2474_v29, %v2475_v31  ;;  %v2356_v59 = vadd.f32 %v4034_v50, %v2316_v10  ;;  %2953 = vmatmul.msk.bf16.gmra.mxu3 %vm482_vm3, %v1900_v42  ;;  %v1908_v29 = vor.u32 %v1907_v52, %v1904_v49 }
 0x263   : > { %2982 = vst [vmem:[%s4053_s7 + $0x1c] sm:$0xf] %v2476_v45  ;;  %v1730_v21 = vpop.f32.mrf.mxu2  ;;  %v1478_v2 = vsel %vm1445_vm7, %v1475_v0, %v1477_v23 }
 0x264   : > { %v1805_v17 = vadd.f32 %v1730_v21, %v1649_v28  ;;  %v1576_v20 = vpop.f32.mrf.mxu1  ;;  %v2392_v61 = vmax.f32 %v2356_v59, 0.0  ;;  %v1909_v10 = vsel %vm1833_vm6, %v1899_v41, %v1908_v29 }
 0x265   : > { %v1650_v1 = vadd.f32 %v1576_v20, %v3814_v24  ;;  %v244_v24 = vld [vmem:[%s3268_s30 + $0xa0] sm:$0x3] }
 0x266   : > { %v2085_v35 = vadd.f32 %v4124_v38, %v1805_v17  ;;  %v2244_v37 = vpop.f32.mrf.mxu0  ;;  %v2143_v38 = vrot.slane %v3117_v9, 3  ;;  %v4186_v56 = vpop.f32.mrf.mxu3  ;;  %v1680_v40 = vunpack.c.l.b16 %v244_v24 }
 0x268   : > { %v2317_v53 = vadd.f32 %v2242_v63, %v2085_v35  ;;  %v2144_v63 = vsel %vm2113_vm8, %v2141_v27, %v2143_v38  ;;  %v4199_v45 = vpack.c.b16 %v1680_v40, %v1680_v40 }
 0x26a   : > { %v2357_v39 = vadd.f32 %v4034_v50, %v2317_v53  ;;  %v1911_v20 = vshrl.u32 %v4199_v45, 16  ;;  %v1914_v35 = vshll.u32 %v4199_v45, 16 }
 0x26b   : > { %v1732_v33 = vpop.f32.mrf.mxu2 }
 0x26c   : > { %v2393_v18 = vmax.f32 %v2357_v39, 0.0  ;;  %v1806_v43 = vadd.f32 %v1732_v33, %v1650_v1  ;;  %v1579_v30 = vpop.f32.mrf.mxu1  ;;  %v1913_v9 = vrot.slane %v1911_v20, 2 }
 0x26d   : > { %v1651_v0 = vadd.f32 %v1579_v30, %v3823_v11 }
 0x26e   : > { %v3050_v36 = vpack.c.bf16 %v2393_v18, %v2392_v61  ;;  %v2086_v5 = vadd.f32 %v4139_v13, %v1806_v43  ;;  %v2247_v6 = vpop.f32.mrf.mxu0  ;;  %v4197_v31 = vpop.f32.mrf.mxu3  ;;  %v1916_v18 = vrot.slane %v1914_v35, 3 }
 0x26f   : > { %2916 = vmatmul.msk.bf16.gmra.mxu1 %vm482_vm3, %v1476_v44 }
 0x270   : > { %3063 = vst [vmem:[%s4053_s7 + $0x20] sm:$0xff] %v3050_v36   ;;  %v2318_v57 = vadd.f32 %v2244_v37, %v2086_v5  ;;  %2934 = vmatmul.msk.bf16.gmra.mxu2 %vm482_vm3, %v1478_v2  ;;  %v3118_v37 = vld [vmem:[%s3268_s30 + $0x90] sm:$0xff] }
 0x271   : > { %2970 = vmatmul.msk.bf16.gmra.mxu0 %vm482_vm3, %v2144_v63  ;;  %v4208_v59 = vrot.slane %v3118_v37, 2  ;;  %v2145_v62 = vrot.slane %v3118_v37, 3  ;;  %v1917_v63 = vor.u32 %v1916_v18, %v1913_v9 }
 0x272   : > { %v2358_v27 = vadd.f32 %v4034_v50, %v2318_v57  ;;  %2954 = vmatmul.msk.bf16.gmra.mxu3 %vm482_vm3, %v1909_v10 }
 0x273   : > { %v1735_v13 = vpop.f32.mrf.mxu2  ;;  %v1480_v43 = vsel %vm1445_vm7, %v1477_v23, %v4208_v59 }
 0x274   : > { %v1807_v28 = vadd.f32 %v1735_v13, %v1651_v0  ;;  %v1581_v44 = vpop.f32.mrf.mxu1  ;;  %v2394_v42 = vmax.f32 %v2358_v27, 0.0  ;;  %v1918_v13 = vsel %vm1833_vm6, %v1908_v29, %v1917_v63  ;;  %v2147_v29 = vrot.slane %v4179_v8, 3 }
 0x275   : > { %v1652_v12 = vadd.f32 %v1581_v44, %v3831_v15  ;;  %v2146_v15 = vsel %vm2113_vm8, %v2143_v38, %v2145_v62 }
 0x276   : > { %v2087_v21 = vadd.f32 %v4155_v58, %v1807_v28  ;;  %v2249_v17 = vpop.f32.mrf.mxu0  ;;  %v4212_v41 = vpop.f32.mrf.mxu3  ;;  %v2487_v39 = vpack.c.bf16 %v2394_v42, %v2394_v42 }
 0x278   : > { %v2319_v11 = vadd.f32 %v2247_v6, %v2087_v21  ;;  %v2985_v36 = vrot.slane %v2487_v39, 9 }
 0x27a   : > { %v2359_v53 = vadd.f32 %v4034_v50, %v2319_v11 }
 0x27b   : > { %v1737_v58 = vpop.f32.mrf.mxu2 }
 0x27c   : > { %v2395_v1 = vmax.f32 %v2359_v53, 0.0  ;;  %v1808_v61 = vadd.f32 %v1737_v58, %v1652_v12  ;;  %v1584_v33 = vpop.f32.mrf.mxu1 }
 0x27e   : > { %v2488_v30 = vpack.c.bf16 %v2395_v1, %v2395_v1  ;;  %v2088_v49 = vadd.f32 %v4171_v34, %v1808_v61  ;;  %v2252_v52 = vpop.f32.mrf.mxu0  ;;  %v1653_v34 = vadd.f32 %v1584_v33, %v3842_v46  ;;  %v4225_v40 = vpop.f32.mrf.mxu3  ;;  %v1683_v46 = vrot.slane %v4179_v8, 2 }
 0x27f   : > { %2917 = vmatmul.msk.bf16.gmra.mxu1 %vm482_vm3, %v1478_v2  ;;  %v2148_v61 = vsel %vm2113_vm8, %v2145_v62, %v2147_v29 }
 0x280   : > { %v2495_v5 = vrot.slane %v2488_v30, 5  ;;  %v2320_v6 = vadd.f32 %v2249_v17, %v2088_v49  ;;  %2935 = vmatmul.msk.bf16.gmra.mxu2 %vm482_vm3, %v1480_v43  ;;  %v1684_v58 = vsel %vm1445_vm7, %v4208_v59, %v1683_v46 }
 0x281   : > { %2971 = vmatmul.msk.bf16.gmra.mxu0 %vm482_vm3, %v2146_v15 }
 0x282   : > { %v2496_v23 = vsel %vm4075_vm11, %v2985_v36, %v2495_v5  ;;  %v2360_v24 = vadd.f32 %v4034_v50, %v2320_v6  ;;  %2955 = vmatmul.msk.bf16.gmra.mxu3 %vm482_vm3, %v1918_v13  ;;  %v2497_v10 = vrot.slane %v2495_v5, 4 }
 0x283   : > { %2986 = vst [vmem:[%s4053_s7 + $0x28] sm:$0xf] %v2496_v23  ;;  %v1740_v38 = vpop.f32.mrf.mxu2 }
 0x284   : > { %v2396_v2 = vmax.f32 %v2360_v24, 0.0  ;;  %v1809_v57 = vadd.f32 %v1740_v38, %v1653_v34  ;;  %v1586_v0 = vpop.f32.mrf.mxu1  ;;  %v1481_v34 = vrot.slane %v3859_v55, 2  ;;  %v1685_v38 = vrot.slane %v4199_v45, 2 }
 0x285   : > { %v1654_v11 = vadd.f32 %v1586_v0, %v3855_v19  ;;  %v2149_v0 = vrot.slane %v4199_v45, 3 }
 0x286   : > { %v2489_v27 = vpack.c.bf16 %v2396_v2, %v2396_v2  ;;  %v2089_v28 = vadd.f32 %v4186_v56, %v1809_v57  ;;  %v2254_v44 = vpop.f32.mrf.mxu0  ;;  %v4237_v35 = vpop.f32.mrf.mxu3  ;;  %v1482_v55 = vsel %vm1445_vm7, %v4208_v59, %v1481_v34 }
 0x288   : > { %v2498_v21 = vrot.slane %v2489_v27, 5  ;;  %v2321_v17 = vadd.f32 %v2252_v52, %v2089_v28  ;;  %v2988_v19 = vrot.slane %v2489_v27, 10 }
 0x28a   : > { %v2499_v20 = vsel %vm4075_vm11, %v2497_v10, %v2498_v21  ;;  %v2361_v42 = vadd.f32 %v4034_v50, %v2321_v17  ;;  %v1686_v10 = vsel %vm1445_vm7, %v1683_v46, %v1685_v38 }
 0x28b   : > { %2987 = vst [vmem:[%s4053_s7 + $0x2c] sm:$0xf] %v2499_v20  ;;  %v1742_v56 = vpop.f32.mrf.mxu2 }
 0x28c   : > { %v2397_v37 = vmax.f32 %v2361_v42, 0.0  ;;  %v1810_v53 = vadd.f32 %v1742_v56, %v1654_v11  ;;  %v1589_v12 = vpop.f32.mrf.mxu1 }
 0x28d   : > { %v1655_v49 = vadd.f32 %v1589_v12, %v3864_v32 }
 0x28e   : > { %v2505_v9 = vpack.c.bf16 %v2397_v37, %v2397_v37  ;;  %v2090_v39 = vadd.f32 %v4197_v31, %v1810_v53  ;;  %v2257_v1 = vpop.f32.mrf.mxu0  ;;  %v2032_v31 = vpop.f32.mrf.mxu3 }
 0x28f   : > { %2918 = vmatmul.msk.bf16.gmra.mxu1 %vm482_vm3, %v1480_v43 }
 0x290   : > { %v2511_v8 = vrot.slane %v2505_v9, 6  ;;  %v2322_v33 = vadd.f32 %v2254_v44, %v2090_v39  ;;  %2936 = vmatmul.msk.bf16.gmra.mxu2 %vm482_vm3, %v1684_v58 }
 0x291   : > { %2972 = vmatmul.msk.bf16.gmra.mxu0 %vm482_vm3, %v2148_v61 }
 0x292   : > { %v2512_v18 = vsel %vm4110_vm13, %v2988_v19, %v2511_v8  ;;  %v2362_v30 = vadd.f32 %v4034_v50, %v2322_v33  ;;  %v2513_v63 = vrot.slane %v2511_v8, 4  ;;  %v4484_v8 = vld [vmem:[#allocation26_spill] sm:$0xff] }
 0x293   : > { %2989 = vst [vmem:[%s4053_s7 + $0x30] sm:$0xf] %v2512_v18  ;;  %v1745_v52 = vpop.f32.mrf.mxu2 }
 0x294   : > { %v2398_v62 = vmax.f32 %v2362_v30, 0.0  ;;  %v1811_v43 = vadd.f32 %v1745_v52, %v1655_v49  ;;  %v1591_v15 = vpop.f32.mrf.mxu1 }
 0x295   : > { %v1656_v57 = vadd.f32 %v1591_v15, %v3874_v54  ;;  %v2150_v54 = vsel %vm2113_vm8, %v2147_v29, %v2149_v0 }
 0x296   : > { %v2506_v36 = vpack.c.bf16 %v2398_v62, %v2398_v62  ;;  %v2091_v5 = vadd.f32 %v4212_v41, %v1811_v43  ;;  %v2259_v6 = vpop.f32.mrf.mxu0  ;;  %v2035_v13 = vpop.f32.mrf.mxu3 }
 0x298   : > { %v2514_v23 = vrot.slane %v2506_v36, 6  ;;  %v2323_v24 = vadd.f32 %v2257_v1, %v2091_v5  ;;  %v2991_v45 = vrot.slane %v2506_v36, 11 }
 0x29a   : > { %v2515_v32 = vsel %vm4110_vm13, %v2513_v63, %v2514_v23  ;;  %v2363_v2 = vadd.f32 %v4034_v50, %v2323_v24 }
 0x29b   : > { %2990 = vst [vmem:[%s4053_s7 + $0x34] sm:$0xf] %v2515_v32  ;;  %v1747_v41 = vpop.f32.mrf.mxu2 }
 0x29c   : > { %v2399_v27 = vmax.f32 %v2363_v2, 0.0  ;;  %v1812_v28 = vadd.f32 %v1747_v41, %v1656_v57  ;;  %v1594_v44 = vpop.f32.mrf.mxu1 }
 0x29e   : > { %v2521_v21 = vpack.c.bf16 %v2399_v27, %v2399_v27  ;;  %v2092_v17 = vadd.f32 %v4225_v40, %v1812_v28  ;;  %v2262_v20 = vpop.f32.mrf.mxu0  ;;  %v1657_v40 = vadd.f32 %v1594_v44, %v3882_v22  ;;  %v2037_v56 = vpop.f32.mrf.mxu3 }
 0x29f   : > { %2919 = vmatmul.msk.bf16.gmra.mxu1 %vm482_vm3, %v1482_v55 }
 0x2a0   : > { %v2527_v42 = vrot.slane %v2521_v21, 7  ;;  %v2324_v11 = vadd.f32 %v2259_v6, %v2092_v17  ;;  %2937 = vmatmul.msk.bf16.gmra.mxu2 %vm482_vm3, %v1686_v10 }
 0x2a1   : > { %2973 = vmatmul.msk.bf16.gmra.mxu0 %vm482_vm3, %v2150_v54 }
 0x2a2   : > { %v2528_v59 = vsel %vm4145_vm15, %v2991_v45, %v2527_v42  ;;  %v2364_v46 = vadd.f32 %v4034_v50, %v2324_v11  ;;  %v2529_v39 = vrot.slane %v2527_v42, 4  ;;  %v4487_v11 = vld [vmem:[#allocation39_spill] sm:$0xff] }
 0x2a3   : > { %2992 = vst [vmem:[%s4053_s7 + $0x38] sm:$0xf] %v2528_v59  ;;  %v1750_v29 = vpop.f32.mrf.mxu2 }
 0x2a4   : > { %v2400_v37 = vmax.f32 %v2364_v46, 0.0  ;;  %v1813_v53 = vadd.f32 %v1750_v29, %v1657_v40  ;;  %v1596_v12 = vpop.f32.mrf.mxu1 }
 0x2a5   : > { %v1658_v33 = vadd.f32 %v1596_v12, %v4484_v8  ;;  %v4488_v8 = vld [vmem:[#allocation42_spill] sm:$0xff] }
 0x2a6   : > { %v2522_v58 = vpack.c.bf16 %v2400_v37, %v2400_v37  ;;  %v2264_v9 = vpop.f32.mrf.mxu0  ;;  %v2093_v61 = vadd.f32 %v4237_v35, %v1813_v53  ;;  %v2040_v22 = vpop.f32.mrf.mxu3  ;;  %v4485_v35 = vld [vmem:[#allocation16_spill] sm:$0xff] }
 0x2a8   : > { %v2530_v1 = vrot.slane %v2522_v58, 7  ;;  %v2325_v30 = vadd.f32 %v2262_v20, %v2093_v61 }
 0x2aa   : > { %v2531_v19 = vsel %vm4145_vm15, %v2529_v39, %v2530_v1  ;;  %v2365_v15 = vadd.f32 %v4034_v50, %v2325_v30 }
 0x2ab   : > { %2993 = vst [vmem:[%s4053_s7 + $0x3c] sm:$0xf] %v2531_v19  ;;  %v1752_v18 = vpop.f32.mrf.mxu2 }
 0x2ac   : > { %v1814_v49 = vadd.f32 %v1752_v18, %v1658_v33  ;;  %v1599_v52 = vpop.f32.mrf.mxu1  ;;  %v2401_v23 = vmax.f32 %v2365_v15, 0.0 }
 0x2ad   : > { %v1659_v6 = vadd.f32 %v1599_v52, %v4485_v35 }
 0x2ae   : > { %v2094_v62 = vadd.f32 %v2032_v31, %v1814_v49  ;;  %v2267_v43 = vpop.f32.mrf.mxu0  ;;  %v2042_v32 = vpop.f32.mrf.mxu3  ;;  %v4486_v31 = vld [vmem:[#allocation23_spill] sm:$0xff] }
 0x2b0   : > { %v2326_v36 = vadd.f32 %v2264_v9, %v2094_v62 }
 0x2b2   : > { %v2366_v5 = vadd.f32 %v4034_v50, %v2326_v36 }
 0x2b3   : > { %v1755_v63 = vpop.f32.mrf.mxu2 }
 0x2b4   : > { %v2402_v24 = vmax.f32 %v2366_v5, 0.0  ;;  %v1815_v34 = vadd.f32 %v1755_v63, %v1659_v6  ;;  %v1601_v38 = vpop.f32.mrf.mxu1  ;;  %v4489_v63 = vld [vmem:[#allocation25_spill] sm:$0xff] }
 0x2b5   : > { %v1660_v27 = vadd.f32 %v1601_v38, %v4486_v31 }
 0x2b6   : > { %v3055_v2 = vpack.c.bf16 %v2402_v24, %v2401_v23  ;;  %v2095_v57 = vadd.f32 %v2035_v13, %v1815_v34  ;;  %v2269_v0 = vpop.f32.mrf.mxu0  ;;  %v2045_v20 = vpop.f32.mrf.mxu3 }
 0x2b8   : > { %3064 = vst [vmem:[%s4053_s7 + $0x40] sm:$0xff] %v3055_v2   ;;  %v2327_v41 = vadd.f32 %v2267_v43, %v2095_v57 }
 0x2ba   : > { %v2367_v44 = vadd.f32 %v4034_v50, %v2327_v41 }
 0x2bb   : > { %v1757_v28 = vpop.f32.mrf.mxu2 }
 0x2bc   : > { %v1816_v55 = vadd.f32 %v1757_v28, %v1660_v27  ;;  %v1604_v10 = vpop.f32.mrf.mxu1  ;;  %v2403_v54 = vmax.f32 %v2367_v44, 0.0 }
 0x2bd   : > { %v1661_v59 = vadd.f32 %v1604_v10, %v4487_v11  ;;  %v4490_v10 = vld [vmem:[#allocation24_spill] sm:$0xff] }
 0x2be   : > { %v2096_v21 = vadd.f32 %v2037_v56, %v1816_v55  ;;  %v2272_v17 = vpop.f32.mrf.mxu0  ;;  %v2542_v46 = vpack.c.bf16 %v2403_v54, %v2403_v54  ;;  %v2047_v1 = vpop.f32.mrf.mxu3 }
 0x2c0   : > { %v2328_v45 = vadd.f32 %v2269_v0, %v2096_v21  ;;  %v2996_v9 = vrot.slane %v2542_v46, 9 }
 0x2c2   : > { %v2368_v42 = vadd.f32 %v4034_v50, %v2328_v45 }
 0x2c3   : > { %v1760_v13 = vpop.f32.mrf.mxu2 }
 0x2c4   : > { %v2404_v40 = vmax.f32 %v2368_v42, 0.0  ;;  %v1817_v29 = vadd.f32 %v1760_v13, %v1661_v59  ;;  %v1606_v37 = vpop.f32.mrf.mxu1 }
 0x2c5   : > { %v1662_v33 = vadd.f32 %v1606_v37, %v4488_v8 }
 0x2c6   : > { %v2543_v53 = vpack.c.bf16 %v2404_v40, %v2404_v40  ;;  %v2097_v12 = vadd.f32 %v2040_v22, %v1817_v29  ;;  %v2274_v58 = vpop.f32.mrf.mxu0  ;;  %v2050_v34 = vpop.f32.mrf.mxu3 }
 0x2c8   : > { %v2550_v39 = vrot.slane %v2543_v53, 5  ;;  %v2329_v56 = vadd.f32 %v2272_v17, %v2097_v12  ;;  %v4491_v12 = vld [vmem:[#allocation44_spill] sm:$0xff] }
 0x2ca   : > { %v2551_v61 = vsel %vm4075_vm11, %v2996_v9, %v2550_v39  ;;  %v2369_v19 = vadd.f32 %v4034_v50, %v2329_v56  ;;  %v2552_v15 = vrot.slane %v2550_v39, 4 }
 0x2cb   : > { %2997 = vst [vmem:[%s4053_s7 + $0x48] sm:$0xf] %v2551_v61  ;;  %v1762_v18 = vpop.f32.mrf.mxu2 }
 0x2cc   : > { %v2405_v30 = vmax.f32 %v2369_v19, 0.0  ;;  %v1818_v49 = vadd.f32 %v1762_v18, %v1662_v33  ;;  %v1609_v52 = vpop.f32.mrf.mxu1 }
 0x2cd   : > { %v1663_v23 = vadd.f32 %v1609_v52, %v4489_v63 }
 0x2ce   : > { %v2544_v62 = vpack.c.bf16 %v2405_v30, %v2405_v30  ;;  %v2098_v22 = vadd.f32 %v2042_v32, %v1818_v49  ;;  %v2277_v43 = vpop.f32.mrf.mxu0  ;;  %v2052_v11 = vpop.f32.mrf.mxu3 }
 0x2d0   : > { %v2553_v36 = vrot.slane %v2544_v62, 5  ;;  %v2330_v5 = vadd.f32 %v2274_v58, %v2098_v22  ;;  %v2999_v31 = vrot.slane %v2544_v62, 10  ;;  %v4492_v22 = vld [vmem:[#allocation13_spill] sm:$0xff] }
 0x2d2   : > { %v2554_v35 = vsel %vm4075_vm11, %v2552_v15, %v2553_v36  ;;  %v2370_v6 = vadd.f32 %v4034_v50, %v2330_v5 }
 0x2d3   : > { %2998 = vst [vmem:[%s4053_s7 + $0x4c] sm:$0xf] %v2554_v35  ;;  %v1765_v24 = vpop.f32.mrf.mxu2 }
 0x2d4   : > { %v2406_v38 = vmax.f32 %v2370_v6, 0.0  ;;  %v1819_v2 = vadd.f32 %v1765_v24, %v1663_v23  ;;  %v1611_v57 = vpop.f32.mrf.mxu1 }
 0x2d5   : > { %v1664_v21 = vadd.f32 %v1611_v57, %v4490_v10 }
 0x2d6   : > { %v2560_v0 = vpack.c.bf16 %v2406_v38, %v2406_v38  ;;  %v2099_v32 = vadd.f32 %v2045_v20, %v1819_v2  ;;  %v2279_v41 = vpop.f32.mrf.mxu0  ;;  %v2055_v33 = vpop.f32.mrf.mxu3 }
 0x2d8   : > { %v2566_v27 = vrot.slane %v2560_v0, 6  ;;  %v2331_v28 = vadd.f32 %v2277_v43, %v2099_v32 }
 0x2da   : > { %v2567_v44 = vsel %vm4110_vm13, %v2999_v31, %v2566_v27  ;;  %v2371_v55 = vadd.f32 %v4034_v50, %v2331_v28  ;;  %v2568_v46 = vrot.slane %v2566_v27, 4 }
 0x2db   : > { %3000 = vst [vmem:[%s4053_s7 + $0x50] sm:$0xf] %v2567_v44  ;;  %v1767_v17 = vpop.f32.mrf.mxu2 }
 0x2dc   : > { %v2407_v54 = vmax.f32 %v2371_v55, 0.0  ;;  %v1820_v45 = vadd.f32 %v1767_v17, %v1664_v21  ;;  %v1614_v42 = vpop.f32.mrf.mxu1 }
 0x2dd   : > { %v1665_v58 = vadd.f32 %v1614_v42, %v4491_v12 }
 0x2de   : > { %v2561_v59 = vpack.c.bf16 %v2407_v54, %v2407_v54  ;;  %v2100_v20 = vadd.f32 %v2047_v1, %v1820_v45  ;;  %v2282_v13 = vpop.f32.mrf.mxu0  ;;  %v2057_v38 = vpop.f32.mrf.mxu3 }
 0x2e0   : > { %v2569_v40 = vrot.slane %v2561_v59, 6  ;;  %v2332_v29 = vadd.f32 %v2279_v41, %v2100_v20  ;;  %v3002_v18 = vrot.slane %v2561_v59, 11 }
 0x2e2   : > { %v2570_v37 = vsel %vm4110_vm13, %v2568_v46, %v2569_v40  ;;  %v2372_v53 = vadd.f32 %v4034_v50, %v2332_v29 }
 0x2e3   : > { %3001 = vst [vmem:[%s4053_s7 + $0x54] sm:$0xf] %v2570_v37  ;;  %v1770_v9 = vpop.f32.mrf.mxu2 }
 0x2e4   : > { %v2408_v39 = vmax.f32 %v2372_v53, 0.0  ;;  %v1821_v56 = vadd.f32 %v1770_v9, %v1665_v58  ;;  %v1616_v61 = vpop.f32.mrf.mxu1 }
 0x2e5   : > { %v1666_v43 = vadd.f32 %v1616_v61, %v4492_v22 }
 0x2e6   : > { %v2576_v19 = vpack.c.bf16 %v2408_v39, %v2408_v39  ;;  %v2101_v8 = vadd.f32 %v2050_v34, %v1821_v56  ;;  %v2284_v1 = vpop.f32.mrf.mxu0  ;;  %v2060_v54 = vpop.f32.mrf.mxu3 }
 0x2e8   : > { %v2582_v30 = vrot.slane %v2576_v19, 7  ;;  %v2333_v49 = vadd.f32 %v2282_v13, %v2101_v8 }
 0x2ea   : > { %v2583_v52 = vsel %vm4145_vm15, %v3002_v18, %v2582_v30  ;;  %v2373_v62 = vadd.f32 %v4034_v50, %v2333_v49  ;;  %v2584_v23 = vrot.slane %v2582_v30, 4 }
 0x2eb   : > { %3003 = vst [vmem:[%s4053_s7 + $0x58] sm:$0xf] %v2583_v52  ;;  %v1772_v15 = vpop.f32.mrf.mxu2 }
 0x2ec   : > { %v2409_v36 = vmax.f32 %v2373_v62, 0.0  ;;  %v1822_v5 = vadd.f32 %v1772_v15, %v1666_v43  ;;  %v1619_v35 = vpop.f32.mrf.mxu1 }
 0x2ed   : > { %v1667_v57 = vadd.f32 %v1619_v35, %v3966_v26 }
 0x2ee   : > { %v2577_v6 = vpack.c.bf16 %v2409_v36, %v2409_v36  ;;  %v2287_v63 = vpop.f32.mrf.mxu0  ;;  %v2102_v34 = vadd.f32 %v2052_v11, %v1822_v5  ;;  %v2062_v58 = vpop.f32.mrf.mxu3  ;;  %v3119_v5 = vld [vmem:[#allocation4] ss:$0 sm:$0xff] }
 0x2f0   : > { %v2585_v24 = vrot.slane %v2577_v6, 7  ;;  %v2334_v32 = vadd.f32 %v2284_v1, %v2102_v34 }
 0x2f2   : > { %v2586_v2 = vsel %vm4145_vm15, %v2584_v23, %v2585_v24  ;;  %v2374_v44 = vadd.f32 %v4034_v50, %v2334_v32 }
 0x2f3   : > { %3004 = vst [vmem:[%s4053_s7 + $0x5c] sm:$0xf] %v2586_v2  ;;  %v1775_v0 = vpop.f32.mrf.mxu2 }
 0x2f4   : > { %v1823_v41 = vadd.f32 %v1775_v0, %v1667_v57  ;;  %v1621_v31 = vpop.f32.mrf.mxu1  ;;  %v2410_v45 = vmax.f32 %v2374_v44, 0.0 }
 0x2f5   : > { %v1668_v21 = vadd.f32 %v1621_v31, %v3976_v47 }
 0x2f6   : > { %v2103_v27 = vadd.f32 %v2055_v33, %v1823_v41  ;;  %v2289_v28 = vpop.f32.mrf.mxu0  ;;  %v2065_v52 = vpop.f32.mrf.mxu3 }
 0x2f8   : > { %v2335_v55 = vadd.f32 %v2287_v63, %v2103_v27 }
 0x2fa   : > { %v2375_v10 = vadd.f32 %v4034_v50, %v2335_v55 }
 0x2fb   : > { %v1777_v17 = vpop.f32.mrf.mxu2 }
 0x2fc   : > { %v2411_v42 = vmax.f32 %v2375_v10, 0.0  ;;  %v1824_v26 = vadd.f32 %v1777_v17, %v1668_v21  ;;  %v1624_v11 = vpop.f32.mrf.mxu1 }
 0x2fd   : > { %v1669_v40 = vadd.f32 %v1624_v11, %v3982_v60 }
 0x2fe   : > { %v3060_v59 = vpack.c.bf16 %v2411_v42, %v2410_v45  ;;  %v2104_v20 = vadd.f32 %v2057_v38, %v1824_v26  ;;  %v2292_v13 = vpop.f32.mrf.mxu0  ;;  %v2067_v0 = vpop.f32.mrf.mxu3 }
 0x300   : > { %3065 = vst [vmem:[%s4053_s7 + $0x60] sm:$0xff] %v3060_v59   ;;  %v2336_v46 = vadd.f32 %v2289_v28, %v2104_v20 }
 0x302   : > { %v2376_v37 = vadd.f32 %v4034_v50, %v2336_v46 }
 0x303   : > { %v1780_v29 = vpop.f32.mrf.mxu2 }
 0x304   : > { %v1825_v53 = vadd.f32 %v1780_v29, %v1669_v40  ;;  %v1626_v12 = vpop.f32.mrf.mxu1  ;;  %v2412_v39 = vmax.f32 %v2376_v37, 0.0 }
 0x305   : > { %v1670_v19 = vadd.f32 %v1626_v12, %v3992_v16 }
 0x306   : > { %v2105_v47 = vadd.f32 %v2060_v54, %v1825_v53  ;;  %v2294_v9 = vpop.f32.mrf.mxu0  ;;  %v2597_v1 = vpack.c.bf16 %v2412_v39, %v2412_v39 }
 0x308   : > { %v2337_v56 = vadd.f32 %v2292_v13, %v2105_v47  ;;  %v3007_v62 = vrot.slane %v2597_v1, 9 }
 0x30a   : > { %v2377_v61 = vadd.f32 %v4034_v50, %v2337_v56 }
 0x30b   : > { %v1782_v8 = vpop.f32.mrf.mxu2 }
 0x30c   : > { %v2413_v33 = vmax.f32 %v2377_v61, 0.0  ;;  %v1826_v18 = vadd.f32 %v1782_v8, %v1670_v19  ;;  %v1629_v60 = vpop.f32.mrf.mxu1 }
 0x30d   : > { %v1671_v16 = vadd.f32 %v1629_v60, %v3998_v51 }
 0x30e   : > { %v2598_v30 = vpack.c.bf16 %v2413_v33, %v2413_v33  ;;  %v2106_v49 = vadd.f32 %v2062_v58, %v1826_v18  ;;  %v2297_v15 = vpop.f32.mrf.mxu0 }
 0x310   : > { %v2605_v22 = vrot.slane %v2598_v30, 5  ;;  %v2338_v43 = vadd.f32 %v2294_v9, %v2106_v49 }
 0x312   : > { %v2606_v36 = vsel %vm4075_vm11, %v3007_v62, %v2605_v22  ;;  %v2378_v50 = vadd.f32 %v3119_v5, %v2338_v43  ;;  %v2607_v38 = vrot.slane %v2605_v22, 4 }
 0x313   : > { %3008 = vst [vmem:[%s4053_s7 + $0x68] sm:$0xf] %v2606_v36  ;;  %v1785_v35 = vpop.f32.mrf.mxu2 }
 0x314   : > { %v2414_v6 = vmax.f32 %v2378_v50, 0.0  ;;  %v1827_v63 = vadd.f32 %v1785_v35, %v1671_v16  ;;  %v1631_v23 = vpop.f32.mrf.mxu1 }
 0x315   : > { %v1672_v31 = vadd.f32 %v1631_v23, %v4008_v25  ;;  %v2070_v25 = vpop.f32.mrf.mxu3 }
 0x316   : > { %v2599_v24 = vpack.c.bf16 %v2414_v6, %v2414_v6  ;;  %v2107_v34 = vadd.f32 %v2065_v52, %v1827_v63  ;;  %v2299_v51 = vpop.f32.mrf.mxu0 }
 0x318   : > { %v2608_v2 = vrot.slane %v2599_v24, 5  ;;  %v2339_v57 = vadd.f32 %v2297_v15, %v2107_v34  ;;  %v3010_v17 = vrot.slane %v2599_v24, 10 }
 0x31a   : > { %v2609_v32 = vsel %vm4075_vm11, %v2607_v38, %v2608_v2  ;;  %v2379_v41 = vadd.f32 %v3119_v5, %v2339_v57 }
 0x31b   : > { %3009 = vst [vmem:[%s4053_s7 + $0x6c] sm:$0xf] %v2609_v32  ;;  %v1787_v27 = vpop.f32.mrf.mxu2 }
 0x31c   : > { %v2415_v28 = vmax.f32 %v2379_v41, 0.0  ;;  %v1828_v44 = vadd.f32 %v1787_v27, %v1672_v31  ;;  %v1634_v55 = vpop.f32.mrf.mxu1 }
 0x31d   : > { %v1673_v26 = vadd.f32 %v1634_v55, %v4014_v3  ;;  %v2072_v61 = vpop.f32.mrf.mxu3 }
 0x31e   : > { %v2615_v10 = vpack.c.bf16 %v2415_v28, %v2415_v28  ;;  %v2108_v21 = vadd.f32 %v2067_v0, %v1828_v44  ;;  %v2302_v13 = vpop.f32.mrf.mxu0 }
 0x320   : > { %v2621_v54 = vrot.slane %v2615_v10, 6  ;;  %v2340_v45 = vadd.f32 %v2299_v51, %v2108_v21 }
 0x322   : > { %v2622_v42 = vsel %vm4110_vm13, %v3010_v17, %v2621_v54  ;;  %v2380_v14 = vadd.f32 %v3119_v5, %v2340_v45  ;;  %v2623_v37 = vrot.slane %v2621_v54, 4 }
 0x323   : > { %3011 = vst [vmem:[%s4053_s7 + $0x70] sm:$0xf] %v2622_v42  ;;  %v1790_v11 = vpop.f32.mrf.mxu2 }
 0x324   : > { %v2416_v59 = vmax.f32 %v2380_v14, 0.0  ;;  %v1829_v20 = vadd.f32 %v1790_v11, %v1673_v26  ;;  %v1636_v29 = vpop.f32.mrf.mxu1 }
 0x325   : > { %v1674_v3 = vadd.f32 %v1636_v29, %v4024_v4 }
 0x326   : > { %v2616_v46 = vpack.c.bf16 %v2416_v59, %v2416_v59  ;;  %v2109_v40 = vadd.f32 %v2070_v25, %v1829_v20  ;;  %v2304_v1 = vpop.f32.mrf.mxu0 }
 0x328   : > { %v2624_v53 = vrot.slane %v2616_v46, 6  ;;  %v2341_v12 = vadd.f32 %v2302_v13, %v2109_v40  ;;  %v3013_v33 = vrot.slane %v2616_v46, 11 }
 0x32a   : > { %v2625_v58 = vsel %vm4110_vm13, %v2623_v37, %v2624_v53  ;;  %v2381_v47 = vadd.f32 %v3119_v5, %v2341_v12 }
 0x32b   : > { %3012 = vst [vmem:[%s4053_s7 + $0x74] sm:$0xf] %v2625_v58  ;;  %v1792_v9 = vpop.f32.mrf.mxu2 }
 0x32c   : > { %v2417_v39 = vmax.f32 %v2381_v47, 0.0  ;;  %v1830_v56 = vadd.f32 %v1792_v9, %v1674_v3 }
 0x32e   : > { %v2631_v19 = vpack.c.bf16 %v2417_v39, %v2417_v39  ;;  %v2110_v8 = vadd.f32 %v2072_v61, %v1830_v56 }
 0x330   : > { %v2637_v18 = vrot.slane %v2631_v19, 7  ;;  %v2342_v60 = vadd.f32 %v2304_v1, %v2110_v8 }
 0x332   : > { %v2638_v48 = vsel %vm4145_vm15, %v3013_v33, %v2637_v18  ;;  %v2382_v30 = vadd.f32 %v3119_v5, %v2342_v60  ;;  %v2639_v4 = vrot.slane %v2637_v18, 4 }
 0x333   : > { %3014 = vst [vmem:[%s4053_s7 + $0x78] sm:$0xf] %v2638_v48 }
 0x334   : > { %v2418_v49 = vmax.f32 %v2382_v30, 0.0 }
 0x336   : > { %v2632_v52 = vpack.c.bf16 %v2418_v49, %v2418_v49 }
 0x338   : > { %v2640_v62 = vrot.slane %v2632_v52, 7 }
 0x33a   : > { %v2641_v22 = vsel %vm4145_vm15, %v2639_v4, %v2640_v62 }
 0x33b   : > { %3015 = vst [vmem:[%s4053_s7 + $0x7c] sm:$0xf] %v2641_v22 }
 0x33c PF: > { %s15_s12 = sadd.s32 1, %s3194_s12  }
 0x33d   : > { %p12_p7 = scmp.ge.s32.totalorder %s15_s12, 4  }
 0x33f   :  { %14 = sbr.rel (!%p12_p7) target bundleno = 2 (0x2), region = 94 }
 0x344   :  { %2668 = vsyncpa [#allocation3], 1 }
 0x345   :  { %2670 = vsyncpa [#allocation3 + $0x1], 1 }
 0x346   :  { %2671 = vsyncpa [#allocation5], 1 }

// kernel: _ocr_forward_arrays.5
= control target key start
LH: loop header
LB: loop body
LE: loop exit
PB: predicated region body
PF: predicated region fallthrough
CT: control target
= control target key end

     0   :  { %10 = vsyncpa [#allocation3], 0  ;;  %s4076_s0 = inlined_call_operand.vmem [shape: bf16[2,36,128], index: 0, kind: input, shape index: {}]   ;;  %s4077_s1 = inlined_call_operand.vmem [shape: bf16[9,128,256], index: 1, kind: input, shape index: {}]   ;;  %s4078_s2 = inlined_call_operand.vmem [shape: f32[1,256], index: 2, kind: input, shape index: {}]   ;;  %s4079_s3 = inlined_call_operand.vmem [shape: bf16[256,128], index: 3, kind: input, shape index: {}]   ;;  %s4080_s4 = inlined_call_operand.vmem [shape: f32[1,128], index: 4, kind: input, shape index: {}]   ;;  %s4081_s5 = inlined_call_operand.hbm [shape: f32[2,4,128], index: 5, kind: output, shape index: {}]  }
   0x1   :  { %12 = vsyncpa [#allocation3 + $0x1], 0  ;;  %s2929_s18 = smov 0   ;;  %s2931_s19 = smov 0  }
   0x2   :  { %s2933_s20 = smov 0   ;;  %s2935_s21 = smov 0  }
   0x3 LB: > { %s2950_s22 = sadd.s32 4294967295, %s2897_s21   ;;  %s1847_s23 = sadd.s32 4294967294, %s2897_s21   ;;  %s2897_s21 = sphi %s2935_s21, %s4087_s21   ;;  %s2893_s20 = sphi %s2933_s20, %s4086_s20   ;;  %s2889_s19 = sphi %s2931_s19, %s4085_s19   ;;  %s2885_s18 = sphi %s2929_s18, %s4084_s18  }
   0x4   : > { %s2954_s24 = sadd.s32 1, %s2897_s21   ;;  %s135_s25 = sadd.s32 1, %s2893_s20 }
   0x5   : > { %s132_s26 = ssub.s32 %s2897_s21, %s2954_s24  ;;  %p145_p0 = scmp.ne.s32.totalorder %s2893_s20, %s2889_s19 }
   0x6   : > { %p133_p1 = scmp.eq.s32.totalorder %s132_s26, 0  ;;  %p146_p2 = scmp.eq.s32.totalorder %s2950_s22, 1 }
   0x7   : > { %p151_p3 = scmp.ne.s32.totalorder %s2889_s19, %s2885_s18  ;;  %p152_p4 = scmp.eq.s32.totalorder %s1847_s23, 1 }
   0x8   : > { %s2965_s27 = scalar_select %p133_p1, %s2893_s20, %s135_s25  }
   0x9   : > { %p2967_p5 = por %p146_p2, %p145_p0  ;;  %p2971_p6 = por %p152_p4, %p151_p3 }
   0xa   : > { %p1850_p7 = scmp.ge.s32.totalorder %s2897_s21, 1  ;;  %p190_p8 = scmp.lt.s32.totalorder %s2897_s21, 3 }
   0xc   : > { %p191_p9 = pnand %p1850_p7, %p190_p8 }
   0xd   : > { %p218_p10 = scmp.lt.s32.totalorder (!%p191_p9), %s2950_s22, 1  ;;  %s215_s12 = sand.u32 (!%p191_p9), 1, %s2889_s19  }
   0xe   : > { %194 = sbr.rel (%p191_p9) target bundleno = 481 (0x1e1), region = 40  ;;  %s1851_s14 = sshll.u32 (!%p191_p9), %s215_s12, 2 }
   0xf   : > { %s2622_s15 = sshll.u32 (!%p191_p9), %s2950_s22, 2  ;;  %s217_s26 = scalar_lea.vmem (!%p191_p9), [#allocation2], %s1851_s14 }
  0x10   : > { %s1783_s25 = scalar_lea.hbm (!%p191_p9), %s4081_s5, %s2622_s15  ;;  %s1785_s30 = sshll.u32 (!%p191_p9), %s217_s26, 4  ;;  %s1786_s30 = int_to_ptr.vmem [resolvable:$true] %s1785_s30 }
  0x11   : > { %s1787_s7 = sshll.u32 (!%p191_p9), %s1783_s25, 4  ;;  %s2855_s11 = scalar_lea.hbm (!%p191_p9), %s4081_s5, 8  ;;  %s1788_s7 = int_to_ptr.hbm [resolvable:$true] %s1787_s7 }
  0x12   : > { %s2849_s8 = sshra.s32 (!%p191_p9), %s1788_s7, 4  ;;  %s2850_s8 = int_to_ptr.hbm [resolvable:$true] %s2849_s8 }
  0x13   : > { %v1927_v0 = vld [vmem:[%s4077_s1 + $0xf0] sm:$0xf]  ;;  %v2656_v1 = vld [vmem:[%s4077_s1 + $0xf4] sm:$0xf0]  ;;  %v2655_v2 = vld [vmem:[%s4077_s1 + $0xf4] sm:$0xf]  ;;  %p2856_p0 = scmp.lt.s32.totalorder %s2850_s8, %s4081_s5 }
  0x14   : > { %v1928_v3 = vor.u32 %v2656_v1, %v1927_v0  ;;  %v1929_v4 = vld [vmem:[%s4077_s1 + $0xf8] sm:$0xf0]  ;;  %v1991_v5 = vld [vmem:[%s4077_s1 + $0x70] sm:$0xf]  ;;  %v2640_v6 = vld [vmem:[%s4077_s1 + $0x74] sm:$0xf0] }
  0x15   : > { %v1932_v7 = vor.u32 %v2655_v2, %v1929_v4  ;;  %v1992_v8 = vor.u32 %v2640_v6, %v1991_v5  ;;  %v2639_v9 = vld [vmem:[%s4077_s1 + $0x74] sm:$0xf]  ;;  %v1993_v10 = vld [vmem:[%s4077_s1 + $0x78] sm:$0xf0]  ;;  %v1919_v11 = vld [vmem:[%s4077_s1 + $0xe0] sm:$0xf] }
  0x16   : > { %367 = vmatpush.bf16.msra.mxu0 %v1928_v3  ;;  %v1996_v12 = vor.u32 %v2639_v9, %v1993_v10  ;;  %v2654_v13 = vld [vmem:[%s4077_s1 + $0xe4] sm:$0xf0]  ;;  %v2653_v14 = vld [vmem:[%s4077_s1 + $0xe4] sm:$0xf]  ;;  %v1921_v15 = vld [vmem:[%s4077_s1 + $0xe8] sm:$0xf0] }
  0x17   : > { %385 = vmatpush.bf16.msra.mxu1 %v1932_v7  ;;  %485 = vmatpush.bf16.msra.mxu2 %v1992_v8  ;;  %v1920_v16 = vor.u32 %v2654_v13, %v1919_v11  ;;  %v1924_v17 = vor.u32 %v2653_v14, %v1921_v15  ;;  %v1983_v18 = vld [vmem:[%s4077_s1 + $0x60] sm:$0xf]  ;;  %v2638_v19 = vld [vmem:[%s4077_s1 + $0x64] sm:$0xf0]  ;;  %v2637_v20 = vld [vmem:[%s4077_s1 + $0x64] sm:$0xf] }
  0x18   : > { %503 = vmatpush.bf16.msra.mxu3 %v1996_v12  ;;  %v1984_v21 = vor.u32 %v2638_v19, %v1983_v18  ;;  %v1985_v22 = vld [vmem:[%s4077_s1 + $0x68] sm:$0xf0]  ;;  %v1911_v23 = vld [vmem:[%s4077_s1 + $0xd0] sm:$0xf]  ;;  %v2652_v24 = vld [vmem:[%s4077_s1 + $0xd4] sm:$0xf0] }
  0x19   : > { %v1988_v25 = vor.u32 %v2637_v20, %v1985_v22  ;;  %v2651_v26 = vld [vmem:[%s4077_s1 + $0xd4] sm:$0xf]  ;;  %v1913_v27 = vld [vmem:[%s4077_s1 + $0xd8] sm:$0xf0]  ;;  %v1975_v28 = vld [vmem:[%s4077_s1 + $0x50] sm:$0xf]  ;;  %v1912_v29 = vor.u32 %v2652_v24, %v1911_v23 }
  0x1a   : > { %368 = vmatpush.bf16.msra.mxu0 %v1920_v16  ;;  %v2636_v30 = vld [vmem:[%s4077_s1 + $0x54] sm:$0xf0]  ;;  %v2635_v31 = vld [vmem:[%s4077_s1 + $0x54] sm:$0xf]  ;;  %v1977_v32 = vld [vmem:[%s4077_s1 + $0x58] sm:$0xf0]  ;;  %v1916_v33 = vor.u32 %v2651_v26, %v1913_v27 }
  0x1b   : > { %386 = vmatpush.bf16.msra.mxu1 %v1924_v17  ;;  %486 = vmatpush.bf16.msra.mxu2 %v1984_v21  ;;  %v1976_v34 = vor.u32 %v2636_v30, %v1975_v28  ;;  %v1903_v35 = vld [vmem:[%s4077_s1 + $0xc0] sm:$0xf]  ;;  %v2650_v36 = vld [vmem:[%s4077_s1 + $0xc4] sm:$0xf0]  ;;  %v2649_v37 = vld [vmem:[%s4077_s1 + $0xc4] sm:$0xf]  ;;  %v1980_v38 = vor.u32 %v2635_v31, %v1977_v32 }
  0x1c   : > { %504 = vmatpush.bf16.msra.mxu3 %v1988_v25  ;;  %v1905_v39 = vld [vmem:[%s4077_s1 + $0xc8] sm:$0xf0]  ;;  %v1967_v40 = vld [vmem:[%s4077_s1 + $0x40] sm:$0xf]  ;;  %v2634_v41 = vld [vmem:[%s4077_s1 + $0x44] sm:$0xf0]  ;;  %v1904_v44 = vor.u32 %v2650_v36, %v1903_v35 }
  0x1d   : > { %v2633_v42 = vld [vmem:[%s4077_s1 + $0x44] sm:$0xf]  ;;  %v1969_v43 = vld [vmem:[%s4077_s1 + $0x48] sm:$0xf0]  ;;  %v1908_v45 = vor.u32 %v2649_v37, %v1905_v39  ;;  %v1968_v46 = vor.u32 %v2634_v41, %v1967_v40  ;;  %v1895_v47 = vld [vmem:[%s4077_s1 + $0xb0] sm:$0xf] }
  0x1e   : > { %369 = vmatpush.bf16.msra.mxu0 %v1912_v29  ;;  %v2648_v48 = vld [vmem:[%s4077_s1 + $0xb4] sm:$0xf0]  ;;  %v2647_v49 = vld [vmem:[%s4077_s1 + $0xb4] sm:$0xf]  ;;  %v1972_v50 = vor.u32 %v2633_v42, %v1969_v43  ;;  %v1897_v51 = vld [vmem:[%s4077_s1 + $0xb8] sm:$0xf0] }
  0x1f   : > { %387 = vmatpush.bf16.msra.mxu1 %v1916_v33  ;;  %487 = vmatpush.bf16.msra.mxu2 %v1976_v34  ;;  %v1959_v52 = vld [vmem:[%s4077_s1 + $0x30] sm:$0xf]  ;;  %v2632_v53 = vld [vmem:[%s4077_s1 + $0x34] sm:$0xf0]  ;;  %v2631_v54 = vld [vmem:[%s4077_s1 + $0x34] sm:$0xf]  ;;  %v1896_v56 = vor.u32 %v2648_v48, %v1895_v47  ;;  %v1900_v57 = vor.u32 %v2647_v49, %v1897_v51 }
  0x20   : > { %505 = vmatpush.bf16.msra.mxu3 %v1980_v38  ;;  %v1961_v55 = vld [vmem:[%s4077_s1 + $0x38] sm:$0xf0]  ;;  %v1960_v58 = vor.u32 %v2632_v53, %v1959_v52  ;;  %v1887_v59 = vld [vmem:[%s4077_s1 + $0xa0] sm:$0xf]  ;;  %v2646_v60 = vld [vmem:[%s4077_s1 + $0xa4] sm:$0xf0] }
  0x21   : > { %v2645_v61 = vld [vmem:[%s4077_s1 + $0xa4] sm:$0xf]  ;;  %v1964_v62 = vor.u32 %v2631_v54, %v1961_v55  ;;  %v1889_v63 = vld [vmem:[%s4077_s1 + $0xa8] sm:$0xf0]  ;;  %v1951_v0 = vld [vmem:[%s4077_s1 + $0x20] sm:$0xf]  ;;  %v1888_v4 = vor.u32 %v2646_v60, %v1887_v59 }
  0x22   : > { %370 = vmatpush.bf16.msra.mxu0 %v1904_v44  ;;  %v2630_v1 = vld [vmem:[%s4077_s1 + $0x24] sm:$0xf0]  ;;  %v2629_v2 = vld [vmem:[%s4077_s1 + $0x24] sm:$0xf]  ;;  %v1953_v3 = vld [vmem:[%s4077_s1 + $0x28] sm:$0xf0]  ;;  %v1892_v7 = vor.u32 %v2645_v61, %v1889_v63 }
  0x23   : > { %388 = vmatpush.bf16.msra.mxu1 %v1908_v45  ;;  %488 = vmatpush.bf16.msra.mxu2 %v1968_v46  ;;  %v1879_v5 = vld [vmem:[%s4077_s1 + $0x90] sm:$0xf]  ;;  %v2644_v6 = vld [vmem:[%s4077_s1 + $0x94] sm:$0xf0]  ;;  %v1952_v8 = vor.u32 %v2630_v1, %v1951_v0  ;;  %v2643_v9 = vld [vmem:[%s4077_s1 + $0x94] sm:$0xf]  ;;  %v1956_v12 = vor.u32 %v2629_v2, %v1953_v3 }
  0x24   : > { %506 = vmatpush.bf16.msra.mxu3 %v1972_v50  ;;  %v1881_v10 = vld [vmem:[%s4077_s1 + $0x98] sm:$0xf0]  ;;  %v1943_v11 = vld [vmem:[%s4077_s1 + $0x10] sm:$0xf]  ;;  %v2628_v13 = vld [vmem:[%s4077_s1 + $0x14] sm:$0xf0]  ;;  %v1880_v18 = vor.u32 %v2644_v6, %v1879_v5 }
  0x25   : > { %v2627_v14 = vld [vmem:[%s4077_s1 + $0x14] sm:$0xf]  ;;  %v1945_v15 = vld [vmem:[%s4077_s1 + $0x18] sm:$0xf0]  ;;  %v1871_v16 = vld [vmem:[%s4077_s1 + $0x80] sm:$0xf]  ;;  %v1884_v21 = vor.u32 %v2643_v9, %v1881_v10  ;;  %v1944_v22 = vor.u32 %v2628_v13, %v1943_v11 }
  0x26   : > { %371 = vmatpush.bf16.msra.mxu0 %v1896_v56  ;;  %v2642_v17 = vld [vmem:[%s4077_s1 + $0x84] sm:$0xf0]  ;;  %v2641_v19 = vld [vmem:[%s4077_s1 + $0x84] sm:$0xf]  ;;  %v1873_v20 = vld [vmem:[%s4077_s1 + $0x88] sm:$0xf0]  ;;  %v1948_v26 = vor.u32 %v2627_v14, %v1945_v15 }
  0x27   : > { %389 = vmatpush.bf16.msra.mxu1 %v1900_v57  ;;  %489 = vmatpush.bf16.msra.mxu2 %v1960_v58  ;;  %s219_s13 = scalar_select %p218_p10, %s2950_s22, 1  ;;  %v1935_v23 = vld [vmem:[%s4077_s1] sm:$0xf]  ;;  %v2626_v24 = vld [vmem:[%s4077_s1 + $0x4] sm:$0xf0]  ;;  %v1872_v32 = vor.u32 %v2642_v17, %v1871_v16  ;;  %v1876_v36 = vor.u32 %v2641_v19, %v1873_v20  ;;  %vm686_vm1 = vcmask 1044480  }
  0x28   : > { %507 = vmatpush.bf16.msra.mxu3 %v1964_v62  ;;  %v2625_v25 = vld [vmem:[%s4077_s1 + $0x4] sm:$0xf]  ;;  %v1937_v27 = vld [vmem:[%s4077_s1 + $0x8] sm:$0xf0]  ;;  %v2071_v28 = vld [vmem:[%s4077_s1 + $0x170] sm:$0xf]  ;;  %v1936_v37 = vor.u32 %v2626_v24, %v1935_v23 }
  0x29   : > { %s2794_s6 = smul.u32 20, %s219_s13  ;;  %v2672_v29 = vld [vmem:[%s4077_s1 + $0x174] sm:$0xf0]  ;;  %v2671_v30 = vld [vmem:[%s4077_s1 + $0x174] sm:$0xf]  ;;  %v1940_v38 = vor.u32 %v2625_v25, %v1937_v27  ;;  %vm538_vm2 = vcmask 1046528  }
  0x2a   : > { %372 = vmatpush.bf16.msra.mxu0 %v1888_v4  ;;  %v2073_v31 = vld [vmem:[%s4077_s1 + $0x178] sm:$0xf0]  ;;  %v2151_v33 = vld [vmem:[%s4077_s1 + $0x1f0] sm:$0xf]  ;;  %v2688_v34 = vld [vmem:[%s4077_s1 + $0x1f4] sm:$0xf0]  ;;  %v2072_v45 = vor.u32 %v2672_v29, %v2071_v28 }
  0x2b   : > { %390 = vmatpush.bf16.msra.mxu1 %v1892_v7  ;;  %490 = vmatpush.bf16.msra.mxu2 %v1952_v8  ;;  %s3186_s17 = scalar_lea.vmem %s4076_s0, %s2794_s6  ;;  %v2687_v35 = vld [vmem:[%s4077_s1 + $0x1f4] sm:$0xf]  ;;  %v2153_v41 = vld [vmem:[%s4077_s1 + $0x1f8] sm:$0xf0]  ;;  %v2076_v46 = vor.u32 %v2671_v30, %v2073_v31  ;;  %v2152_v47 = vor.u32 %v2688_v34, %v2151_v33  ;;  %v2063_v48 = vld [vmem:[%s4077_s1 + $0x160] sm:$0xf] }
  0x2c   : > { %508 = vmatpush.bf16.msra.mxu3 %v1956_v12  ;;  %v3198_v39 = vld [vmem:[%s3186_s17] sm:$0xff]   ;;  %v3201_v40 = vld [vmem:[%s3186_s17 + $0x8] sm:$0xff]   ;;  %v2156_v52 = vor.u32 %v2687_v35, %v2153_v41  ;;  %vm269_vm0 = vsmask.f32 7424  ;;  %v2055_v62 = vld [vmem:[%s4077_s1 + $0x150] sm:$0xf] }
  0x2d   : > { %v3207_v42 = vunpack.c.l.b16 %v3201_v40  ;;  %v271_v43 = vshrl.u32 %v3198_v39, 16  ;;  %v273_v44 = vshll.u32 %v3198_v39, 16  ;;  %v2670_v49 = vld [vmem:[%s4077_s1 + $0x164] sm:$0xf0]  ;;  %v2669_v53 = vld [vmem:[%s4077_s1 + $0x164] sm:$0xf] }
  0x2e   : > { %373 = vmatpush.bf16.msra.mxu0 %v1880_v18  ;;  %v2065_v54 = vld [vmem:[%s4077_s1 + $0x168] sm:$0xf0]  ;;  %v2143_v55 = vld [vmem:[%s4077_s1 + $0x1e0] sm:$0xf]  ;;  %v2686_v56 = vld [vmem:[%s4077_s1 + $0x1e4] sm:$0xf0]  ;;  %v2064_v59 = vor.u32 %v2670_v49, %v2063_v48 }
  0x2f   : > { %391 = vmatpush.bf16.msra.mxu1 %v1884_v21  ;;  %491 = vmatpush.bf16.msra.mxu2 %v1944_v22  ;;  %v3219_v50 = vpack.c.b16 %v3207_v42, %v3207_v42  ;;  %v275_v51 = vrot.slane %v273_v44, 1  ;;  %v2685_v60 = vld [vmem:[%s4077_s1 + $0x1e4] sm:$0xf]  ;;  %v2145_v61 = vld [vmem:[%s4077_s1 + $0x1e8] sm:$0xf0]  ;;  %v2068_v1 = vor.u32 %v2669_v53, %v2065_v54  ;;  %v2144_v2 = vor.u32 %v2686_v56, %v2143_v55  ;;  %s1773_s22 = scalar_lea.sflag [#allocation3], %s215_s12 }
  0x30   : > { %509 = vmatpush.bf16.msra.mxu3 %v1948_v26  ;;  %v2668_v63 = vld [vmem:[%s4077_s1 + $0x154] sm:$0xf0]  ;;  %v2667_v3 = vld [vmem:[%s4077_s1 + $0x154] sm:$0xf]  ;;  %v2148_v4 = vor.u32 %v2685_v60, %v2145_v61  ;;  %v2057_v5 = vld [vmem:[%s4077_s1 + $0x158] sm:$0xf0] }
  0x31   : > { %v276_v57 = vor.u32 %v275_v51, %v271_v43  ;;  %v278_v58 = vshll.u32 %v3219_v50, 16  ;;  %v2135_v6 = vld [vmem:[%s4077_s1 + $0x1d0] sm:$0xf]  ;;  %v2684_v7 = vld [vmem:[%s4077_s1 + $0x1d4] sm:$0xf0]  ;;  %v2056_v9 = vor.u32 %v2668_v63, %v2055_v62  ;;  %v2060_v14 = vor.u32 %v2667_v3, %v2057_v5  ;;  %s2851_s6 = scalar_lea.hbm %s2850_s8, 4 }
  0x32   : > { %374 = vmatpush.bf16.msra.mxu0 %v1872_v32  ;;  %v2683_v10 = vld [vmem:[%s4077_s1 + $0x1d4] sm:$0xf]  ;;  %v2137_v11 = vld [vmem:[%s4077_s1 + $0x1d8] sm:$0xf0]  ;;  %v2047_v12 = vld [vmem:[%s4077_s1 + $0x140] sm:$0xf]  ;;  %v2136_v15 = vor.u32 %v2684_v7, %v2135_v6  ;;  %p2852_p11 = scmp.ne.s32.totalorder %s2850_s8, %s2851_s6  ;;  %p2857_p1 = scmp.lt.s32.totalorder %s2855_s11, %s2851_s6 }
  0x33   : > { %392 = vmatpush.bf16.msra.mxu1 %v1876_v36  ;;  %492 = vmatpush.bf16.msra.mxu2 %v1936_v37  ;;  %v3250_v0 = vrot.slane %v278_v58, 1  ;;  %v2666_v13 = vld [vmem:[%s4077_s1 + $0x144] sm:$0xf0]  ;;  %v2665_v16 = vld [vmem:[%s4077_s1 + $0x144] sm:$0xf]  ;;  %v2140_v17 = vor.u32 %v2683_v10, %v2137_v11  ;;  %v282_v29 = vshrl.u32 %v3219_v50, 16 }
  0x34   : > { %510 = vmatpush.bf16.msra.mxu3 %v1940_v38  ;;  %v2049_v18 = vld [vmem:[%s4077_s1 + $0x148] sm:$0xf0]  ;;  %v2127_v19 = vld [vmem:[%s4077_s1 + $0x1c0] sm:$0xf]  ;;  %v2682_v20 = vld [vmem:[%s4077_s1 + $0x1c4] sm:$0xf0]  ;;  %v2048_v21 = vor.u32 %v2666_v13, %v2047_v12  ;;  %p2853_p12 = pnand %p2852_p11, %p2967_p5  ;;  %p2858_p2 = por %p2857_p1, %p2856_p0 }
  0x35   : > { %v281_v8 = vsel %vm269_vm0, %v276_v57, %v3250_v0  ;;  %v2681_v22 = vld [vmem:[%s4077_s1 + $0x1c4] sm:$0xf]  ;;  %v2129_v23 = vld [vmem:[%s4077_s1 + $0x1c8] sm:$0xf0]  ;;  %v2039_v24 = vld [vmem:[%s4077_s1 + $0x130] sm:$0xf]  ;;  %v2052_v26 = vor.u32 %v2665_v16, %v2049_v18  ;;  %v2128_v27 = vor.u32 %v2682_v20, %v2127_v19  ;;  %v284_v54 = vor.u32 %v282_v29, %v3250_v0 }
  0x36   : > { %624 = vmatpush.bf16.msrb.mxu0 %v2072_v45  ;;  %493 = vmatmul.bf16.vlgmr.msra.gmra.mxu2 %v3198_v39  ;;  %v2664_v25 = vld [vmem:[%s4077_s1 + $0x134] sm:$0xf0]  ;;  %v2132_v28 = vor.u32 %v2681_v22, %v2129_v23  ;;  %v2663_v30 = vld [vmem:[%s4077_s1 + $0x134] sm:$0xf]  ;;  %v2041_v31 = vld [vmem:[%s4077_s1 + $0x138] sm:$0xf0]  ;;  %p2854_p13 = pneg %p2853_p12 }
  0x37   : > { %642 = vmatpush.bf16.msrb.mxu1 %v2076_v46  ;;  %772 = vmatpush.bf16.msrb.mxu2 %v2152_v47  ;;  %v2040_v32 = vor.u32 %v2664_v25, %v2039_v24  ;;  %v2119_v33 = vld [vmem:[%s4077_s1 + $0x1b0] sm:$0xf]  ;;  %v2680_v34 = vld [vmem:[%s4077_s1 + $0x1b4] sm:$0xf0]  ;;  %v2679_v35 = vld [vmem:[%s4077_s1 + $0x1b4] sm:$0xf]  ;;  %v2044_v41 = vor.u32 %v2663_v30, %v2041_v31 }
  0x38   : > { %790 = vmatpush.bf16.msrb.mxu3 %v2156_v52  ;;  %375 = vmatmul.bf16.vlgmr.msra.gmra.mxu0 %v281_v8  ;;  %v2121_v36 = vld [vmem:[%s4077_s1 + $0x1b8] sm:$0xf0]  ;;  %v2031_v37 = vld [vmem:[%s4077_s1 + $0x120] sm:$0xf]  ;;  %v2662_v38 = vld [vmem:[%s4077_s1 + $0x124] sm:$0xf0]  ;;  %v2120_v45 = vor.u32 %v2680_v34, %v2119_v33  ;;  %p2859_p3 = pnand %p2858_p2, %p2854_p13 }
  0x39   : > { %511 = vmatmul.bf16.vlgmr.msra.gmra.mxu3 %v3198_v39  ;;  %393 = vmatmul.bf16.vlgmr.msra.gmra.mxu1 %v281_v8  ;;  %v2661_v46 = vld [vmem:[%s4077_s1 + $0x124] sm:$0xf]  ;;  %v2033_v47 = vld [vmem:[%s4077_s1 + $0x128] sm:$0xf0]  ;;  %v2124_v48 = vor.u32 %v2679_v35, %v2121_v36  ;;  %v2032_v49 = vor.u32 %v2662_v38, %v2031_v37  ;;  %v2111_v51 = vld [vmem:[%s4077_s1 + $0x1a0] sm:$0xf] }
  0x3a   : > { %625 = vmatpush.bf16.msrb.mxu0 %v2064_v59  ;;  %v2678_v52 = vld [vmem:[%s4077_s1 + $0x1a4] sm:$0xf0]  ;;  %v2677_v53 = vld [vmem:[%s4077_s1 + $0x1a4] sm:$0xf]  ;;  %v2113_v55 = vld [vmem:[%s4077_s1 + $0x1a8] sm:$0xf0]  ;;  %v2036_v58 = vor.u32 %v2661_v46, %v2033_v47 }
  0x3b   : > { %643 = vmatpush.bf16.msrb.mxu1 %v2068_v1  ;;  %773 = vmatpush.bf16.msrb.mxu2 %v2144_v2  ;;  %v2023_v56 = vld [vmem:[%s4077_s1 + $0x110] sm:$0xf]  ;;  %v2660_v57 = vld [vmem:[%s4077_s1 + $0x114] sm:$0xf0]  ;;  %v2112_v59 = vor.u32 %v2678_v52, %v2111_v51  ;;  %v2659_v60 = vld [vmem:[%s4077_s1 + $0x114] sm:$0xf]  ;;  %v2116_v63 = vor.u32 %v2677_v53, %v2113_v55 }
  0x3c   : > { %791 = vmatpush.bf16.msrb.mxu3 %v2148_v4  ;;  %v2025_v61 = vld [vmem:[%s4077_s1 + $0x118] sm:$0xf0]  ;;  %v2103_v62 = vld [vmem:[%s4077_s1 + $0x190] sm:$0xf]  ;;  %v2024_v0 = vor.u32 %v2660_v57, %v2023_v56  ;;  %v2676_v1 = vld [vmem:[%s4077_s1 + $0x194] sm:$0xf0] }
  0x3d   : > { %v2675_v2 = vld [vmem:[%s4077_s1 + $0x194] sm:$0xf]  ;;  %v2105_v3 = vld [vmem:[%s4077_s1 + $0x198] sm:$0xf0]  ;;  %v2015_v4 = vld [vmem:[%s4077_s1 + $0x100] sm:$0xf]  ;;  %v2028_v7 = vor.u32 %v2659_v60, %v2025_v61  ;;  %v2104_v11 = vor.u32 %v2676_v1, %v2103_v62 }
  0x3e   : > { %626 = vmatpush.bf16.msrb.mxu0 %v2056_v9  ;;  %v2658_v5 = vld [vmem:[%s4077_s1 + $0x104] sm:$0xf0]  ;;  %v2657_v6 = vld [vmem:[%s4077_s1 + $0x104] sm:$0xf]  ;;  %v2017_v8 = vld [vmem:[%s4077_s1 + $0x108] sm:$0xf0] }
  0x3f   : > { %644 = vmatpush.bf16.msrb.mxu1 %v2060_v14  ;;  %774 = vmatpush.bf16.msrb.mxu2 %v2136_v15  ;;  %v2231_v9 = vld [vmem:[%s4077_s1 + $0x270] sm:$0xf]  ;;  %v2704_v10 = vld [vmem:[%s4077_s1 + $0x274] sm:$0xf0]  ;;  %v2095_v12 = vld [vmem:[%s4077_s1 + $0x180] sm:$0xf]  ;;  %v2108_v15 = vor.u32 %v2675_v2, %v2105_v3  ;;  %v2016_v16 = vor.u32 %v2658_v5, %v2015_v4  ;;  %v2020_v24 = vor.u32 %v2657_v6, %v2017_v8 }
  0x40   : > { %792 = vmatpush.bf16.msrb.mxu3 %v2140_v17  ;;  %v2674_v13 = vld [vmem:[%s4077_s1 + $0x184] sm:$0xf0]  ;;  %v2673_v14 = vld [vmem:[%s4077_s1 + $0x184] sm:$0xf]  ;;  %v2097_v17 = vld [vmem:[%s4077_s1 + $0x188] sm:$0xf0]  ;;  %v2232_v20 = vor.u32 %v2704_v10, %v2231_v9 }
  0x41   : > { %v2703_v18 = vld [vmem:[%s4077_s1 + $0x274] sm:$0xf]  ;;  %v2233_v19 = vld [vmem:[%s4077_s1 + $0x278] sm:$0xf0]  ;;  %v2720_v22 = vld [vmem:[%s4077_s1 + $0x2f4] sm:$0xf0] }
  0x42   : > { %627 = vmatpush.bf16.msrb.mxu0 %v2048_v21  ;;  %v2311_v21 = vld [vmem:[%s4077_s1 + $0x2f0] sm:$0xf]  ;;  %v2719_v23 = vld [vmem:[%s4077_s1 + $0x2f4] sm:$0xf]  ;;  %v2313_v25 = vld [vmem:[%s4077_s1 + $0x2f8] sm:$0xf0]  ;;  %v2236_v31 = vor.u32 %v2703_v18, %v2233_v19 }
  0x43   : > { %645 = vmatpush.bf16.msrb.mxu1 %v2052_v26  ;;  %775 = vmatpush.bf16.msrb.mxu2 %v2128_v27  ;;  %v2223_v26 = vld [vmem:[%s4077_s1 + $0x260] sm:$0xf]  ;;  %v2702_v27 = vld [vmem:[%s4077_s1 + $0x264] sm:$0xf0]  ;;  %v687_v29 = vrot.slane %v3198_v39, 3  ;;  %v3430_v30 = vrot.slane %v3201_v40, 3  ;;  %v2312_v33 = vor.u32 %v2720_v22, %v2311_v21  ;;  %v2316_v36 = vor.u32 %v2719_v23, %v2313_v25 }
  0x44   : > { %793 = vmatpush.bf16.msrb.mxu3 %v2132_v28  ;;  %v2096_v28 = vor.u32 %v2674_v13, %v2095_v12  ;;  %v2701_v34 = vld [vmem:[%s4077_s1 + $0x264] sm:$0xf]  ;;  %v2225_v35 = vld [vmem:[%s4077_s1 + $0x268] sm:$0xf0]  ;;  %v2224_v37 = vor.u32 %v2702_v27, %v2223_v26  ;;  %v2303_v38 = vld [vmem:[%s4077_s1 + $0x2e0] sm:$0xf] }
  0x45   : > { %v3446_v46 = vrot.slane %v3219_v50, 1  ;;  %v2717_v47 = vld [vmem:[%s4077_s1 + $0x2e4] sm:$0xf]  ;;  %v2305_v51 = vld [vmem:[%s4077_s1 + $0x2e8] sm:$0xf0]  ;;  %v833_v3 = vrot.slane %v273_v44, 4 }
  0x46   : > { %628 = vmatpush.bf16.msrb.mxu0 %v2040_v32  ;;  %498 = vmatmul.bf16.gmra.mxu2 %v3219_v50  ;;  %v2100_v32 = vor.u32 %v2673_v14, %v2097_v17  ;;  %v2215_v52 = vld [vmem:[%s4077_s1 + $0x250] sm:$0xf]  ;;  %v2217_v55 = vld [vmem:[%s4077_s1 + $0x258] sm:$0xf0]  ;;  %v2716_v57 = vld [vmem:[%s4077_s1 + $0x2d4] sm:$0xf0]  ;;  %v2308_v61 = vor.u32 %v2717_v47, %v2305_v51 }
  0x47   : > { %646 = vmatpush.bf16.msrb.mxu1 %v2044_v41  ;;  %776 = vmatpush.bf16.msrb.mxu2 %v2120_v45  ;;  %v2718_v41 = vld [vmem:[%s4077_s1 + $0x2e4] sm:$0xf0]  ;;  %v539_v45 = vrot.slane %v3198_v39, 1  ;;  %v2295_v56 = vld [vmem:[%s4077_s1 + $0x2d0] sm:$0xf]  ;;  %v836_v4 = vshrl.u32 %v3201_v40, 16 }
  0x48   : > { %794 = vmatpush.bf16.msrb.mxu3 %v2124_v48  ;;  %380 = vmatmul.bf16.gmra.mxu0 %v284_v54  ;;  %v689_v48 = vsel %vm686_vm1, %v687_v29, %v3430_v30  ;;  %v2304_v53 = vor.u32 %v2718_v41, %v2303_v38  ;;  %v2698_v2 = vld [vmem:[%s4077_s1 + $0x244] sm:$0xf0]  ;;  %v2296_v5 = vor.u32 %v2716_v57, %v2295_v56  ;;  %v2697_v6 = vld [vmem:[%s4077_s1 + $0x244] sm:$0xf]  ;;  %v839_v8 = vshll.u32 %v3201_v40, 16 }
  0x49   : > { %516 = vmatmul.bf16.gmra.mxu3 %v3219_v50  ;;  %398 = vmatmul.bf16.gmra.mxu1 %v284_v54  ;;  %v2700_v50 = vld [vmem:[%s4077_s1 + $0x254] sm:$0xf0]  ;;  %v2699_v54 = vld [vmem:[%s4077_s1 + $0x254] sm:$0xf]  ;;  %v541_v60 = vsel %vm538_vm2, %v539_v45, %v3446_v46  ;;  %v2714_v44 = vld [vmem:[%s4077_s1 + $0x2c4] sm:$0xf0] }
  0x4a   : > { %629 = vmatpush.bf16.msrb.mxu0 %v2032_v49  ;;  %v2228_v49 = vor.u32 %v2701_v34, %v2225_v35  ;;  %v2216_v62 = vor.u32 %v2700_v50, %v2215_v52  ;;  %v2220_v1 = vor.u32 %v2699_v54, %v2217_v55  ;;  %v838_v10 = vrot.slane %v836_v4, 3  ;;  %v2289_v13 = vld [vmem:[%s4077_s1 + $0x2c8] sm:$0xf0]  ;;  %v2199_v17 = vld [vmem:[%s4077_s1 + $0x230] sm:$0xf] }
  0x4b   : > { %647 = vmatpush.bf16.msrb.mxu1 %v2036_v58  ;;  %777 = vmatpush.bf16.msrb.mxu2 %v2112_v59  ;;  %v2788_v58 = vunpack.c.h.b16 %v3198_v39  ;;  %v832_v59 = vrot.slane %v271_v43, 3  ;;  %v2207_v43 = vld [vmem:[%s4077_s1 + $0x240] sm:$0xf]  ;;  %v2696_v18 = vld [vmem:[%s4077_s1 + $0x234] sm:$0xf0]  ;;  %vm1131_vm4 = vcmask 1045504  }
  0x4c   : > { %795 = vmatpush.bf16.msrb.mxu3 %v2116_v63  ;;  %v2715_v63 = vld [vmem:[%s4077_s1 + $0x2d4] sm:$0xf]  ;;  %v2287_v39 = vld [vmem:[%s4077_s1 + $0x2c0] sm:$0xf]  ;;  %v2208_v12 = vor.u32 %v2698_v2, %v2207_v43  ;;  %vm831_vm3 = vsmask.f32 4352  ;;  %v2200_v26 = vor.u32 %v2696_v18, %v2199_v17 }
  0x4d   : > { %v3502_v9 = vpack.c.b16 %v3207_v42, %v2788_v58  ;;  %v2713_v42 = vld [vmem:[%s4077_s1 + $0x2c4] sm:$0xf]  ;;  %v834_v14 = vor.u32 %v833_v3, %v832_v59  ;;  %v2288_v19 = vor.u32 %v2714_v44, %v2287_v39  ;;  %v2201_v21 = vld [vmem:[%s4077_s1 + $0x238] sm:$0xf0]  ;;  %v2279_v23 = vld [vmem:[%s4077_s1 + $0x2b0] sm:$0xf]  ;;  %v3632_v39 = vunpack.c.h.b16 %v3201_v40 }
  0x4e   : > { %630 = vmatpush.bf16.msrb.mxu0 %v2024_v0  ;;  %v2297_v0 = vld [vmem:[%s4077_s1 + $0x2d8] sm:$0xf0]  ;;  %v2292_v25 = vor.u32 %v2713_v42, %v2289_v13  ;;  %v2711_v29 = vld [vmem:[%s4077_s1 + $0x2b4] sm:$0xf]  ;;  %v2694_v34 = vld [vmem:[%s4077_s1 + $0x224] sm:$0xf0] }
  0x4f   : > { %648 = vmatpush.bf16.msrb.mxu1 %v2028_v7  ;;  %778 = vmatpush.bf16.msrb.mxu2 %v2104_v11  ;;  %v2209_v7 = vld [vmem:[%s4077_s1 + $0x248] sm:$0xf0]  ;;  %v2300_v11 = vor.u32 %v2715_v63, %v2297_v0  ;;  %v2693_v35 = vld [vmem:[%s4077_s1 + $0x224] sm:$0xf]  ;;  %v2710_v38 = vld [vmem:[%s4077_s1 + $0x2a4] sm:$0xf0] }
  0x50   : > { %796 = vmatpush.bf16.msrb.mxu3 %v2108_v15  ;;  %v841_v15 = vrot.slane %v839_v8, 4  ;;  %v2709_v47 = vld [vmem:[%s4077_s1 + $0x2a4] sm:$0xf]  ;;  %v2183_v52 = vld [vmem:[%s4077_s1 + $0x210] sm:$0xf]  ;;  %vm1584_vm6 = vcmask 1041408  }
  0x51   : > { %v2692_v50 = vld [vmem:[%s4077_s1 + $0x214] sm:$0xf0]  ;;  %v2185_v54 = vld [vmem:[%s4077_s1 + $0x218] sm:$0xf0]  ;;  %v2263_v55 = vld [vmem:[%s4077_s1 + $0x290] sm:$0xf] }
  0x52   : > { %631 = vmatpush.bf16.msrb.mxu0 %v2016_v16  ;;  %v2212_v16 = vor.u32 %v2697_v6, %v2209_v7  ;;  %v3528_v22 = vor.u32 %v841_v15, %v838_v10  ;;  %v2708_v56 = vld [vmem:[%s4077_s1 + $0x294] sm:$0xf0]  ;;  %v2707_v58 = vld [vmem:[%s4077_s1 + $0x294] sm:$0xf]  ;;  %v2265_v59 = vld [vmem:[%s4077_s1 + $0x298] sm:$0xf0] }
  0x53   : > { %649 = vmatpush.bf16.msrb.mxu1 %v2020_v24  ;;  %779 = vmatpush.bf16.msrb.mxu2 %v2096_v28  ;;  %v2712_v24 = vld [vmem:[%s4077_s1 + $0x2b4] sm:$0xf0]  ;;  %v2689_v63 = vld [vmem:[%s4077_s1 + $0x204] sm:$0xf]  ;;  %v2255_v43 = vld [vmem:[%s4077_s1 + $0x280] sm:$0xf]  ;;  %v2268_v6 = vor.u32 %v2707_v58, %v2265_v59 }
  0x54   : > { %797 = vmatpush.bf16.msrb.mxu3 %v2100_v32  ;;  %v3537_v27 = vsel %vm831_vm3, %v834_v14, %v3528_v22  ;;  %v2280_v32 = vor.u32 %v2712_v24, %v2279_v23  ;;  %v2706_v2 = vld [vmem:[%s4077_s1 + $0x284] sm:$0xf0]  ;;  %v2705_v3 = vld [vmem:[%s4077_s1 + $0x284] sm:$0xf]  ;;  %v2391_v4 = vld [vmem:[%s4077_s1 + $0x370] sm:$0xf] }
  0x55   : > { %v2736_v7 = vld [vmem:[%s4077_s1 + $0x374] sm:$0xf0]  ;;  %v2735_v8 = vld [vmem:[%s4077_s1 + $0x374] sm:$0xf]  ;;  %v2256_v40 = vor.u32 %v2706_v2, %v2255_v43  ;;  %v2473_v15 = vld [vmem:[%s4077_s1 + $0x3f8] sm:$0xf0] }
  0x56   : > { %926 = vmatpush.bf16.msra.mxu0 %v2232_v20  ;;  %780 = vmatmul.bf16.vlgmr.msrb.gmra.mxu2 %v689_v48  ;;  %v2695_v20 = vld [vmem:[%s4077_s1 + $0x234] sm:$0xf]  ;;  %v2752_v42 = vld [vmem:[%s4077_s1 + $0x3f4] sm:$0xf0]  ;;  %v2392_v17 = vor.u32 %v2736_v7, %v2391_v4  ;;  %v2734_v23 = vld [vmem:[%s4077_s1 + $0x364] sm:$0xf0] }
  0x57   : > { %944 = vmatpush.bf16.msra.mxu1 %v2236_v31  ;;  %1069 = vmatpush.bf16.msra.mxu2 %v2312_v33  ;;  %v2204_v28 = vor.u32 %v2695_v20, %v2201_v21  ;;  %v2281_v31 = vld [vmem:[%s4077_s1 + $0x2b8] sm:$0xf0]  ;;  %v2191_v33 = vld [vmem:[%s4077_s1 + $0x220] sm:$0xf]  ;;  %v2751_v14 = vld [vmem:[%s4077_s1 + $0x3f4] sm:$0xf] }
  0x58   : > { %1087 = vmatpush.bf16.msra.mxu3 %v2316_v36  ;;  %632 = vmatmul.bf16.vlgmr.msrb.gmra.mxu0 %v541_v60  ;;  %v2193_v36 = vld [vmem:[%s4077_s1 + $0x228] sm:$0xf0]  ;;  %v2284_v41 = vor.u32 %v2711_v29, %v2281_v31  ;;  %v2192_v45 = vor.u32 %v2694_v34, %v2191_v33  ;;  %v2733_v24 = vld [vmem:[%s4077_s1 + $0x364] sm:$0xf]  ;;  %v2750_v29 = vld [vmem:[%s4077_s1 + $0x3e4] sm:$0xf0] }
  0x59   : > { %798 = vmatmul.bf16.vlgmr.msrb.gmra.mxu3 %v689_v48  ;;  %650 = vmatmul.bf16.vlgmr.msrb.gmra.mxu1 %v541_v60  ;;  %v2273_v48 = vld [vmem:[%s4077_s1 + $0x2a8] sm:$0xf0]  ;;  %v2184_v60 = vor.u32 %v2692_v50, %v2183_v52  ;;  %v2749_v31 = vld [vmem:[%s4077_s1 + $0x3e4] sm:$0xf]  ;;  %vm1276_vm5 = vsmask.f32 5376 }
  0x5a   : > { %927 = vmatpush.bf16.msra.mxu0 %v2224_v37  ;;  %v2271_v37 = vld [vmem:[%s4077_s1 + $0x2a0] sm:$0xf]  ;;  %v2276_v57 = vor.u32 %v2709_v47, %v2273_v48  ;;  %v2465_v34 = vld [vmem:[%s4077_s1 + $0x3e8] sm:$0xf0]  ;;  %v2455_v47 = vld [vmem:[%s4077_s1 + $0x3d0] sm:$0xf] }
  0x5b   : > { %945 = vmatpush.bf16.msra.mxu1 %v2228_v49  ;;  %1070 = vmatpush.bf16.msra.mxu2 %v2304_v53  ;;  %v2196_v49 = vor.u32 %v2693_v35, %v2193_v36  ;;  %v2272_v51 = vor.u32 %v2710_v38, %v2271_v37  ;;  %v2691_v53 = vld [vmem:[%s4077_s1 + $0x214] sm:$0xf]  ;;  %v2375_v35 = vld [vmem:[%s4077_s1 + $0x350] sm:$0xf]  ;;  %v2732_v36 = vld [vmem:[%s4077_s1 + $0x354] sm:$0xf0]  ;;  %v2468_v50 = vor.u32 %v2749_v31, %v2465_v34 }
  0x5c   : > { %1088 = vmatpush.bf16.msra.mxu3 %v2308_v61  ;;  %v2175_v61 = vld [vmem:[%s4077_s1 + $0x200] sm:$0xf]  ;;  %v2188_v0 = vor.u32 %v2691_v53, %v2185_v54  ;;  %v2731_v38 = vld [vmem:[%s4077_s1 + $0x354] sm:$0xf]  ;;  %v2748_v53 = vld [vmem:[%s4077_s1 + $0x3d4] sm:$0xf0] }
  0x5d   : > { %v2747_v54 = vld [vmem:[%s4077_s1 + $0x3d4] sm:$0xf]  ;;  %v2729_v43 = vld [vmem:[%s4077_s1 + $0x344] sm:$0xf]  ;;  %v2369_v2 = vld [vmem:[%s4077_s1 + $0x348] sm:$0xf0] }
  0x5e   : > { %928 = vmatpush.bf16.msra.mxu0 %v2216_v62  ;;  %v2690_v62 = vld [vmem:[%s4077_s1 + $0x204] sm:$0xf0]  ;;  %v2431_v31 = vld [vmem:[%s4077_s1 + $0x3a0] sm:$0xf]  ;;  %v2433_v34 = vld [vmem:[%s4077_s1 + $0x3a8] sm:$0xf0] }
  0x5f   : > { %946 = vmatpush.bf16.msra.mxu1 %v2220_v1  ;;  %1071 = vmatpush.bf16.msra.mxu2 %v2296_v5  ;;  %v2264_v1 = vor.u32 %v2708_v56, %v2263_v55  ;;  %v227_v5 = vld [vmem:[%s3186_s17 + $0x10] sm:$0x3]  ;;  %v2176_v10 = vor.u32 %v2690_v62, %v2175_v61  ;;  %v2457_v56 = vld [vmem:[%s4077_s1 + $0x3d8] sm:$0xf0]  ;;  %v2376_v61 = vor.u32 %v2732_v36, %v2375_v35 }
  0x60   : > { %1089 = vmatpush.bf16.msra.mxu3 %v2300_v11  ;;  %v1129_v44 = vunpack.c.l.b16 %v227_v5  ;;  %v2257_v11 = vld [vmem:[%s4077_s1 + $0x288] sm:$0xf0]  ;;  %v2460_v4 = vor.u32 %v2747_v54, %v2457_v56  ;;  %v2447_v5 = vld [vmem:[%s4077_s1 + $0x3c0] sm:$0xf]  ;;  %v986_v35 = vpack.c.b16 %v3632_v39, %v3632_v39 }
  0x61   : > { %v2260_v20 = vor.u32 %v2705_v3, %v2257_v11  ;;  %v2359_v11 = vld [vmem:[%s4077_s1 + $0x330] sm:$0xf] }
  0x62   : > { %929 = vmatpush.bf16.msra.mxu0 %v2208_v12  ;;  %v2471_v12 = vld [vmem:[%s4077_s1 + $0x3f0] sm:$0xf] }
  0x63   : > { %947 = vmatpush.bf16.msra.mxu1 %v2212_v16  ;;  %1072 = vmatpush.bf16.msra.mxu2 %v2288_v19  ;;  %v3650_v16 = vpack.c.b16 %v1129_v44, %v3632_v39  ;;  %v2383_v19 = vld [vmem:[%s4077_s1 + $0x360] sm:$0xf]  ;;  %v2472_v21 = vor.u32 %v2752_v42, %v2471_v12  ;;  %v2728_v42 = vld [vmem:[%s4077_s1 + $0x334] sm:$0xf0]  ;;  %v2723_v39 = vld [vmem:[%s4077_s1 + $0x314] sm:$0xf] }
  0x64   : > { %1090 = vmatpush.bf16.msra.mxu3 %v2292_v25  ;;  %v2385_v25 = vld [vmem:[%s4077_s1 + $0x368] sm:$0xf0] }
  0x65   : > { %v2388_v33 = vor.u32 %v2733_v24, %v2385_v25  ;;  %v3693_v48 = vrot.slane %v3650_v16, 2  ;;  %v1286_v52 = vshrl.u32 %v3650_v16, 16  ;;  %v1289_v55 = vshll.u32 %v3650_v16, 16  ;;  %v2351_v24 = vld [vmem:[%s4077_s1 + $0x320] sm:$0xf] }
  0x66   : > { %930 = vmatpush.bf16.msra.mxu0 %v2200_v26  ;;  %785 = vmatmul.bf16.gmra.mxu2 %v3430_v30  ;;  %v2476_v26 = vor.u32 %v2751_v14, %v2473_v15  ;;  %v2439_v15 = vld [vmem:[%s4077_s1 + $0x3b0] sm:$0xf]  ;;  %v2726_v25 = vld [vmem:[%s4077_s1 + $0x324] sm:$0xf0] }
  0x67   : > { %948 = vmatpush.bf16.msra.mxu1 %v2204_v28  ;;  %1073 = vmatpush.bf16.msra.mxu2 %v2280_v32  ;;  %v2463_v28 = vld [vmem:[%s4077_s1 + $0x3e0] sm:$0xf]  ;;  %v2384_v32 = vor.u32 %v2734_v23, %v2383_v19  ;;  %v2441_v19 = vld [vmem:[%s4077_s1 + $0x3b8] sm:$0xf0]  ;;  %v2352_v36 = vor.u32 %v2726_v25, %v2351_v24  ;;  %v1435_v24 = vrot.slane %v3502_v9, 3  ;;  %v3890_v25 = vrot.slane %v3650_v16, 3 }
  0x68   : > { %1091 = vmatpush.bf16.msra.mxu3 %v2284_v41  ;;  %637 = vmatmul.bf16.gmra.mxu0 %v3446_v46  ;;  %v2464_v37 = vor.u32 %v2750_v29, %v2463_v28  ;;  %v2377_v41 = vld [vmem:[%s4077_s1 + $0x358] sm:$0xf0]  ;;  %v2725_v28 = vld [vmem:[%s4077_s1 + $0x324] sm:$0xf]  ;;  %v2353_v29 = vld [vmem:[%s4077_s1 + $0x328] sm:$0xf0] }
  0x69   : > { %803 = vmatmul.bf16.gmra.mxu3 %v3430_v30  ;;  %v2177_v30 = vld [vmem:[%s4077_s1 + $0x208] sm:$0xf0]  ;;  %655 = vmatmul.bf16.gmra.mxu1 %v3446_v46  ;;  %v2393_v46 = vld [vmem:[%s4077_s1 + $0x378] sm:$0xf0]  ;;  %v2380_v62 = vor.u32 %v2731_v38, %v2377_v41  ;;  %v2343_v38 = vld [vmem:[%s4077_s1 + $0x310] sm:$0xf]  ;;  %v1437_v16 = vsel %vm686_vm1, %v1435_v24, %v3890_v25 }
  0x6a   : > { %931 = vmatpush.bf16.msra.mxu0 %v2192_v45  ;;  %v2180_v13 = vor.u32 %v2689_v63, %v2177_v30  ;;  %v2396_v18 = vor.u32 %v2735_v8, %v2393_v46  ;;  %v1132_v45 = vrot.slane %v3502_v9, 2  ;;  %v2367_v63 = vld [vmem:[%s4077_s1 + $0x340] sm:$0xf]  ;;  %v2456_v30 = vor.u32 %v2748_v53, %v2455_v47  ;;  %v2745_v8 = vld [vmem:[%s4077_s1 + $0x3c4] sm:$0xf] }
  0x6b   : > { %949 = vmatpush.bf16.msra.mxu1 %v2196_v49  ;;  %1074 = vmatpush.bf16.msra.mxu2 %v2272_v51  ;;  %v1278_v49 = vshrl.u32 %v3502_v9, 16  ;;  %v1281_v51 = vshll.u32 %v3502_v9, 16  ;;  %v2449_v46 = vld [vmem:[%s4077_s1 + $0x3c8] sm:$0xf0]  ;;  %v2724_v41 = vld [vmem:[%s4077_s1 + $0x314] sm:$0xf0] }
  0x6c   : > { %1092 = vmatpush.bf16.msra.mxu3 %v2276_v57  ;;  %v3709_v57 = vsel %vm1131_vm4, %v1132_v45, %v3693_v48  ;;  %v2452_v14 = vor.u32 %v2745_v8, %v2449_v46  ;;  %v2425_v53 = vld [vmem:[%s4077_s1 + $0x398] sm:$0xf0]  ;;  %v2344_v54 = vor.u32 %v2724_v41, %v2343_v38  ;;  %v2757_v38 = vld [vmem:[%s4077_s1 + $0x424] sm:$0xf]  ;;  %v2513_v41 = vld [vmem:[%s4077_s1 + $0x428] sm:$0xf0] }
  0x6d   : > { %v1280_v58 = vrot.slane %v1278_v49, 2  ;;  %v1283_v59 = vrot.slane %v1281_v51, 3  ;;  %v2345_v49 = vld [vmem:[%s4077_s1 + $0x318] sm:$0xf0]  ;;  %v2423_v51 = vld [vmem:[%s4077_s1 + $0x390] sm:$0xf] }
  0x6e   : > { %932 = vmatpush.bf16.msra.mxu0 %v2184_v60  ;;  %v1288_v60 = vrot.slane %v1286_v52, 2  ;;  %v2740_v52 = vld [vmem:[%s4077_s1 + $0x394] sm:$0xf0]  ;;  %v2348_v56 = vor.u32 %v2723_v39, %v2345_v49  ;;  %v2516_v39 = vor.u32 %v2757_v38, %v2513_v41 }
  0x6f   : > { %950 = vmatpush.bf16.msra.mxu1 %v2188_v0  ;;  %1075 = vmatpush.bf16.msra.mxu2 %v2264_v1  ;;  %v2730_v0 = vld [vmem:[%s4077_s1 + $0x344] sm:$0xf0]  ;;  %v1291_v1 = vrot.slane %v1289_v55, 3  ;;  %v1284_v3 = vor.u32 %v1283_v59, %v1280_v58  ;;  %v2335_v55 = vld [vmem:[%s4077_s1 + $0x300] sm:$0xf] }
  0x70   : > { %1093 = vmatpush.bf16.msra.mxu3 %v2268_v6  ;;  %v2746_v6 = vld [vmem:[%s4077_s1 + $0x3c4] sm:$0xf0]  ;;  %v2368_v44 = vor.u32 %v2730_v0, %v2367_v63  ;;  %v2721_v59 = vld [vmem:[%s4077_s1 + $0x304] sm:$0xf]  ;;  %v2415_v63 = vld [vmem:[%s4077_s1 + $0x380] sm:$0xf] }
  0x71   : > { %v3731_v7 = vor.u32 %v1291_v1, %v1288_v60  ;;  %v2722_v58 = vld [vmem:[%s4077_s1 + $0x304] sm:$0xf0]  ;;  %v2337_v60 = vld [vmem:[%s4077_s1 + $0x308] sm:$0xf0]  ;;  %v2551_v0 = vld [vmem:[%s4077_s1 + $0x470] sm:$0xf] }
  0x72   : > { %933 = vmatpush.bf16.msra.mxu0 %v2176_v10  ;;  %v2372_v10 = vor.u32 %v2729_v43, %v2369_v2  ;;  %v2768_v1 = vld [vmem:[%s4077_s1 + $0x474] sm:$0xf0]  ;;  %v2737_v43 = vld [vmem:[%s4077_s1 + $0x384] sm:$0xf]  ;;  %v2417_v2 = vld [vmem:[%s4077_s1 + $0x388] sm:$0xf0] }
  0x73   : > { %951 = vmatpush.bf16.msra.mxu1 %v2180_v13  ;;  %1076 = vmatpush.bf16.msra.mxu2 %v2256_v40  ;;  %v3746_v12 = vsel %vm1276_vm5, %v1284_v3, %v3731_v7  ;;  %v2727_v13 = vld [vmem:[%s4077_s1 + $0x334] sm:$0xf]  ;;  %v2361_v40 = vld [vmem:[%s4077_s1 + $0x338] sm:$0xf0]  ;;  %v2336_v3 = vor.u32 %v2722_v58, %v2335_v55  ;;  %v2420_v46 = vor.u32 %v2737_v43, %v2417_v2  ;;  %v2497_v58 = vld [vmem:[%s4077_s1 + $0x408] sm:$0xf0] }
  0x74   : > { %1094 = vmatpush.bf16.msra.mxu3 %v2260_v20  ;;  %v2360_v20 = vor.u32 %v2728_v42, %v2359_v11  ;;  %v2545_v42 = vld [vmem:[%s4077_s1 + $0x468] sm:$0xf0] }
  0x76   : > { %1217 = vmatpush.bf16.msrb.mxu0 %v2392_v17  ;;  %1077 = vmatmul.bf16.vlgmr.msra.gmra.mxu2 %v3502_v9  ;;  %v2744_v17 = vld [vmem:[%s4077_s1 + $0x3b4] sm:$0xf0] }
  0x77   : > { %1235 = vmatpush.bf16.msrb.mxu1 %v2396_v18  ;;  %1376 = vmatpush.bf16.msrb.mxu2 %v2472_v21  ;;  %v2743_v18 = vld [vmem:[%s4077_s1 + $0x3b4] sm:$0xf]  ;;  %v2364_v21 = vor.u32 %v2727_v13, %v2361_v40  ;;  %v2440_v23 = vor.u32 %v2744_v17, %v2439_v15  ;;  %v2535_v40 = vld [vmem:[%s4077_s1 + $0x450] sm:$0xf] }
  0x78   : > { %1394 = vmatpush.bf16.msrb.mxu3 %v2476_v26  ;;  %934 = vmatmul.bf16.vlgmr.msra.gmra.mxu0 %v3537_v27  ;;  %v2444_v26 = vor.u32 %v2743_v18, %v2441_v19  ;;  %v2763_v18 = vld [vmem:[%s4077_s1 + $0x454] sm:$0xf]  ;;  %v2537_v19 = vld [vmem:[%s4077_s1 + $0x458] sm:$0xf0] }
  0x79   : > { %1095 = vmatmul.bf16.vlgmr.msra.gmra.mxu3 %v3502_v9  ;;  %952 = vmatmul.bf16.vlgmr.msra.gmra.mxu1 %v3537_v27  ;;  %v2448_v27 = vor.u32 %v2746_v6, %v2447_v5  ;;  %v2340_v5 = vor.u32 %v2721_v59, %v2337_v60  ;;  %v2552_v6 = vor.u32 %v2768_v1, %v2551_v0  ;;  %v2760_v9 = vld [vmem:[%s4077_s1 + $0x434] sm:$0xf0] }
  0x7a   : > { %1218 = vmatpush.bf16.msrb.mxu0 %v2384_v32  ;;  %v2742_v32 = vld [vmem:[%s4077_s1 + $0x3a4] sm:$0xf0] }
  0x7b   : > { %1236 = vmatpush.bf16.msrb.mxu1 %v2388_v33  ;;  %1377 = vmatpush.bf16.msrb.mxu2 %v2464_v37  ;;  %v2741_v33 = vld [vmem:[%s4077_s1 + $0x3a4] sm:$0xf]  ;;  %v2356_v37 = vor.u32 %v2725_v28, %v2353_v29  ;;  %v2432_v45 = vor.u32 %v2742_v32, %v2431_v31  ;;  %v2529_v29 = vld [vmem:[%s4077_s1 + $0x448] sm:$0xf0]  ;;  %v2519_v31 = vld [vmem:[%s4077_s1 + $0x430] sm:$0xf] }
  0x7c   : > { %1395 = vmatpush.bf16.msrb.mxu3 %v2468_v50  ;;  %v2436_v47 = vor.u32 %v2741_v33, %v2433_v34  ;;  %v2739_v50 = vld [vmem:[%s4077_s1 + $0x394] sm:$0xf]  ;;  %v2761_v28 = vld [vmem:[%s4077_s1 + $0x444] sm:$0xf]  ;;  %v2520_v32 = vor.u32 %v2760_v9, %v2519_v31  ;;  %v2521_v34 = vld [vmem:[%s4077_s1 + $0x438] sm:$0xf0] }
  0x7d   : > { %v2759_v33 = vld [vmem:[%s4077_s1 + $0x434] sm:$0xf] }
  0x7e   : > { %1219 = vmatpush.bf16.msrb.mxu0 %v2376_v61  ;;  %v2424_v61 = vor.u32 %v2740_v52, %v2423_v51  ;;  %v2755_v51 = vld [vmem:[%s4077_s1 + $0x414] sm:$0xf]  ;;  %v2505_v52 = vld [vmem:[%s4077_s1 + $0x418] sm:$0xf0] }
  0x7f   : > { %1237 = vmatpush.bf16.msrb.mxu1 %v2380_v62  ;;  %1378 = vmatpush.bf16.msrb.mxu2 %v2456_v30  ;;  %v2428_v62 = vor.u32 %v2739_v50, %v2425_v53  ;;  %v2738_v30 = vld [vmem:[%s4077_s1 + $0x384] sm:$0xf0]  ;;  %v2495_v50 = vld [vmem:[%s4077_s1 + $0x400] sm:$0xf] }
  0x80   : > { %1396 = vmatpush.bf16.msrb.mxu3 %v2460_v4  ;;  %v2767_v4 = vld [vmem:[%s4077_s1 + $0x474] sm:$0xf]  ;;  %v2416_v8 = vor.u32 %v2738_v30, %v2415_v63  ;;  %v2754_v53 = vld [vmem:[%s4077_s1 + $0x404] sm:$0xf0] }
  0x81   : > { %v2496_v55 = vor.u32 %v2754_v53, %v2495_v50 }
  0x82   : > { %1220 = vmatpush.bf16.msrb.mxu0 %v2368_v44  ;;  %v2543_v44 = vld [vmem:[%s4077_s1 + $0x460] sm:$0xf] }
  0x83   : > { %1238 = vmatpush.bf16.msrb.mxu1 %v2372_v10  ;;  %1379 = vmatpush.bf16.msrb.mxu2 %v2448_v27  ;;  %v2766_v10 = vld [vmem:[%s4077_s1 + $0x464] sm:$0xf0]  ;;  %v2765_v27 = vld [vmem:[%s4077_s1 + $0x464] sm:$0xf] }
  0x84   : > { %1397 = vmatpush.bf16.msrb.mxu3 %v2452_v14  ;;  %v2544_v13 = vor.u32 %v2766_v10, %v2543_v44  ;;  %v2764_v14 = vld [vmem:[%s4077_s1 + $0x454] sm:$0xf0]  ;;  %v2548_v15 = vor.u32 %v2765_v27, %v2545_v42 }
  0x85   : > { %v2536_v17 = vor.u32 %v2764_v14, %v2535_v40 }
  0x86   : > { %1221 = vmatpush.bf16.msrb.mxu0 %v2360_v20  ;;  %1082 = vmatmul.bf16.gmra.mxu2 %v986_v35  ;;  %v2527_v20 = vld [vmem:[%s4077_s1 + $0x440] sm:$0xf] }
  0x87   : > { %1239 = vmatpush.bf16.msrb.mxu1 %v2364_v21  ;;  %1380 = vmatpush.bf16.msrb.mxu2 %v2440_v23  ;;  %v2762_v21 = vld [vmem:[%s4077_s1 + $0x444] sm:$0xf0]  ;;  %v2540_v23 = vor.u32 %v2763_v18, %v2537_v19 }
  0x88   : > { %1398 = vmatpush.bf16.msrb.mxu3 %v2444_v26  ;;  %939 = vmatmul.bf16.gmra.mxu0 %v3528_v22  ;;  %v2528_v26 = vor.u32 %v2762_v21, %v2527_v20 }
  0x89   : > { %1100 = vmatmul.bf16.gmra.mxu3 %v986_v35  ;;  %957 = vmatmul.bf16.gmra.mxu1 %v3528_v22  ;;  %v2553_v22 = vld [vmem:[%s4077_s1 + $0x478] sm:$0xf0]  ;;  %v2511_v35 = vld [vmem:[%s4077_s1 + $0x420] sm:$0xf] }
  0x8a   : > { %1222 = vmatpush.bf16.msrb.mxu0 %v2352_v36  ;;  %v2556_v11 = vor.u32 %v2767_v4, %v2553_v22  ;;  %v2524_v36 = vor.u32 %v2759_v33, %v2521_v34 }
  0x8b   : > { %1240 = vmatpush.bf16.msrb.mxu1 %v2356_v37  ;;  %1381 = vmatpush.bf16.msrb.mxu2 %v2432_v45  ;;  %v2503_v45 = vld [vmem:[%s4077_s1 + $0x410] sm:$0xf] }
  0x8c   : > { %1399 = vmatpush.bf16.msrb.mxu3 %v2436_v47  ;;  %v2756_v47 = vld [vmem:[%s4077_s1 + $0x414] sm:$0xf0] }
  0x8d   : > { %v2504_v49 = vor.u32 %v2756_v47, %v2503_v45 }
  0x8e   : > { %1223 = vmatpush.bf16.msrb.mxu0 %v2344_v54  ;;  %v2508_v54 = vor.u32 %v2755_v51, %v2505_v52 }
  0x8f   : > { %1241 = vmatpush.bf16.msrb.mxu1 %v2348_v56  ;;  %1382 = vmatpush.bf16.msrb.mxu2 %v2424_v61  ;;  %v2753_v56 = vld [vmem:[%s4077_s1 + $0x404] sm:$0xf] }
  0x90   : > { %1400 = vmatpush.bf16.msrb.mxu3 %v2428_v62  ;;  %v2500_v59 = vor.u32 %v2753_v56, %v2497_v58 }
  0x92   : > { %1224 = vmatpush.bf16.msrb.mxu0 %v2336_v3 }
  0x93   : > { %1242 = vmatpush.bf16.msrb.mxu1 %v2340_v5  ;;  %1383 = vmatpush.bf16.msrb.mxu2 %v2416_v8 }
  0x94   : > { %1401 = vmatpush.bf16.msrb.mxu3 %v2420_v46 }
  0x96   : > { %1520 = vmatpush.bf16.msra.mxu0 %v2552_v6  ;;  %1384 = vmatmul.bf16.vlgmr.msrb.gmra.mxu2 %v3746_v12 }
  0x97   : > { %1538 = vmatpush.bf16.msra.mxu1 %v2556_v11 }
  0x98   : > { %1225 = vmatmul.bf16.vlgmr.msrb.gmra.mxu0 %v3709_v57 }
  0x99   : > { %1402 = vmatmul.bf16.vlgmr.msrb.gmra.mxu3 %v3746_v12  ;;  %1243 = vmatmul.bf16.vlgmr.msrb.gmra.mxu1 %v3709_v57  ;;  %v2532_v12 = vor.u32 %v2761_v28, %v2529_v29  ;;  %v2758_v57 = vld [vmem:[%s4077_s1 + $0x424] sm:$0xf0] }
  0x9a   : > { %1521 = vmatpush.bf16.msra.mxu0 %v2544_v13  ;;  %v2512_v37 = vor.u32 %v2758_v57, %v2511_v35 }
  0x9b   : > { %1539 = vmatpush.bf16.msra.mxu1 %v2548_v15 }
  0x9e   : > { %1522 = vmatpush.bf16.msra.mxu0 %v2536_v17 }
  0x9f   : > { %1540 = vmatpush.bf16.msra.mxu1 %v2540_v23 }
  0xa2   : > { %1523 = vmatpush.bf16.msra.mxu0 %v2528_v26 }
  0xa3   : > { %1541 = vmatpush.bf16.msra.mxu1 %v2532_v12 }
  0xa6   : > { %1524 = vmatpush.bf16.msra.mxu0 %v2520_v32  ;;  %1389 = vmatmul.bf16.gmra.mxu2 %v3731_v7 }
  0xa7   : > { %1542 = vmatpush.bf16.msra.mxu1 %v2524_v36 }
  0xa8   : > { %1230 = vmatmul.bf16.gmra.mxu0 %v3693_v48 }
  0xa9   : > { %1407 = vmatmul.bf16.gmra.mxu3 %v3731_v7  ;;  %1248 = vmatmul.bf16.gmra.mxu1 %v3693_v48 }
  0xaa   : > { %1525 = vmatpush.bf16.msra.mxu0 %v2512_v37 }
  0xab   : > { %1543 = vmatpush.bf16.msra.mxu1 %v2516_v39 }
  0xae   : > { %1526 = vmatpush.bf16.msra.mxu0 %v2504_v49 }
  0xaf   : > { %1544 = vmatpush.bf16.msra.mxu1 %v2508_v54 }
  0xb2   : > { %1527 = vmatpush.bf16.msra.mxu0 %v2496_v55 }
  0xb3   : > { %1545 = vmatpush.bf16.msra.mxu1 %v2500_v59 }
  0xb5   : > { %v376_v60 = vpop.f32.mrf.mxu0 }
  0xb6   : > { %v394_v7 = vpop.f32.mrf.mxu1 }
  0xb8   : > { %1528 = vmatmul.bf16.vlgmr.msra.gmra.mxu0 %v1437_v16 }
  0xb9   : > { %1546 = vmatmul.bf16.vlgmr.msra.gmra.mxu1 %v1437_v16  ;;  %v494_v61 = vpop.f32.mrf.mxu2 }
  0xba   : > { %v495_v62 = vadd.f32 %v494_v61, %v376_v60 }
  0xbc   : > { %v512_v63 = vpop.f32.mrf.mxu3 }
  0xbd   : > { %v513_v0 = vadd.f32 %v512_v63, %v394_v7  ;;  %v378_v1 = vpop.f32.mrf.mxu0  ;;  %v2776_v63 = vld [vmem:[%s4079_s3 + $0x38] sm:$0xff] }
  0xbe   : > { %v396_v30 = vpop.f32.mrf.mxu1  ;;  %1745 = vmatpush.bf16.msra.mxu2 %v2776_v63 }
  0xc1   : > { %v496_v43 = vpop.f32.mrf.mxu2 }
  0xc2   : > { %v497_v2 = vadd.f32 %v496_v43, %v378_v1 }
  0xc4   : > { %v514_v3 = vpop.f32.mrf.mxu3 }
  0xc5   : > { %v515_v4 = vadd.f32 %v514_v3, %v396_v30  ;;  %v381_v22 = vpop.f32.mrf.mxu0  ;;  %v2775_v3 = vld [vmem:[%s4079_s3 + $0x30] sm:$0xff] }
  0xc6   : > { %v399_v48 = vpop.f32.mrf.mxu1  ;;  %1746 = vmatpush.bf16.msra.mxu2 %v2775_v3 }
  0xc8   : > { %1533 = vmatmul.bf16.gmra.mxu0 %v3890_v25 }
  0xc9   : > { %1551 = vmatmul.bf16.gmra.mxu1 %v3890_v25  ;;  %v499_v5 = vpop.f32.mrf.mxu2 }
  0xca   : > { %v500_v6 = vadd.f32 %v499_v5, %v381_v22  ;;  %v2774_v5 = vld [vmem:[%s4079_s3 + $0x28] sm:$0xff] }
  0xcb   : > { %1747 = vmatpush.bf16.msra.mxu2 %v2774_v5 }
  0xcc   : > { %v517_v8 = vpop.f32.mrf.mxu3 }
  0xcd   : > { %v518_v46 = vadd.f32 %v517_v8, %v399_v48  ;;  %v383_v44 = vpop.f32.mrf.mxu0 }
  0xce   : > { %v401_v10 = vpop.f32.mrf.mxu1  ;;  %v2773_v44 = vld [vmem:[%s4079_s3 + $0x20] sm:$0xff] }
  0xcf   : > { %v2781_v10 = vld [vmem:[%s4079_s3 + $0x60] sm:$0xff]  ;;  %1748 = vmatpush.bf16.msra.mxu2 %v2773_v44 }
  0xd1   : > { %v501_v11 = vpop.f32.mrf.mxu2 }
  0xd4   : > { %v519_v27 = vpop.f32.mrf.mxu3 }
  0xd5   : > { %v633_v42 = vpop.f32.mrf.mxu0 }
  0xd6   : > { %v651_v13 = vpop.f32.mrf.mxu1  ;;  %v660_v40 = vadd.f32 %v633_v42, %v495_v62  ;;  %v2772_v42 = vld [vmem:[%s4079_s3 + $0x18] sm:$0xff] }
  0xd7   : > { %v661_v14 = vadd.f32 %v651_v13, %v513_v0  ;;  %v2784_v0 = vld [vmem:[%s4079_s3 + $0x78] sm:$0xff]  ;;  %1749 = vmatpush.bf16.msra.mxu2 %v2772_v42 }
  0xd8   : > { %1758 = vmatpush.bf16.msra.mxu3 %v2784_v0  ;;  %v2780_v13 = vld [vmem:[%s4079_s3 + $0x58] sm:$0xff] }
  0xd9   : > { %v781_v15 = vpop.f32.mrf.mxu2 }
  0xda   : > { %v808_v17 = vadd.f32 %v781_v15, %v660_v40  ;;  %v2771_v15 = vld [vmem:[%s4079_s3 + $0x10] sm:$0xff] }
  0xdb   : > { %1750 = vmatpush.bf16.msra.mxu2 %v2771_v15 }
  0xdc   : > { %v799_v18 = vpop.f32.mrf.mxu3 }
  0xdd   : > { %v809_v19 = vadd.f32 %v799_v18, %v661_v14  ;;  %v635_v20 = vpop.f32.mrf.mxu0 }
  0xde   : > { %v653_v21 = vpop.f32.mrf.mxu1  ;;  %v662_v23 = vadd.f32 %v635_v20, %v497_v2  ;;  %v2770_v20 = vld [vmem:[%s4079_s3 + $0x8] sm:$0xff] }
  0xdf   : > { %v663_v24 = vadd.f32 %v653_v21, %v515_v4  ;;  %v2783_v4 = vld [vmem:[%s4079_s3 + $0x70] sm:$0xff]  ;;  %v2778_v21 = vld [vmem:[%s4079_s3 + $0x48] sm:$0xff]  ;;  %1751 = vmatpush.bf16.msra.mxu2 %v2770_v20 }
  0xe0   : > { %1759 = vmatpush.bf16.msra.mxu3 %v2783_v4 }
  0xe1   : > { %v783_v25 = vpop.f32.mrf.mxu2 }
  0xe2   : > { %v3957_v26 = vadd.f32 %v783_v25, %v662_v23  ;;  %v2769_v25 = vld [vmem:[%s4079_s3] sm:$0xff] }
  0xe3   : > { %1752 = vmatpush.bf16.msra.mxu2 %v2769_v25 }
  0xe4   : > { %v801_v28 = vpop.f32.mrf.mxu3 }
  0xe5   : > { %v3959_v29 = vadd.f32 %v801_v28, %v663_v24  ;;  %v638_v31 = vpop.f32.mrf.mxu0  ;;  %v2777_v28 = vld [vmem:[%s4079_s3 + $0x40] sm:$0xff] }
  0xe6   : > { %v656_v9 = vpop.f32.mrf.mxu1  ;;  %v664_v16 = vadd.f32 %v638_v31, %v500_v6  ;;  %v2782_v6 = vld [vmem:[%s4079_s3 + $0x68] sm:$0xff] }
  0xe7   : > { %v665_v12 = vadd.f32 %v656_v9, %v518_v46  ;;  %1760 = vmatpush.bf16.msra.mxu3 %v2782_v6 }
  0xe9   : > { %v786_v32 = vpop.f32.mrf.mxu2 }
  0xea   : > { %v3961_v33 = vadd.f32 %v786_v32, %v664_v16 }
  0xeb   : > { %1761 = vmatpush.bf16.msra.mxu3 %v2781_v10 }
  0xec   : > { %v804_v34 = vpop.f32.mrf.mxu3 }
  0xed   : > { %v3963_v35 = vadd.f32 %v804_v34, %v665_v12  ;;  %v640_v57 = vpop.f32.mrf.mxu0 }
  0xee   : > { %v658_v36 = vpop.f32.mrf.mxu1 }
  0xef   : > { %1762 = vmatpush.bf16.msra.mxu3 %v2780_v13  ;;  %v1562_v36 = vld [vmem:[%s4078_s2] sm:$0x3] }
  0xf1   : > { %v788_v37 = vpop.f32.mrf.mxu2 }
  0xf4   : > { %v806_v38 = vpop.f32.mrf.mxu3 }
  0xf5   : > { %v935_v41 = vpop.f32.mrf.mxu0 }
  0xf6   : > { %v953_v45 = vpop.f32.mrf.mxu1  ;;  %v962_v47 = vadd.f32 %v935_v41, %v808_v17  ;;  %v2779_v17 = vld [vmem:[%s4079_s3 + $0x50] sm:$0xff] }
  0xf7   : > { %v963_v39 = vadd.f32 %v953_v45, %v809_v19  ;;  %1763 = vmatpush.bf16.msra.mxu3 %v2779_v17 }
  0xf9   : > { %v1078_v49 = vpop.f32.mrf.mxu2 }
  0xfa   : > { %v3965_v51 = vadd.f32 %v1078_v49, %v962_v47  ;;  %v1564_v49 = vperm.slane %v1562_v36, 0 }
  0xfb   : > { %1764 = vmatpush.bf16.msra.mxu3 %v2778_v21 }
  0xfc   : > { %v1096_v52 = vpop.f32.mrf.mxu3 }
  0xfd   : > { %v1106_v50 = vadd.f32 %v1096_v52, %v963_v39  ;;  %v937_v53 = vpop.f32.mrf.mxu0  ;;  %v1565_v52 = vperm.slane %v1562_v36, 1  ;;  %v2834_v36 = vld [vmem:[%s4080_s4] ss:$0 sm:$0xff] }
  0xfe   : > { %v955_v54 = vpop.f32.mrf.mxu1  ;;  %v964_v32 = vadd.f32 %v937_v53, %v3957_v26 }
  0xff   : > { %1765 = vmatpush.bf16.msra.mxu3 %v2777_v28  ;;  %v965_v34 = vadd.f32 %v955_v54, %v3959_v29 }
 0x101   : > { %v3967_v55 = vpop.f32.mrf.mxu2 }
 0x102   : > { %v1107_v45 = vadd.f32 %v3967_v55, %v964_v32 }
 0x104   : > { %v3969_v56 = vpop.f32.mrf.mxu3 }
 0x105   : > { %v3971_v58 = vpop.f32.mrf.mxu0  ;;  %v1108_v47 = vadd.f32 %v3969_v56, %v965_v34 }
 0x106   : > { %v3973_v59 = vpop.f32.mrf.mxu1 }
 0x107   : > { %v967_v63 = vadd.f32 %v3973_v59, %v3963_v35 }
 0x109   : > { %v3975_v60 = vpop.f32.mrf.mxu2 }
 0x10c   : > { %v3977_v7 = vpop.f32.mrf.mxu3 }
 0x10d   : > { %v942_v61 = vpop.f32.mrf.mxu0 }
 0x10e   : > { %v960_v62 = vpop.f32.mrf.mxu1 }
 0x10f   : > { %v966_v62 = vadd.f32 %v3971_v58, %v3961_v33 }
 0x111   : > { %v1085_v1 = vpop.f32.mrf.mxu2 }
 0x114   : > { %v1103_v30 = vpop.f32.mrf.mxu3 }
 0x115   : > { %v1226_v43 = vpop.f32.mrf.mxu0  ;;  %v1109_v30 = vadd.f32 %v3975_v60, %v966_v62 }
 0x116   : > { %v1244_v2 = vpop.f32.mrf.mxu1  ;;  %v1253_v16 = vadd.f32 %v1226_v43, %v3965_v51  ;;  %v1110_v43 = vadd.f32 %v3977_v7, %v967_v63 }
 0x117   : > { %v1254_v12 = vadd.f32 %v1244_v2, %v1106_v50 }
 0x119   : > { %v1385_v22 = vpop.f32.mrf.mxu2 }
 0x11a   : > { %v1412_v38 = vadd.f32 %v1385_v22, %v1253_v16 }
 0x11c   : > { %v1403_v48 = vpop.f32.mrf.mxu3 }
 0x11d   : > { %v1228_v8 = vpop.f32.mrf.mxu0  ;;  %v1413_v41 = vadd.f32 %v1403_v48, %v1254_v12 }
 0x11e   : > { %v1246_v46 = vpop.f32.mrf.mxu1  ;;  %v1255_v50 = vadd.f32 %v1228_v8, %v1107_v45 }
 0x11f   : > { %v1256_v26 = vadd.f32 %v1246_v46, %v1108_v47 }
 0x121   : > { %v1387_v11 = vpop.f32.mrf.mxu2 }
 0x122   : > { %v1414_v53 = vadd.f32 %v1387_v11, %v1255_v50 }
 0x124   : > { %v1405_v27 = vpop.f32.mrf.mxu3 }
 0x125   : > { %v1231_v40 = vpop.f32.mrf.mxu0  ;;  %v1415_v29 = vadd.f32 %v1405_v27, %v1256_v26 }
 0x126   : > { %v1249_v14 = vpop.f32.mrf.mxu1  ;;  %v1257_v48 = vadd.f32 %v1231_v40, %v1109_v30 }
 0x127   : > { %v1258_v5 = vadd.f32 %v1249_v14, %v1110_v43 }
 0x129   : > { %v1390_v18 = vpop.f32.mrf.mxu2 }
 0x12a   : > { %v1416_v33 = vadd.f32 %v1390_v18, %v1257_v48 }
 0x12c   : > { %v1408_v19 = vpop.f32.mrf.mxu3 }
 0x12d   : > { %v1233_v23 = vpop.f32.mrf.mxu0  ;;  %v1417_v58 = vadd.f32 %v1408_v19, %v1258_v5 }
 0x12e   : > { %v1251_v24 = vpop.f32.mrf.mxu1 }
 0x131   : > { %v1392_v31 = vpop.f32.mrf.mxu2 }
 0x134   : > { %v1410_v9 = vpop.f32.mrf.mxu3 }
 0x135   : > { %v1529_v57 = vpop.f32.mrf.mxu0 }
 0x136   : > { %v1547_v37 = vpop.f32.mrf.mxu1  ;;  %v1556_v39 = vadd.f32 %v1529_v57, %v1412_v38 }
 0x137   : > { %v1557_v51 = vadd.f32 %v1547_v37, %v1413_v41 }
 0x138   : > { %v1568_v54 = vadd.f32 %v1564_v49, %v1556_v39 }
 0x139   : > { %v1569_v61 = vadd.f32 %v1565_v52, %v1557_v51 }
 0x13a   : > { %v1574_v2 = vmax.f32 %v1568_v54, 0.0 }
 0x13b   : > { %v1575_v3 = vmax.f32 %v1569_v61, 0.0 }
 0x13c   : > { %v1585_v35 = vrot.slane %v1574_v2, 6 }
 0x13d   : > { %v1531_v0 = vpop.f32.mrf.mxu0  ;;  %v1588_v59 = vrot.slane %v1575_v3, 6 }
 0x13e   : > { %v1549_v55 = vpop.f32.mrf.mxu1  ;;  %v1558_v1 = vadd.f32 %v1531_v0, %v1414_v53 }
 0x13f   : > { %v1559_v56 = vadd.f32 %v1549_v55, %v1415_v29 }
 0x140   : > { %v1570_v4 = vadd.f32 %v1564_v49, %v1558_v1 }
 0x141   : > { %v1571_v22 = vadd.f32 %v1565_v52, %v1559_v56 }
 0x142   : > { %v1576_v6 = vmax.f32 %v1570_v4, 0.0 }
 0x143   : > { %v1577_v8 = vmax.f32 %v1571_v22, 0.0 }
 0x144   : > { %v1586_v46 = vrot.slane %v1576_v6, 6  ;;  %v1595_v15 = vrot.slane %v1576_v6, 4 }
 0x145   : > { %v1589_v44 = vrot.slane %v1577_v8, 6  ;;  %v1534_v10 = vpop.f32.mrf.mxu0  ;;  %v1596_v40 = vrot.slane %v1577_v8, 4 }
 0x146   : > { %v1552_v11 = vpop.f32.mrf.mxu1  ;;  %v1587_v60 = vsel %vm1584_vm6, %v1585_v35, %v1586_v46  ;;  %v1560_v7 = vadd.f32 %v1534_v10, %v1416_v33 }
 0x147   : > { %v1590_v27 = vsel %vm1584_vm6, %v1588_v59, %v1589_v44  ;;  %v1561_v42 = vadd.f32 %v1552_v11, %v1417_v58  ;;  %v1593_v13 = vadd.f32 %v1587_v60, %v1574_v2 }
 0x148   : > { %v1594_v17 = vadd.f32 %v1590_v27, %v1575_v3  ;;  %v1572_v14 = vadd.f32 %v1564_v49, %v1560_v7 }
 0x149   : > { %v1573_v20 = vadd.f32 %v1565_v52, %v1561_v42  ;;  %v1599_v21 = vadd.f32 %v1595_v15, %v1593_v13 }
 0x14a   : > { %v1600_v18 = vadd.f32 %v1596_v40, %v1594_v17  ;;  %v1578_v19 = vmax.f32 %v1572_v14, 0.0 }
 0x14b   : > { %v1579_v23 = vmax.f32 %v1573_v20, 0.0 }
 0x14c   : > { %v1603_v24 = vrot.slane %v1578_v19, 2 }
 0x14d   : > { %v1604_v25 = vrot.slane %v1579_v23, 2  ;;  %v1536_v28 = vpop.f32.mrf.mxu0 }
 0x14e   : > { %v1554_v31 = vpop.f32.mrf.mxu1  ;;  %v1607_v9 = vadd.f32 %v1603_v24, %v1599_v21 }
 0x14f   : > { %v1608_v16 = vadd.f32 %v1604_v25, %v1600_v18 }
 0x150   : > { %v1609_v12 = vmul.f32 0.25, %v1607_v9 }
 0x151   : > { %v1610_v32 = vmul.f32 0.25, %v1608_v16 }
 0x152   : > { %v1611_v34 = vpack.c.bf16 %v1609_v12, %v1609_v12 }
 0x153   : > { %v1612_v57 = vpack.c.bf16 %v1610_v32, %v1610_v32 }
 0x154   : > { %1753 = vmatmul.bf16.vlgmr.msra.gmra.mxu2 %v1611_v34 }
 0x155   : > { %1766 = vmatmul.bf16.vlgmr.msra.gmra.mxu3 %v1612_v57 }
 0x1d7   : > { %v1754_v37 = vpop.f32.mrf.mxu2 }
 0x1d8   : > { %v1767_v38 = vpop.f32.mrf.mxu3  ;;  %v1755_v41 = vadd.f32 %v2834_v36, %v1754_v37 }
 0x1da   : > { %v1768_v45 = vadd.f32 %v1767_v38, %v1755_v41 }
 0x1dc   : > { %1771 = vst [vmem:[%s217_s26] sm:$0xf] %v1768_v45 }
 0x1dd   : > { %2862 = shalt.err (!%p2859_p3)
}
 0x1de   : > { %2795 = dma.vmem_to_hbm [thread:$0]  (%p2967_p5), %s1786_s30, 64, %s1788_s7, %s1773_s22  }
 0x1df   : > { %v1756_v47 = vpop.f32.mrf.mxu2 }
 0x1e0   : > { %v1769_v39 = vpop.f32.mrf.mxu3 }
 0x1e1 PF: > { %p2801_p4 = scmp.ge.s32.totalorder %s2897_s21, 2  ;;  %s1799_s12 = sand.u32 1, %s2885_s18  }
 0x1e2   : > { %s1800_s16 = scalar_lea.sflag [#allocation3], %s1799_s12 }
 0x1e3   : > { %p2798_p7 = pnand %p2801_p4, %p2971_p6 }
 0x1e5   : > { %p2799_p8 = pneg %p2798_p7 }
 0x1e7   : > { %2880 = dma.done.wait (%p2799_p8), %s1800_s16, 64  }
 0x1e8   : > { %2882 = vsyncadd (%p2799_p8), %s1800_s16, 4294967232  ;;  %p15_p5 = scmp.ge.s32.totalorder %s2954_s24, 4   ;;  %s4084_s18 = smov %s2889_s19 }
 0x1e9   : > { %s4085_s19 = smov %s2893_s20  ;;  %s4086_s20 = smov %s2965_s27 }
 0x1ea   : > { %s4087_s21 = smov %s2954_s24  ;;  %17 = sbr.rel (!%p15_p5) target bundleno = 3 (0x3), region = 83 }
 0x1ef   :  { %1806 = vsyncpa [#allocation3], 1 }
 0x1f0   :  { %1808 = vsyncpa [#allocation3 + $0x1], 1 }

</bundles_post_ra>
